<compile_context>
chip_gen: v6e
topology: v6e:2x2x1
jax: 0.10.0
libtpu: 0.0.40
codegen_flags: <defaults>
</compile_context>

<pallas_src>
import jax
import jax.numpy as jnp
from jax.experimental import pallas as pl
from jax.experimental.pallas import tpu as pltpu

PATCH = 8              # 56 / 8 = 7  ->  7x7 feature map, matching avg_pool2d(7)
N_FEATURES = 128       # n_features fed to dense1 (constructor arg of Net)
HIDDEN = 128           # stand-in backbone width
ROWS_PER_IMG = 49      # 7*7 spatial positions after the stem
IMG_TILE = 16          # images per grid block -> 16*49 = 784 rows (mult. of 16)
OUT_LANES = 128        # pad the 1-wide classifier output to a lane-dense store


# ------------------------------ fused kernel --------------------------------

def _net_kernel(x_ref, w0_ref, b0_ref, w1_ref, b1_ref, w2_ref, b2_ref,
                pool_ref, wh_ref, bh_ref, o_ref):
    """One grid block = IMG_TILE images (784 bf16 patch rows), fully VMEM-resident."""
    # Stand-in backbone: lane-dense linear+ReLU channel mixers.  MXU operands
    # are bf16; accumulation and elementwise math stay f32.
    h = jnp.dot(x_ref[...], w0_ref[...], preferred_element_type=jnp.float32)
    h = jnp.maximum(h + b0_ref[...], 0.0).astype(jnp.bfloat16)
    h = jnp.dot(h, w1_ref[...], preferred_element_type=jnp.float32)
    h = jnp.maximum(h + b1_ref[...], 0.0).astype(jnp.bfloat16)
    f = jnp.dot(h, w2_ref[...], preferred_element_type=jnp.float32)
    f = jnp.maximum(f + b2_ref[...], 0.0)            # (IMG_TILE*49, n_features) f32

    # F.avg_pool2d(x, 7) + view(N, -1): per-image mean over the 49 patch rows,
    # as a constant (IMG_TILE, IMG_TILE*49) block-diagonal 1/49 matmul —
    # block-local and O(1) in batch size (replaces the old O(N^2) pmat).
    pooled = jnp.dot(pool_ref[...], f, preferred_element_type=jnp.float32)

    # dense1 -> dense2 -> classif collapsed at setup time (exact: no
    # nonlinearity between them), padded to 128 output lanes so both the MXU
    # op and the output store are lane-dense.
    logit = jnp.dot(pooled, wh_ref[...], preferred_element_type=jnp.float32) + bh_ref[...]
    o_ref[...] = jax.nn.sigmoid(logit)               # (IMG_TILE, 128); column 0 is real


# ------------------------------ wrappers -------------------------------------

def patchify(x_nchw, patch=PATCH):
    """NCHW -> (N*(H/p)*(W/p), p*p*C) patch rows (layout glue; fusible into the
    pallas_call input via allow_input_fusion)."""
    n, c, h, w = x_nchw.shape
    x = jnp.transpose(x_nchw, (0, 2, 3, 1))                       # NHWC
    x = x.reshape(n, h // patch, patch, w // patch, patch, c)
    x = jnp.transpose(x, (0, 1, 3, 2, 4, 5))                      # (N,7,7,p,p,C)
    return x.reshape(n * (h // patch) * (w // patch), patch * patch * c)


def prepare_net_params(backbone_params, head_params, n_features=N_FEATURES):
    """One-time parameter preprocessing (hoisted out of the per-call path)."""
    (w0, b0), (w1, b1), (w2, b2) = backbone_params
    hw1, hb1, hw2, hb2, hw3, hb3 = head_params

    # Exact collapse of the affine head chain (no activation between layers).
    wh = hw1 @ hw2 @ hw3                                          # (n_features, 1)
    bh = (hb1 @ hw2 + hb2) @ hw3 + hb3                            # (1,)
    wh_pad = jnp.zeros((n_features, OUT_LANES), jnp.float32).at[:, 0].set(wh[:, 0])
    bh_pad = jnp.zeros((1, OUT_LANES), jnp.float32).at[0, 0].set(bh[0])

    # Constant per-block pooling matrix (independent of batch size).
    pool = jnp.repeat(jnp.eye(IMG_TILE, dtype=jnp.float32),
                      ROWS_PER_IMG, axis=1) / float(ROWS_PER_IMG)  # (16, 784)

    return dict(
        w0=w0.astype(jnp.bfloat16), b0=b0.reshape(1, -1).astype(jnp.float32),
        w1=w1.astype(jnp.bfloat16), b1=b1.reshape(1, -1).astype(jnp.float32),
        w2=w2.astype(jnp.bfloat16), b2=b2.reshape(1, -1).astype(jnp.float32),
        pool=pool, wh=wh_pad, bh=bh_pad)


def net_forward(x_nchw, params):
    n = x_nchw.shape[0]
    n_pad = ((n + IMG_TILE - 1) // IMG_TILE) * IMG_TILE
    rows = IMG_TILE * ROWS_PER_IMG

    patches = patchify(x_nchw)                                    # (N*49, 192)
    if n_pad != n:
        patches = jnp.pad(patches, ((0, (n_pad - n) * ROWS_PER_IMG), (0, 0)))
    patches = patches.astype(jnp.bfloat16)                        # halve input DMA
    patch_dim = patches.shape[1]
    n_features = params["wh"].shape[0]
    hidden = params["w1"].shape[0]

    grid_spec = pltpu.PrefetchScalarGridSpec(
        num_scalar_prefetch=0,
        grid=(n_pad // IMG_TILE,),
        in_specs=[
            pl.BlockSpec((rows, patch_dim), lambda i: (i, 0)),        # patches (per block)
            pl.BlockSpec((patch_dim, hidden), lambda i: (0, 0)),      # w0 (resident)
            pl.BlockSpec((1, hidden), lambda i: (0, 0)),              # b0
            pl.BlockSpec((hidden, hidden), lambda i: (0, 0)),         # w1
            pl.BlockSpec((1, hidden), lambda i: (0, 0)),              # b1
            pl.BlockSpec((hidden, n_features), lambda i: (0, 0)),     # w2
            pl.BlockSpec((1, n_features), lambda i: (0, 0)),          # b2
            pl.BlockSpec((IMG_TILE, rows), lambda i: (0, 0)),         # pool (constant)
            pl.BlockSpec((n_features, OUT_LANES), lambda i: (0, 0)),  # collapsed head W
            pl.BlockSpec((1, OUT_LANES), lambda i: (0, 0)),           # collapsed head b
        ],
        out_specs=pl.BlockSpec((IMG_TILE, OUT_LANES), lambda i: (i, 0)),
    )

    out = pl.pallas_call(
        _net_kernel,
        out_shape=jax.ShapeDtypeStruct((n_pad, OUT_LANES), jnp.float32),
        grid_spec=grid_spec,
        compiler_params=pltpu.CompilerParams(
            dimension_semantics=("parallel",),       # v7x: image blocks split across both TCs
            vmem_limit_bytes=32 * 1024 * 1024,       # sized against v7x's 64 MiB physical VMEM
            allow_input_fusion=[0],                  # fuse patchify into the kernel input
        ),
    )(patches, params["w0"], params["b0"], params["w1"], params["b1"],
      params["w2"], params["b2"], params["pool"], params["wh"], params["bh"])

    return out[:n, :1]                               # drop lane padding + batch padding


# ------------------------------ parameters -----------------------------------

def init_params(key, n_features=N_FEATURES, in_ch=3, patch=PATCH):
    def lin(k, fan_in, fan_out, scale=0.1):
        kw, kb = jax.random.split(k)
        w = jax.random.normal(kw, (fan_in, fan_out), jnp.float32) * scale
        b = jax.random.normal(kb, (fan_out,), jnp.float32) * scale
        return w, b

    keys = jax.random.split(key, 6)
    patch_dim = patch * patch * in_ch                    # 192
    backbone = [lin(keys[0], patch_dim, HIDDEN),
                lin(keys[1], HIDDEN, HIDDEN),
                lin(keys[2], HIDDEN, n_features)]
    w1, b1 = lin(keys[3], n_features, 128)               # dense1
    w2, b2 = lin(keys[4], 128, 64)                       # dense2
    w3, b3 = lin(keys[5], 64, 1)                         # classif
    return backbone, (w1, b1, w2, b2, w3, b3)


# --------------------------------- main ---------------------------------------

if __name__ == "__main__":
    key = jax.random.PRNGKey(0)
    kx, kp = jax.random.split(key)
    x = jax.random.normal(kx, (2, 3, 56, 56), jnp.float32)   # NCHW like PyTorch
    backbone, head = init_params(kp)
    params = prepare_net_params(backbone, head)              # one-time prep (hoisted)

    fwd = jax.jit(net_forward)
    out = jax.block_until_ready(fwd(x, params))

    # Pure-JAX reference with the original (un-collapsed) module semantics:
    # avg_pool2d(7) -> flatten -> dense1 -> dense2 -> classif -> sigmoid,
    # using the same bf16-MXU-operand / f32-elementwise precision as the kernel.
    def ref_forward(x_nchw):
        (w0, b0), (w1, b1), (w2, b2) = backbone
        n = x_nchw.shape[0]
        h = patchify(x_nchw).astype(jnp.bfloat16)
        h = jnp.dot(h, w0.astype(jnp.bfloat16), preferred_element_type=jnp.float32)
        h = jnp.maximum(h + b0, 0.0).astype(jnp.bfloat16)
        h = jnp.dot(h, w1.astype(jnp.bfloat16), preferred_element_type=jnp.float32)
        h = jnp.maximum(h + b1, 0.0).astype(jnp.bfloat16)
        f = jnp.dot(h, w2.astype(jnp.bfloat16), preferred_element_type=jnp.float32)
        f = jnp.maximum(f + b2, 0.0)
        pooled = jnp.mean(f.reshape(n, 7, 7, -1), axis=(1, 2))   # avg_pool2d(7) + view
        hw1, hb1, hw2, hb2, hw3, hb3 = head
        h1 = pooled @ hw1 + hb1
        h2 = h1 @ hw2 + hb2
        return jax.nn.sigmoid(h2 @ hw3 + hb3)

    ref = jax.block_until_ready(ref_forward(x))
    assert out.shape == (2, 1), out.shape
    assert jnp.allclose(out, ref, atol=1e-4, rtol=1e-4), (out, ref)
    print("KERNEL_OK")
</pallas_src>

<mosaic_0001>
module attributes {stable_mosaic.version = 11 : i64} {
  func.func @_net_kernel(%arg0: i32, %arg1: memref<784x192xbf16, #tpu.memory_space<vmem>>, %arg2: memref<192x128xbf16, #tpu.memory_space<vmem>>, %arg3: memref<1x128xf32, #tpu.memory_space<vmem>>, %arg4: memref<128x128xbf16, #tpu.memory_space<vmem>>, %arg5: memref<1x128xf32, #tpu.memory_space<vmem>>, %arg6: memref<128x128xbf16, #tpu.memory_space<vmem>>, %arg7: memref<1x128xf32, #tpu.memory_space<vmem>>, %arg8: memref<16x784xf32, #tpu.memory_space<vmem>>, %arg9: memref<128x128xf32, #tpu.memory_space<vmem>>, %arg10: memref<1x128xf32, #tpu.memory_space<vmem>>, %arg11: memref<16x128xf32, #tpu.memory_space<vmem>>) attributes {dimension_semantics = [#tpu.dimension_semantics<parallel>], iteration_bounds = array<i64: 1>, scalar_prefetch = 0 : i64, scratch_operands = 0 : i64, tpu.core_type = #tpu.core_type<tc>, window_params = [{transform_indices = @transform_0, window_bounds = array<i64: 784, 192>}, {pipeline_mode = #tpu.pipeline_mode<synchronous>, transform_indices = @transform_1, window_bounds = array<i64: 192, 128>}, {pipeline_mode = #tpu.pipeline_mode<synchronous>, transform_indices = @transform_2, window_bounds = array<i64: 1, 128>}, {pipeline_mode = #tpu.pipeline_mode<synchronous>, transform_indices = @transform_3, window_bounds = array<i64: 128, 128>}, {pipeline_mode = #tpu.pipeline_mode<synchronous>, transform_indices = @transform_4, window_bounds = array<i64: 1, 128>}, {pipeline_mode = #tpu.pipeline_mode<synchronous>, transform_indices = @transform_5, window_bounds = array<i64: 128, 128>}, {pipeline_mode = #tpu.pipeline_mode<synchronous>, transform_indices = @transform_6, window_bounds = array<i64: 1, 128>}, {pipeline_mode = #tpu.pipeline_mode<synchronous>, transform_indices = @transform_7, window_bounds = array<i64: 16, 784>}, {pipeline_mode = #tpu.pipeline_mode<synchronous>, transform_indices = @transform_8, window_bounds = array<i64: 128, 128>}, {pipeline_mode = #tpu.pipeline_mode<synchronous>, transform_indices = @transform_9, window_bounds = array<i64: 1, 128>}, {transform_indices = @transform_10, window_bounds = array<i64: 16, 128>}]} {
    %c0 = arith.constant 0 : index
    %c0_0 = arith.constant 0 : index
    %0 = vector.load %arg1[%c0, %c0_0] : memref<784x192xbf16, #tpu.memory_space<vmem>>, vector<784x192xbf16>
    %c0_1 = arith.constant 0 : index
    %c0_2 = arith.constant 0 : index
    %1 = vector.load %arg2[%c0_1, %c0_2] : memref<192x128xbf16, #tpu.memory_space<vmem>>, vector<192x128xbf16>
    %cst = arith.constant dense<0.000000e+00> : vector<784x128xf32>
    %2 = tpu.matmul %0, %1, %cst {dimension_numbers = #tpu.dot_dimension_numbers<[1], [0], [0], [1], [0, 0, 1, 1], [], []>} : vector<784x192xbf16>, vector<192x128xbf16>, vector<784x128xf32> -> vector<784x128xf32>
    %c0_3 = arith.constant 0 : index
    %c0_4 = arith.constant 0 : index
    %3 = vector.load %arg3[%c0_3, %c0_4] : memref<1x128xf32, #tpu.memory_space<vmem>>, vector<1x128xf32>
    %4 = vector.broadcast %3 : vector<1x128xf32> to vector<784x128xf32>
    %5 = arith.addf %2, %4 : vector<784x128xf32>
    %cst_5 = arith.constant 0.000000e+00 : f32
    %6 = vector.broadcast %cst_5 : f32 to vector<784x128xf32>
    %7 = arith.maximumf %5, %6 : vector<784x128xf32>
    %8 = arith.truncf %7 : vector<784x128xf32> to vector<784x128xbf16>
    %c0_6 = arith.constant 0 : index
    %c0_7 = arith.constant 0 : index
    %9 = vector.load %arg4[%c0_6, %c0_7] : memref<128x128xbf16, #tpu.memory_space<vmem>>, vector<128x128xbf16>
    %cst_8 = arith.constant dense<0.000000e+00> : vector<784x128xf32>
    %10 = tpu.matmul %8, %9, %cst_8 {dimension_numbers = #tpu.dot_dimension_numbers<[1], [0], [0], [1], [0, 0, 1, 1], [], []>} : vector<784x128xbf16>, vector<128x128xbf16>, vector<784x128xf32> -> vector<784x128xf32>
    %c0_9 = arith.constant 0 : index
    %c0_10 = arith.constant 0 : index
    %11 = vector.load %arg5[%c0_9, %c0_10] : memref<1x128xf32, #tpu.memory_space<vmem>>, vector<1x128xf32>
    %12 = vector.broadcast %11 : vector<1x128xf32> to vector<784x128xf32>
    %13 = arith.addf %10, %12 : vector<784x128xf32>
    %cst_11 = arith.constant 0.000000e+00 : f32
    %14 = vector.broadcast %cst_11 : f32 to vector<784x128xf32>
    %15 = arith.maximumf %13, %14 : vector<784x128xf32>
    %16 = arith.truncf %15 : vector<784x128xf32> to vector<784x128xbf16>
    %c0_12 = arith.constant 0 : index
    %c0_13 = arith.constant 0 : index
    %17 = vector.load %arg6[%c0_12, %c0_13] : memref<128x128xbf16, #tpu.memory_space<vmem>>, vector<128x128xbf16>
    %cst_14 = arith.constant dense<0.000000e+00> : vector<784x128xf32>
    %18 = tpu.matmul %16, %17, %cst_14 {dimension_numbers = #tpu.dot_dimension_numbers<[1], [0], [0], [1], [0, 0, 1, 1], [], []>} : vector<784x128xbf16>, vector<128x128xbf16>, vector<784x128xf32> -> vector<784x128xf32>
    %c0_15 = arith.constant 0 : index
    %c0_16 = arith.constant 0 : index
    %19 = vector.load %arg7[%c0_15, %c0_16] : memref<1x128xf32, #tpu.memory_space<vmem>>, vector<1x128xf32>
    %20 = vector.broadcast %19 : vector<1x128xf32> to vector<784x128xf32>
    %21 = arith.addf %18, %20 : vector<784x128xf32>
    %cst_17 = arith.constant 0.000000e+00 : f32
    %22 = vector.broadcast %cst_17 : f32 to vector<784x128xf32>
    %23 = arith.maximumf %21, %22 : vector<784x128xf32>
    %c0_18 = arith.constant 0 : index
    %c0_19 = arith.constant 0 : index
    %24 = vector.load %arg8[%c0_18, %c0_19] : memref<16x784xf32, #tpu.memory_space<vmem>>, vector<16x784xf32>
    %cst_20 = arith.constant dense<0.000000e+00> : vector<16x128xf32>
    %25 = tpu.matmul %24, %23, %cst_20 {dimension_numbers = #tpu.dot_dimension_numbers<[1], [0], [0], [1], [0, 0, 1, 1], [], []>} : vector<16x784xf32>, vector<784x128xf32>, vector<16x128xf32> -> vector<16x128xf32>
    %c0_21 = arith.constant 0 : index
    %c0_22 = arith.constant 0 : index
    %26 = vector.load %arg9[%c0_21, %c0_22] : memref<128x128xf32, #tpu.memory_space<vmem>>, vector<128x128xf32>
    %cst_23 = arith.constant dense<0.000000e+00> : vector<16x128xf32>
    %27 = tpu.matmul %25, %26, %cst_23 {dimension_numbers = #tpu.dot_dimension_numbers<[1], [0], [0], [1], [0, 0, 1, 1], [], []>} : vector<16x128xf32>, vector<128x128xf32>, vector<16x128xf32> -> vector<16x128xf32>
    %c0_24 = arith.constant 0 : index
    %c0_25 = arith.constant 0 : index
    %28 = vector.load %arg10[%c0_24, %c0_25] : memref<1x128xf32, #tpu.memory_space<vmem>>, vector<1x128xf32>
    %29 = vector.broadcast %28 : vector<1x128xf32> to vector<16x128xf32>
    %30 = arith.addf %27, %29 : vector<16x128xf32>
    %31 = arith.negf %30 : vector<16x128xf32>
    %32 = math.exp %31 : vector<16x128xf32>
    %cst_26 = arith.constant 1.000000e+00 : f32
    %33 = vector.broadcast %cst_26 : f32 to vector<16x128xf32>
    %34 = arith.addf %33, %32 : vector<16x128xf32>
    %35 = arith.divf %33, %34 : vector<16x128xf32>
    %c0_27 = arith.constant 0 : index
    %c0_28 = arith.constant 0 : index
    %36 = vector.load %arg11[%c0_27, %c0_28] : memref<16x128xf32, #tpu.memory_space<vmem>>, vector<16x128xf32>
    tpu.vector_store %arg11[%c0_27, %c0_28], %35 {strides = array<i32>} : memref<16x128xf32, #tpu.memory_space<vmem>>, vector<16x128xf32>,
    return
  }
  func.func @transform_0(%arg0: i32) -> (i32, i32) {
    %c0_i32 = arith.constant 0 : i32
    %c0_i32_0 = arith.constant 0 : i32
    return %arg0, %c0_i32 : i32, i32
  }
  func.func @transform_1(%arg0: i32) -> (i32, i32) {
    %c0_i32 = arith.constant 0 : i32
    %c0_i32_0 = arith.constant 0 : i32
    %c0_i32_1 = arith.constant 0 : i32
    return %c0_i32, %c0_i32_0 : i32, i32
  }
  func.func @transform_2(%arg0: i32) -> (i32, i32) {
    %c0_i32 = arith.constant 0 : i32
    %c0_i32_0 = arith.constant 0 : i32
    %c0_i32_1 = arith.constant 0 : i32
    return %c0_i32, %c0_i32_0 : i32, i32
  }
  func.func @transform_3(%arg0: i32) -> (i32, i32) {
    %c0_i32 = arith.constant 0 : i32
    %c0_i32_0 = arith.constant 0 : i32
    %c0_i32_1 = arith.constant 0 : i32
    return %c0_i32, %c0_i32_0 : i32, i32
  }
  func.func @transform_4(%arg0: i32) -> (i32, i32) {
    %c0_i32 = arith.constant 0 : i32
    %c0_i32_0 = arith.constant 0 : i32
    %c0_i32_1 = arith.constant 0 : i32
    return %c0_i32, %c0_i32_0 : i32, i32
  }
  func.func @transform_5(%arg0: i32) -> (i32, i32) {
    %c0_i32 = arith.constant 0 : i32
    %c0_i32_0 = arith.constant 0 : i32
    %c0_i32_1 = arith.constant 0 : i32
    return %c0_i32, %c0_i32_0 : i32, i32
  }
  func.func @transform_6(%arg0: i32) -> (i32, i32) {
    %c0_i32 = arith.constant 0 : i32
    %c0_i32_0 = arith.constant 0 : i32
    %c0_i32_1 = arith.constant 0 : i32
    return %c0_i32, %c0_i32_0 : i32, i32
  }
  func.func @transform_7(%arg0: i32) -> (i32, i32) {
    %c0_i32 = arith.constant 0 : i32
    %c0_i32_0 = arith.constant 0 : i32
    %c0_i32_1 = arith.constant 0 : i32
    return %c0_i32, %c0_i32_0 : i32, i32
  }
  func.func @transform_8(%arg0: i32) -> (i32, i32) {
    %c0_i32 = arith.constant 0 : i32
    %c0_i32_0 = arith.constant 0 : i32
    %c0_i32_1 = arith.constant 0 : i32
    return %c0_i32, %c0_i32_0 : i32, i32
  }
  func.func @transform_9(%arg0: i32) -> (i32, i32) {
    %c0_i32 = arith.constant 0 : i32
    %c0_i32_0 = arith.constant 0 : i32
    %c0_i32_1 = arith.constant 0 : i32
    return %c0_i32, %c0_i32_0 : i32, i32
  }
  func.func @transform_10(%arg0: i32) -> (i32, i32) {
    %c0_i32 = arith.constant 0 : i32
    %c0_i32_0 = arith.constant 0 : i32
    return %arg0, %c0_i32 : i32, i32
  }
}

</mosaic_0001>

<bundles_post_ra>
// kernel: net_forward.1
= control target key start
LH: loop header
LB: loop body
LE: loop exit
PB: predicated region body
PF: predicated region fallthrough
CT: control target
= control target key end

     0   :  { %v4175_v0 = vmov 0   ;;  %v4176_v2 = vmov 0.0   ;;  %vm678_vm0 = vcmask 523264   ;;  %vm4177_vm1 = vmmov 0   ;;  %s5623_s1 = inlined_call_operand.vmem [shape: bf16[192,128], index: 1, kind: input, shape index: {}]   ;;  %s5624_s0 = inlined_call_operand.vmem [shape: bf16[784,192], index: 0, kind: input, shape index: {}]   ;;  %s5625_s3 = inlined_call_operand.vmem [shape: bf16[128,128], index: 3, kind: input, shape index: {}]   ;;  %s5626_s2 = inlined_call_operand.vmem [shape: f32[1,128], index: 2, kind: input, shape index: {}]   ;;  %s5627_s5 = inlined_call_operand.vmem [shape: bf16[128,128], index: 5, kind: input, shape index: {}]   ;;  %s5628_s4 = inlined_call_operand.vmem [shape: f32[1,128], index: 4, kind: input, shape index: {}]   ;;  %s5629_s6 = inlined_call_operand.vmem [shape: f32[1,128], index: 6, kind: input, shape index: {}]   ;;  %s5630_s7 = inlined_call_operand.vmem [shape: f32[16,784], index: 7, kind: input, shape index: {}]   ;;  %s5631_s8 = inlined_call_operand.vmem [shape: f32[128,128], index: 8, kind: input, shape index: {}]   ;;  %s5632_s9 = inlined_call_operand.vmem [shape: f32[1,128], index: 9, kind: input, shape index: {}]   ;;  %s5633_s10 = inlined_call_operand.vmem [shape: f32[16,128], index: 10, kind: output, shape index: {}]  }
   0x1   :  { %826 = vmatprep.subr.bf16.mxu0 %v4175_v0  ;;  %v3990_v1 = vld [vmem:[%s5623_s1 + $0x38] sm:$0xff]   ;;  %3971 = vmatprep.subr.bf16.mxu1 %v4176_v2  ;;  %v3991_v3 = vld [vmem:[%s5623_s1 + $0x30] sm:$0xff]   ;;  %v3992_v4 = vld [vmem:[%s5623_s1 + $0x28] sm:$0xff]   ;;  %vm2649_vm2 = vcmask 130048  }
   0x2   :  { %827 = vmatpush1.bf16.msra.mxu0 %v3990_v1  ;;  %v3993_v5 = vld [vmem:[%s5623_s1 + $0x20] sm:$0xff]   ;;  %v3994_v6 = vld [vmem:[%s5623_s1 + $0x18] sm:$0xff]   ;;  %v3995_v9 = vld [vmem:[%s5623_s1 + $0x10] sm:$0xff]   ;;  %3585 = vmatprep.mubr.msk.bf16.mxu1 %vm4177_vm1, %v4176_v2 }
   0x3   :  { %828 = vmatprep.subr.bf16.mxu0 %v4175_v0  ;;  %v4004_v7 = vld [vmem:[%s5624_s0 + $0x4] ss:$8 sps:$4 sm:$0xff]   ;;  %v4005_v8 = vld [vmem:[%s5625_s3 + $0x38] sm:$0xff]   ;;  %v4024_v11 = vld [vmem:[%s5625_s3 + $0x30] sm:$0xff]  }
   0x4   :  { %3183 = vmatprep.mubr.msk.bf16.mxu0 %vm678_vm0, %v4004_v7  ;;  %3979 = vmatpush3.bf16.msra.mxu1 %v4005_v8  ;;  %v3996_v10 = vld [vmem:[%s5623_s1 + $0x8] sm:$0xff]   ;;  %v3997_v12 = vld [vmem:[%s5623_s1] sm:$0xff]   ;;  %v3998_v13 = vld [vmem:[%s5623_s1 + $0x58] sm:$0xff]  }
   0x5   :  { %3972 = vmatprep.subr.bf16.mxu1 %v4176_v2  ;;  %v4043_v14 = vld [vmem:[%s5625_s3 + $0x28] sm:$0xff]   ;;  %v3999_v15 = vld [vmem:[%s5623_s1 + $0x50] sm:$0xff]   ;;  %v4001_v17 = vld [vmem:[%s5623_s1 + $0x40] sm:$0xff]  }
   0x6   :  { %829 = vmatpush1.bf16.msra.mxu0 %v3991_v3  ;;  %v4000_v16 = vld [vmem:[%s5623_s1 + $0x48] sm:$0xff]   ;;  %v4006_v19 = vld [vmem:[%s5624_s0 + $0x14] ss:$8 sps:$4 sm:$0xff]   ;;  %v4008_v20 = vld [vmem:[%s5624_s0 + $0x10] ss:$8 sps:$4 sm:$0xff]  }
   0x7   :  { %830 = vmatprep.subr.bf16.mxu0 %v4175_v0  ;;  %v4002_v18 = vld [vmem:[%s5624_s0] ss:$8 sps:$4 sm:$0xff]   ;;  %v4009_v21 = vld [vmem:[%s5624_s0 + $0x24] ss:$8 sps:$4 sm:$0xff]   ;;  %v4012_v23 = vld [vmem:[%s5624_s0 + $0x34] ss:$8 sps:$4 sm:$0xff]  }
   0x8   :  { %3980 = vmatpush3.bf16.msra.mxu1 %v4024_v11  ;;  %v4011_v22 = vld [vmem:[%s5624_s0 + $0x20] ss:$8 sps:$4 sm:$0xff]   ;;  %v4014_v25 = vld [vmem:[%s5624_s0 + $0x30] ss:$8 sps:$4 sm:$0xff]   ;;  %v4015_v26 = vld [vmem:[%s5624_s0 + $0x44] ss:$8 sps:$4 sm:$0xff]  }
   0x9   :  { %3973 = vmatprep.subr.bf16.mxu1 %v4176_v2  ;;  %v4062_v24 = vld [vmem:[%s5625_s3 + $0x20] sm:$0xff]   ;;  %v4018_v28 = vld [vmem:[%s5624_s0 + $0x54] ss:$8 sps:$4 sm:$0xff]   ;;  %v4020_v29 = vld [vmem:[%s5624_s0 + $0x50] ss:$8 sps:$4 sm:$0xff]  }
   0xa   :  { %831 = vmatpush1.bf16.msra.mxu0 %v3992_v4  ;;  %v4017_v27 = vld [vmem:[%s5624_s0 + $0x40] ss:$8 sps:$4 sm:$0xff]   ;;  %v4021_v30 = vld [vmem:[%s5624_s0 + $0x64] ss:$8 sps:$4 sm:$0xff]   ;;  %v4025_v32 = vld [vmem:[%s5624_s0 + $0x74] ss:$8 sps:$4 sm:$0xff]  }
   0xb   :  { %832 = vmatprep.subr.bf16.mxu0 %v4175_v0  ;;  %v4023_v31 = vld [vmem:[%s5624_s0 + $0x60] ss:$8 sps:$4 sm:$0xff]   ;;  %v4027_v33 = vld [vmem:[%s5624_s0 + $0x70] ss:$8 sps:$4 sm:$0xff]   ;;  %v4028_v34 = vld [vmem:[%s5624_s0 + $0x84] ss:$8 sps:$4 sm:$0xff]  }
   0xc   :  { %3981 = vmatpush3.bf16.msra.mxu1 %v4043_v14  ;;  %v4030_v35 = vld [vmem:[%s5624_s0 + $0x80] ss:$8 sps:$4 sm:$0xff]   ;;  %v4031_v36 = vld [vmem:[%s5624_s0 + $0x94] ss:$8 sps:$4 sm:$0xff]   ;;  %v4033_v37 = vld [vmem:[%s5624_s0 + $0x90] ss:$8 sps:$4 sm:$0xff]  }
   0xd   :  { %3974 = vmatprep.subr.bf16.mxu1 %v4176_v2  ;;  %v4034_v38 = vld [vmem:[%s5624_s0 + $0xa4] ss:$8 sps:$4 sm:$0xff]   ;;  %v4081_v39 = vld [vmem:[%s5625_s3 + $0x18] sm:$0xff]   ;;  %v4036_v40 = vld [vmem:[%s5624_s0 + $0xa0] ss:$8 sps:$4 sm:$0xff]  }
   0xe   :  { %833 = vmatpush1.bf16.msra.mxu0 %v3993_v5  ;;  %v4037_v41 = vld [vmem:[%s5624_s0 + $0xb4] ss:$8 sps:$4 sm:$0xff]   ;;  %v4039_v42 = vld [vmem:[%s5624_s0 + $0xb0] ss:$8 sps:$4 sm:$0xff]   ;;  %v4040_v43 = vld [vmem:[%s5624_s0 + $0xc4] ss:$8 sps:$4 sm:$0xff]  }
   0xf   :  { %834 = vmatprep.subr.bf16.mxu0 %v4175_v0  ;;  %v4042_v44 = vld [vmem:[%s5624_s0 + $0xc0] ss:$8 sps:$4 sm:$0xff]   ;;  %v4044_v45 = vld [vmem:[%s5624_s0 + $0xd4] ss:$8 sps:$4 sm:$0xff]   ;;  %v4046_v46 = vld [vmem:[%s5624_s0 + $0xd0] ss:$8 sps:$4 sm:$0xff]  }
  0x10   :  { %3982 = vmatpush3.bf16.msra.mxu1 %v4062_v24  ;;  %v4047_v47 = vld [vmem:[%s5624_s0 + $0xe4] ss:$8 sps:$4 sm:$0xff]   ;;  %v4049_v48 = vld [vmem:[%s5624_s0 + $0xe0] ss:$8 sps:$4 sm:$0xff]   ;;  %v4050_v49 = vld [vmem:[%s5624_s0 + $0xf4] ss:$8 sps:$4 sm:$0xff]  }
  0x11   :  { %3975 = vmatprep.subr.bf16.mxu1 %v4176_v2  ;;  %v4052_v50 = vld [vmem:[%s5624_s0 + $0xf0] ss:$8 sps:$4 sm:$0xff]   ;;  %v4053_v51 = vld [vmem:[%s5624_s0 + $0x104] ss:$8 sps:$4 sm:$0xff]   ;;  %v4055_v53 = vld [vmem:[%s5624_s0 + $0x100] ss:$8 sps:$4 sm:$0xff]  }
  0x12   :  { %835 = vmatpush1.bf16.msra.mxu0 %v3994_v6  ;;  %v4100_v52 = vld [vmem:[%s5625_s3 + $0x10] sm:$0xff]   ;;  %v4059_v56 = vld [vmem:[%s5624_s0 + $0x124] ss:$8 sps:$4 sm:$0xff]   ;;  %v4061_v57 = vld [vmem:[%s5624_s0 + $0x120] ss:$8 sps:$4 sm:$0xff]  }
  0x13   :  { %836 = vmatprep.subr.bf16.mxu0 %v4175_v0  ;;  %v4056_v54 = vld [vmem:[%s5624_s0 + $0x114] ss:$8 sps:$4 sm:$0xff]   ;;  %v4058_v55 = vld [vmem:[%s5624_s0 + $0x110] ss:$8 sps:$4 sm:$0xff]   ;;  %v4066_v60 = vld [vmem:[%s5624_s0 + $0x144] ss:$8 sps:$4 sm:$0xff]  }
  0x14   :  { %3983 = vmatpush3.bf16.msra.mxu1 %v4081_v39  ;;  %v4063_v58 = vld [vmem:[%s5624_s0 + $0x134] ss:$8 sps:$4 sm:$0xff]   ;;  %v4065_v59 = vld [vmem:[%s5624_s0 + $0x130] ss:$8 sps:$4 sm:$0xff]   ;;  %v4068_v61 = vld [vmem:[%s5624_s0 + $0x140] ss:$8 sps:$4 sm:$0xff]  }
  0x15   :  { %3976 = vmatprep.subr.bf16.mxu1 %v4176_v2  ;;  %v4069_v62 = vld [vmem:[%s5624_s0 + $0x154] ss:$8 sps:$4 sm:$0xff]   ;;  %v4071_v63 = vld [vmem:[%s5624_s0 + $0x150] ss:$8 sps:$4 sm:$0xff]   ;;  %v4121_v1 = vld [vmem:[%s5625_s3 + $0x8] sm:$0xff]  }
  0x16   :  { %837 = vmatpush1.bf16.msra.mxu0 %v3995_v9  ;;  %v4074_v3 = vld [vmem:[%s5624_s0 + $0x160] ss:$8 sps:$4 sm:$0xff]   ;;  %v4075_v4 = vld [vmem:[%s5624_s0 + $0x174] ss:$8 sps:$4 sm:$0xff]   ;;  %v4077_v5 = vld [vmem:[%s5624_s0 + $0x170] ss:$8 sps:$4 sm:$0xff]  }
  0x17   :  { %838 = vmatprep.subr.bf16.mxu0 %v4175_v0  ;;  %v4078_v6 = vld [vmem:[%s5624_s0 + $0x184] ss:$8 sps:$4 sm:$0xff]   ;;  %v4080_v7 = vld [vmem:[%s5624_s0 + $0x180] ss:$8 sps:$4 sm:$0xff]  }
  0x18   :  { %3984 = vmatpush3.bf16.msra.mxu1 %v4100_v52  ;;  %v4487_v9 = vld [vmem:[%s5626_s2] ss:$0 sm:$0xff] }
  0x19   :  { %3977 = vmatprep.subr.bf16.mxu1 %v4176_v2 }
  0x1a   :  { %839 = vmatpush1.bf16.msra.mxu0 %v3996_v10 }
  0x1b   :  { %840 = vmatprep.subr.bf16.mxu0 %v4175_v0 }
  0x1c   :  { %3985 = vmatpush3.bf16.msra.mxu1 %v4121_v1 }
  0x1d   :  { %3978 = vmatprep.subr.bf16.mxu1 %v4176_v2 }
  0x1e   :  { %841 = vmatpush1.bf16.msra.mxu0 %v3997_v12 }
  0x1f   :  { %850 = vmatprep.subr.bf16.mxu0 %v4175_v0 }
  0x22   :  { %851 = vmatpush2.bf16.msra.mxu0 %v3998_v13 }
  0x23   :  { %852 = vmatprep.subr.bf16.mxu0 %v4175_v0 }
  0x26   :  { %853 = vmatpush2.bf16.msra.mxu0 %v3999_v15 }
  0x27   :  { %854 = vmatprep.subr.bf16.mxu0 %v4175_v0 }
  0x2a   :  { %855 = vmatpush2.bf16.msra.mxu0 %v4000_v16  ;;  %v4085_v16 = vld [vmem:[%s5624_s0 + $0x1a4] ss:$8 sps:$4 sm:$0xff]  }
  0x2b   :  { %856 = vmatprep.subr.bf16.mxu0 %v4175_v0  ;;  %v4072_v0 = vld [vmem:[%s5624_s0 + $0x164] ss:$8 sps:$4 sm:$0xff]  }
  0x2e   :  { %857 = vmatpush2.bf16.msra.mxu0 %v4001_v17 }
  0x2f   :  { %3505 = vmatprep.subr.bf16.mxu0 %v4176_v2 }
  0x31   :  { %859 = vmatmul.mubr.bf16.vlgmr.msra.gmra.mxu0 %v4002_v18  ;;  %v4135_v18 = vld [vmem:[%s5625_s3] sm:$0xff]  }
  0x32   :  { %3506 = vmatpush3.bf16.msra.mxu0 %v4005_v8  ;;  %3184 = vmatprep.mubr.msk.bf16.mxu0 %vm678_vm0, %v4006_v19  ;;  %v4082_v8 = vld [vmem:[%s5624_s0 + $0x194] ss:$8 sps:$4 sm:$0xff]  }
  0x33   :  { %3507 = vmatprep.subr.bf16.mxu0 %v4176_v2  ;;  %3986 = vmatpush3.bf16.msra.mxu1 %v4135_v18 }
  0x34   :  { %3717 = vmatprep.subr.bf16.mxu1 %v4176_v2 }
  0x36   :  { %3508 = vmatpush3.bf16.msra.mxu0 %v4024_v11 }
  0x37   :  { %3509 = vmatprep.subr.bf16.mxu0 %v4176_v2 }
  0x39   :  { %867 = vmatmul.mubr.bf16.gmra.mxu0 %v4008_v20 }
  0x3a   :  { %3185 = vmatprep.mubr.msk.bf16.mxu0 %vm678_vm0, %v4009_v21  ;;  %3510 = vmatpush3.bf16.msra.mxu0 %v4043_v14  ;;  %v4084_v14 = vld [vmem:[%s5624_s0 + $0x190] ss:$8 sps:$4 sm:$0xff]  }
  0x3b   :  { %3511 = vmatprep.subr.bf16.mxu0 %v4176_v2 }
  0x3e   :  { %3512 = vmatpush3.bf16.msra.mxu0 %v4062_v24 }
  0x3f   :  { %3513 = vmatprep.subr.bf16.mxu0 %v4176_v2 }
  0x41   :  { %875 = vmatmul.mubr.bf16.gmra.mxu0 %v4011_v22 }
  0x42   :  { %3186 = vmatprep.mubr.msk.bf16.mxu0 %vm678_vm0, %v4012_v23  ;;  %3514 = vmatpush3.bf16.msra.mxu0 %v4081_v39  ;;  %v4091_v39 = vld [vmem:[%s5624_s0 + $0x1c4] ss:$8 sps:$4 sm:$0xff]  }
  0x43   :  { %3515 = vmatprep.subr.bf16.mxu0 %v4176_v2 }
  0x46   :  { %3516 = vmatpush3.bf16.msra.mxu0 %v4100_v52 }
  0x47   :  { %3517 = vmatprep.subr.bf16.mxu0 %v4176_v2 }
  0x49   :  { %883 = vmatmul.mubr.bf16.gmra.mxu0 %v4014_v25 }
  0x4a   :  { %3187 = vmatprep.mubr.msk.bf16.mxu0 %vm678_vm0, %v4015_v26  ;;  %3518 = vmatpush3.bf16.msra.mxu0 %v4121_v1  ;;  %v4087_v26 = vld [vmem:[%s5624_s0 + $0x1a0] ss:$8 sps:$4 sm:$0xff]  }
  0x4b   :  { %3519 = vmatprep.subr.bf16.mxu0 %v4176_v2 }
  0x4e   :  { %3520 = vmatpush3.bf16.msra.mxu0 %v4135_v18 }
  0x51   :  { %891 = vmatmul.mubr.bf16.gmra.mxu0 %v4017_v27 }
  0x52   :  { %3188 = vmatprep.mubr.msk.bf16.mxu0 %vm678_vm0, %v4018_v28  ;;  %v4088_v28 = vld [vmem:[%s5624_s0 + $0x1b4] ss:$8 sps:$4 sm:$0xff]  }
  0x59   :  { %899 = vmatmul.mubr.bf16.gmra.mxu0 %v4020_v29 }
  0x5a   :  { %3189 = vmatprep.mubr.msk.bf16.mxu0 %vm678_vm0, %v4021_v30 }
  0x61   :  { %907 = vmatmul.mubr.bf16.gmra.mxu0 %v4023_v31 }
  0x62   :  { %3190 = vmatprep.mubr.msk.bf16.mxu0 %vm678_vm0, %v4025_v32 }
  0x69   :  { %915 = vmatmul.mubr.bf16.gmra.mxu0 %v4027_v33 }
  0x6a   :  { %3191 = vmatprep.mubr.msk.bf16.mxu0 %vm678_vm0, %v4028_v34 }
  0x71   :  { %923 = vmatmul.mubr.bf16.gmra.mxu0 %v4030_v35 }
  0x72   :  { %3192 = vmatprep.mubr.msk.bf16.mxu0 %vm678_vm0, %v4031_v36  ;;  %v4090_v36 = vld [vmem:[%s5624_s0 + $0x1b0] ss:$8 sps:$4 sm:$0xff]  }
  0x79   :  { %931 = vmatmul.mubr.bf16.gmra.mxu0 %v4033_v37 }
  0x7a   :  { %3193 = vmatprep.mubr.msk.bf16.mxu0 %vm678_vm0, %v4034_v38 }
  0x81   :  { %939 = vmatmul.mubr.bf16.gmra.mxu0 %v4036_v40 }
  0x82   :  { %3194 = vmatprep.mubr.msk.bf16.mxu0 %vm678_vm0, %v4037_v41 }
  0x89   :  { %947 = vmatmul.mubr.bf16.gmra.mxu0 %v4039_v42 }
  0x8a   :  { %3195 = vmatprep.mubr.msk.bf16.mxu0 %vm678_vm0, %v4040_v43 }
  0x91   :  { %955 = vmatmul.mubr.bf16.gmra.mxu0 %v4042_v44 }
  0x92   :  { %3196 = vmatprep.mubr.msk.bf16.mxu0 %vm678_vm0, %v4044_v45 }
  0x99   :  { %963 = vmatmul.mubr.bf16.gmra.mxu0 %v4046_v46 }
  0x9a   :  { %3197 = vmatprep.mubr.msk.bf16.mxu0 %vm678_vm0, %v4047_v47 }
  0xa1   :  { %971 = vmatmul.mubr.bf16.gmra.mxu0 %v4049_v48  ;;  %v4093_v48 = vld [vmem:[%s5624_s0 + $0x1c0] ss:$8 sps:$4 sm:$0xff]  }
  0xa2   :  { %3198 = vmatprep.mubr.msk.bf16.mxu0 %vm678_vm0, %v4050_v49 }
  0xa9   :  { %979 = vmatmul.mubr.bf16.gmra.mxu0 %v4052_v50  ;;  %v4094_v50 = vld [vmem:[%s5624_s0 + $0x1d4] ss:$8 sps:$4 sm:$0xff]  }
  0xaa   :  { %3199 = vmatprep.mubr.msk.bf16.mxu0 %vm678_vm0, %v4053_v51 }
  0xb1   :  { %987 = vmatmul.mubr.bf16.gmra.mxu0 %v4055_v53 }
  0xb2   :  { %3200 = vmatprep.mubr.msk.bf16.mxu0 %vm678_vm0, %v4056_v54 }
  0xb9   :  { %995 = vmatmul.mubr.bf16.gmra.mxu0 %v4058_v55 }
  0xba   :  { %3201 = vmatprep.mubr.msk.bf16.mxu0 %vm678_vm0, %v4059_v56 }
  0xc1   :  { %1003 = vmatmul.mubr.bf16.gmra.mxu0 %v4061_v57 }
  0xc2   :  { %3202 = vmatprep.mubr.msk.bf16.mxu0 %vm678_vm0, %v4063_v58 }
  0xc9   :  { %1011 = vmatmul.mubr.bf16.gmra.mxu0 %v4065_v59  ;;  %v4096_v59 = vld [vmem:[%s5624_s0 + $0x1d0] ss:$8 sps:$4 sm:$0xff]  }
  0xca   :  { %3203 = vmatprep.mubr.msk.bf16.mxu0 %vm678_vm0, %v4066_v60 }
  0xd1   :  { %1019 = vmatmul.mubr.bf16.gmra.mxu0 %v4068_v61  ;;  %v4097_v61 = vld [vmem:[%s5624_s0 + $0x1e4] ss:$8 sps:$4 sm:$0xff]  }
  0xd2   :  { %3204 = vmatprep.mubr.msk.bf16.mxu0 %vm678_vm0, %v4069_v62 }
  0xd9   :  { %1027 = vmatmul.mubr.bf16.gmra.mxu0 %v4071_v63 }
  0xda   :  { %3205 = vmatprep.mubr.msk.bf16.mxu0 %vm678_vm0, %v4072_v0 }
  0xe1   :  { %1035 = vmatmul.mubr.bf16.gmra.mxu0 %v4074_v3 }
  0xe2   :  { %3206 = vmatprep.mubr.msk.bf16.mxu0 %vm678_vm0, %v4075_v4 }
  0xe9   :  { %1043 = vmatmul.mubr.bf16.gmra.mxu0 %v4077_v5 }
  0xea   :  { %3207 = vmatprep.mubr.msk.bf16.mxu0 %vm678_vm0, %v4078_v6 }
  0xf1   :  { %v860_v10 = vpop.f32.mrf.mxu0  ;;  %1051 = vmatmul.mubr.bf16.gmra.mxu0 %v4080_v7  ;;  %v4099_v7 = vld [vmem:[%s5624_s0 + $0x1e0] ss:$8 sps:$4 sm:$0xff]  }
  0xf2   :  { %3208 = vmatprep.mubr.msk.bf16.mxu0 %vm678_vm0, %v4082_v8  ;;  %v861_v12 = vadd.f32 %v4487_v9, %v860_v10  ;;  %v4101_v10 = vld [vmem:[%s5624_s0 + $0x1f4] ss:$8 sps:$4 sm:$0xff]  }
  0xf3   :  { %v862_v11 = vpop.f32.mrf.mxu0 }
  0xf4   :  { %v1251_v19 = vmax.f32 %v861_v12, 0.0 }
  0xf5   :  { %v863_v13 = vpop.f32.mrf.mxu0 }
  0xf6   :  { %v864_v15 = vadd.f32 %v4487_v9, %v863_v13 }
  0xf7   :  { %v865_v17 = vpop.f32.mrf.mxu0 }
  0xf8   :  { %v1252_v20 = vmax.f32 %v864_v15, 0.0 }
  0xf9   :  { %v868_v21 = vpop.f32.mrf.mxu0  ;;  %1059 = vmatmul.mubr.bf16.gmra.mxu0 %v4084_v14 }
  0xfa   :  { %v4501_v22 = vpack.c.bf16 %v1252_v20, %v1251_v19  ;;  %3209 = vmatprep.mubr.msk.bf16.mxu0 %vm678_vm0, %v4085_v16  ;;  %v869_v24 = vadd.f32 %v4487_v9, %v868_v21  ;;  %v4103_v19 = vld [vmem:[%s5624_s0 + $0x1f0] ss:$8 sps:$4 sm:$0xff]   ;;  %v4104_v21 = vld [vmem:[%s5624_s0 + $0x204] ss:$8 sps:$4 sm:$0xff]  }
  0xfb   :  { %v870_v23 = vpop.f32.mrf.mxu0 }
  0xfc   :  { %v1253_v30 = vmax.f32 %v869_v24, 0.0 }
  0xfd   :  { %v871_v25 = vpop.f32.mrf.mxu0 }
  0xfe   :  { %v872_v27 = vadd.f32 %v4487_v9, %v871_v25 }
  0xff   :  { %v873_v29 = vpop.f32.mrf.mxu0 }
 0x100   :  { %v1254_v31 = vmax.f32 %v872_v27, 0.0 }
 0x101   :  { %v876_v32 = vpop.f32.mrf.mxu0  ;;  %1067 = vmatmul.mubr.bf16.gmra.mxu0 %v4087_v26 }
 0x102   :  { %v4515_v33 = vpack.c.bf16 %v1254_v31, %v1253_v30  ;;  %3210 = vmatprep.mubr.msk.bf16.mxu0 %vm678_vm0, %v4088_v28  ;;  %v877_v35 = vadd.f32 %v4487_v9, %v876_v32  ;;  %v4106_v31 = vld [vmem:[%s5624_s0 + $0x200] ss:$8 sps:$4 sm:$0xff]  }
 0x103   :  { %v878_v34 = vpop.f32.mrf.mxu0 }
 0x104   :  { %v1255_v41 = vmax.f32 %v877_v35, 0.0  ;;  %v4107_v34 = vld [vmem:[%s5624_s0 + $0x214] ss:$8 sps:$4 sm:$0xff]  }
 0x105   :  { %v879_v37 = vpop.f32.mrf.mxu0 }
 0x106   :  { %v880_v38 = vadd.f32 %v4487_v9, %v879_v37 }
 0x107   :  { %v881_v40 = vpop.f32.mrf.mxu0 }
 0x108   :  { %v1256_v42 = vmax.f32 %v880_v38, 0.0 }
 0x109   :  { %v884_v43 = vpop.f32.mrf.mxu0  ;;  %1075 = vmatmul.mubr.bf16.gmra.mxu0 %v4090_v36 }
 0x10a   :  { %v4526_v44 = vpack.c.bf16 %v1256_v42, %v1255_v41  ;;  %3211 = vmatprep.mubr.msk.bf16.mxu0 %vm678_vm0, %v4091_v39  ;;  %v885_v46 = vadd.f32 %v4487_v9, %v884_v43  ;;  %v4109_v43 = vld [vmem:[%s5624_s0 + $0x210] ss:$8 sps:$4 sm:$0xff]  }
 0x10b   :  { %v886_v45 = vpop.f32.mrf.mxu0 }
 0x10c   :  { %v1257_v52 = vmax.f32 %v885_v46, 0.0  ;;  %v4110_v46 = vld [vmem:[%s5624_s0 + $0x224] ss:$8 sps:$4 sm:$0xff]  }
 0x10d   :  { %v887_v47 = vpop.f32.mrf.mxu0 }
 0x10e   :  { %v888_v49 = vadd.f32 %v4487_v9, %v887_v47 }
 0x10f   :  { %v889_v51 = vpop.f32.mrf.mxu0 }
 0x110   :  { %v1258_v53 = vmax.f32 %v888_v49, 0.0 }
 0x111   :  { %v892_v54 = vpop.f32.mrf.mxu0  ;;  %1083 = vmatmul.mubr.bf16.gmra.mxu0 %v4093_v48 }
 0x112   :  { %v4537_v55 = vpack.c.bf16 %v1258_v53, %v1257_v52  ;;  %3212 = vmatprep.mubr.msk.bf16.mxu0 %vm678_vm0, %v4094_v50  ;;  %v893_v57 = vadd.f32 %v4487_v9, %v892_v54 }
 0x113   :  { %v894_v56 = vpop.f32.mrf.mxu0 }
 0x114   :  { %v1259_v63 = vmax.f32 %v893_v57, 0.0  ;;  %v4112_v56 = vld [vmem:[%s5624_s0 + $0x220] ss:$8 sps:$4 sm:$0xff]  }
 0x115   :  { %v895_v58 = vpop.f32.mrf.mxu0 }
 0x116   :  { %v896_v60 = vadd.f32 %v4487_v9, %v895_v58  ;;  %v4113_v58 = vld [vmem:[%s5624_s0 + $0x234] ss:$8 sps:$4 sm:$0xff]  }
 0x117   :  { %v897_v62 = vpop.f32.mrf.mxu0 }
 0x118   :  { %v1260_v0 = vmax.f32 %v896_v60, 0.0 }
 0x119   :  { %v900_v1 = vpop.f32.mrf.mxu0  ;;  %1091 = vmatmul.mubr.bf16.gmra.mxu0 %v4096_v59 }
 0x11a   :  { %v4548_v3 = vpack.c.bf16 %v1260_v0, %v1259_v63  ;;  %3213 = vmatprep.mubr.msk.bf16.mxu0 %vm678_vm0, %v4097_v61  ;;  %v901_v5 = vadd.f32 %v4487_v9, %v900_v1 }
 0x11b   :  { %v902_v4 = vpop.f32.mrf.mxu0 }
 0x11c   :  { %v1261_v12 = vmax.f32 %v901_v5, 0.0  ;;  %v4115_v5 = vld [vmem:[%s5624_s0 + $0x230] ss:$8 sps:$4 sm:$0xff]  }
 0x11d   :  { %v903_v6 = vpop.f32.mrf.mxu0 }
 0x11e   :  { %v904_v8 = vadd.f32 %v4487_v9, %v903_v6 }
 0x11f   :  { %v905_v11 = vpop.f32.mrf.mxu0 }
 0x120   :  { %v1262_v13 = vmax.f32 %v904_v8, 0.0 }
 0x121   :  { %v908_v14 = vpop.f32.mrf.mxu0  ;;  %1099 = vmatmul.mubr.bf16.gmra.mxu0 %v4099_v7  ;;  %v4116_v7 = vld [vmem:[%s5624_s0 + $0x244] ss:$8 sps:$4 sm:$0xff]  }
 0x122   :  { %v4559_v15 = vpack.c.bf16 %v1262_v13, %v1261_v12  ;;  %3214 = vmatprep.mubr.msk.bf16.mxu0 %vm678_vm0, %v4101_v10  ;;  %v909_v17 = vadd.f32 %v4487_v9, %v908_v14 }
 0x123   :  { %v910_v16 = vpop.f32.mrf.mxu0 }
 0x124   :  { %v1263_v24 = vmax.f32 %v909_v17, 0.0 }
 0x125   :  { %v911_v18 = vpop.f32.mrf.mxu0 }
 0x126   :  { %v912_v20 = vadd.f32 %v4487_v9, %v911_v18  ;;  %v4118_v18 = vld [vmem:[%s5624_s0 + $0x240] ss:$8 sps:$4 sm:$0xff]  }
 0x127   :  { %v913_v23 = vpop.f32.mrf.mxu0 }
 0x128   :  { %v1264_v25 = vmax.f32 %v912_v20, 0.0  ;;  %v4119_v20 = vld [vmem:[%s5624_s0 + $0x254] ss:$8 sps:$4 sm:$0xff]  }
 0x129   :  { %v916_v26 = vpop.f32.mrf.mxu0  ;;  %1107 = vmatmul.mubr.bf16.gmra.mxu0 %v4103_v19 }
 0x12a   :  { %v4570_v27 = vpack.c.bf16 %v1264_v25, %v1263_v24  ;;  %3215 = vmatprep.mubr.msk.bf16.mxu0 %vm678_vm0, %v4104_v21  ;;  %v917_v29 = vadd.f32 %v4487_v9, %v916_v26 }
 0x12b   :  { %v918_v28 = vpop.f32.mrf.mxu0 }
 0x12c   :  { %v1265_v36 = vmax.f32 %v917_v29, 0.0 }
 0x12d   :  { %v919_v30 = vpop.f32.mrf.mxu0 }
 0x12e   :  { %v920_v32 = vadd.f32 %v4487_v9, %v919_v30 }
 0x12f   :  { %v921_v35 = vpop.f32.mrf.mxu0 }
 0x130   :  { %v1266_v37 = vmax.f32 %v920_v32, 0.0 }
 0x131   :  { %v924_v38 = vpop.f32.mrf.mxu0  ;;  %1115 = vmatmul.mubr.bf16.gmra.mxu0 %v4106_v31  ;;  %v4122_v31 = vld [vmem:[%s5624_s0 + $0x250] ss:$8 sps:$4 sm:$0xff]  }
 0x132   :  { %v4581_v39 = vpack.c.bf16 %v1266_v37, %v1265_v36  ;;  %3216 = vmatprep.mubr.msk.bf16.mxu0 %vm678_vm0, %v4107_v34  ;;  %v925_v41 = vadd.f32 %v4487_v9, %v924_v38  ;;  %v4123_v34 = vld [vmem:[%s5624_s0 + $0x264] ss:$8 sps:$4 sm:$0xff]  }
 0x133   :  { %v926_v40 = vpop.f32.mrf.mxu0 }
 0x134   :  { %v1267_v48 = vmax.f32 %v925_v41, 0.0 }
 0x135   :  { %v927_v42 = vpop.f32.mrf.mxu0 }
 0x136   :  { %v928_v45 = vadd.f32 %v4487_v9, %v927_v42 }
 0x137   :  { %v929_v47 = vpop.f32.mrf.mxu0 }
 0x138   :  { %v1268_v49 = vmax.f32 %v928_v45, 0.0  ;;  %v4125_v45 = vld [vmem:[%s5624_s0 + $0x260] ss:$8 sps:$4 sm:$0xff]   ;;  %v4126_v47 = vld [vmem:[%s5624_s0 + $0x274] ss:$8 sps:$4 sm:$0xff]  }
 0x139   :  { %v932_v50 = vpop.f32.mrf.mxu0  ;;  %1123 = vmatmul.mubr.bf16.gmra.mxu0 %v4109_v43 }
 0x13a   :  { %v4592_v51 = vpack.c.bf16 %v1268_v49, %v1267_v48  ;;  %3217 = vmatprep.mubr.msk.bf16.mxu0 %vm678_vm0, %v4110_v46  ;;  %v933_v53 = vadd.f32 %v4487_v9, %v932_v50 }
 0x13b   :  { %v934_v52 = vpop.f32.mrf.mxu0 }
 0x13c   :  { %v1269_v60 = vmax.f32 %v933_v53, 0.0 }
 0x13d   :  { %v935_v54 = vpop.f32.mrf.mxu0 }
 0x13e   :  { %v936_v57 = vadd.f32 %v4487_v9, %v935_v54 }
 0x13f   :  { %v937_v59 = vpop.f32.mrf.mxu0 }
 0x140   :  { %v1270_v61 = vmax.f32 %v936_v57, 0.0 }
 0x141   :  { %v940_v62 = vpop.f32.mrf.mxu0  ;;  %1131 = vmatmul.mubr.bf16.gmra.mxu0 %v4112_v56 }
 0x142   :  { %v4603_v63 = vpack.c.bf16 %v1270_v61, %v1269_v60  ;;  %3218 = vmatprep.mubr.msk.bf16.mxu0 %vm678_vm0, %v4113_v58  ;;  %v941_v1 = vadd.f32 %v4487_v9, %v940_v62  ;;  %v4128_v58 = vld [vmem:[%s5624_s0 + $0x270] ss:$8 sps:$4 sm:$0xff]   ;;  %v4129_v60 = vld [vmem:[%s5624_s0 + $0x284] ss:$8 sps:$4 sm:$0xff]  }
 0x143   :  { %v942_v0 = vpop.f32.mrf.mxu0 }
 0x144   :  { %v1271_v10 = vmax.f32 %v941_v1, 0.0 }
 0x145   :  { %v943_v4 = vpop.f32.mrf.mxu0 }
 0x146   :  { %v944_v6 = vadd.f32 %v4487_v9, %v943_v4 }
 0x147   :  { %v945_v8 = vpop.f32.mrf.mxu0 }
 0x148   :  { %v1272_v11 = vmax.f32 %v944_v6, 0.0  ;;  %v4131_v8 = vld [vmem:[%s5624_s0 + $0x280] ss:$8 sps:$4 sm:$0xff]  }
 0x149   :  { %v948_v12 = vpop.f32.mrf.mxu0  ;;  %1139 = vmatmul.mubr.bf16.gmra.mxu0 %v4115_v5 }
 0x14a   :  { %v4614_v13 = vpack.c.bf16 %v1272_v11, %v1271_v10  ;;  %3219 = vmatprep.mubr.msk.bf16.mxu0 %vm678_vm0, %v4116_v7  ;;  %v949_v16 = vadd.f32 %v4487_v9, %v948_v12  ;;  %v4132_v11 = vld [vmem:[%s5624_s0 + $0x294] ss:$8 sps:$4 sm:$0xff]  }
 0x14b   :  { %v950_v14 = vpop.f32.mrf.mxu0 }
 0x14c   :  { %v1273_v23 = vmax.f32 %v949_v16, 0.0 }
 0x14d   :  { %v951_v17 = vpop.f32.mrf.mxu0 }
 0x14e   :  { %v952_v19 = vadd.f32 %v4487_v9, %v951_v17 }
 0x14f   :  { %v953_v21 = vpop.f32.mrf.mxu0 }
 0x150   :  { %v1274_v24 = vmax.f32 %v952_v19, 0.0 }
 0x151   :  { %v956_v25 = vpop.f32.mrf.mxu0  ;;  %1147 = vmatmul.mubr.bf16.gmra.mxu0 %v4118_v18 }
 0x152   :  { %v4625_v26 = vpack.c.bf16 %v1274_v24, %v1273_v23  ;;  %3220 = vmatprep.mubr.msk.bf16.mxu0 %vm678_vm0, %v4119_v20  ;;  %v957_v29 = vadd.f32 %v4487_v9, %v956_v25  ;;  %v4134_v23 = vld [vmem:[%s5624_s0 + $0x290] ss:$8 sps:$4 sm:$0xff]   ;;  %v4137_v25 = vld [vmem:[%s5624_s0 + $0x2a4] ss:$8 sps:$4 sm:$0xff]  }
 0x153   :  { %v958_v28 = vpop.f32.mrf.mxu0 }
 0x154   :  { %v1275_v36 = vmax.f32 %v957_v29, 0.0 }
 0x155   :  { %v959_v30 = vpop.f32.mrf.mxu0 }
 0x156   :  { %v960_v32 = vadd.f32 %v4487_v9, %v959_v30 }
 0x157   :  { %v961_v35 = vpop.f32.mrf.mxu0 }
 0x158   :  { %v1276_v37 = vmax.f32 %v960_v32, 0.0  ;;  %v4136_v32 = vld [vmem:[%s5627_s5 + $0x38] sm:$0xff]  }
 0x159   :  { %v964_v38 = vpop.f32.mrf.mxu0  ;;  %1155 = vmatmul.mubr.bf16.gmra.mxu0 %v4122_v31 }
 0x15a   :  { %v4636_v40 = vpack.c.bf16 %v1276_v37, %v1275_v36  ;;  %3221 = vmatprep.mubr.msk.bf16.mxu0 %vm678_vm0, %v4123_v34  ;;  %v965_v42 = vadd.f32 %v4487_v9, %v964_v38  ;;  %v4139_v38 = vld [vmem:[%s5624_s0 + $0x2a0] ss:$8 sps:$4 sm:$0xff]  }
 0x15b   :  { %v966_v41 = vpop.f32.mrf.mxu0 }
 0x15c   :  { %v1277_v49 = vmax.f32 %v965_v42, 0.0  ;;  %v4149_v41 = vld [vmem:[%s5627_s5 + $0x30] sm:$0xff]  }
 0x15d   :  { %v967_v43 = vpop.f32.mrf.mxu0 }
 0x15e   :  { %v968_v46 = vadd.f32 %v4487_v9, %v967_v43  ;;  %v4140_v43 = vld [vmem:[%s5624_s0 + $0x2b4] ss:$8 sps:$4 sm:$0xff]  }
 0x15f   :  { %v969_v48 = vpop.f32.mrf.mxu0 }
 0x160   :  { %v1278_v50 = vmax.f32 %v968_v46, 0.0 }
 0x161   :  { %v972_v52 = vpop.f32.mrf.mxu0  ;;  %1163 = vmatmul.mubr.bf16.gmra.mxu0 %v4125_v45 }
 0x162   :  { %v4647_v53 = vpack.c.bf16 %v1278_v50, %v1277_v49  ;;  %3222 = vmatprep.mubr.msk.bf16.mxu0 %vm678_vm0, %v4126_v47  ;;  %v973_v56 = vadd.f32 %v4487_v9, %v972_v52  ;;  %v4159_v49 = vld [vmem:[%s5627_s5 + $0x28] sm:$0xff]  }
 0x163   :  { %v974_v54 = vpop.f32.mrf.mxu0 }
 0x164   :  { %v1279_v62 = vmax.f32 %v973_v56, 0.0 }
 0x165   :  { %v975_v57 = vpop.f32.mrf.mxu0 }
 0x166   :  { %v976_v59 = vadd.f32 %v4487_v9, %v975_v57  ;;  %v4142_v57 = vld [vmem:[%s5624_s0 + $0x2b0] ss:$8 sps:$4 sm:$0xff]  }
 0x167   :  { %v977_v61 = vpop.f32.mrf.mxu0 }
 0x168   :  { %v1280_v0 = vmax.f32 %v976_v59, 0.0 }
 0x169   :  { %v980_v1 = vpop.f32.mrf.mxu0  ;;  %1171 = vmatmul.mubr.bf16.gmra.mxu0 %v4128_v58  ;;  %v4160_v58 = vld [vmem:[%s5627_s5 + $0x20] sm:$0xff]  }
 0x16a   :  { %v4658_v4 = vpack.c.bf16 %v1280_v0, %v1279_v62  ;;  %3223 = vmatprep.mubr.msk.bf16.mxu0 %vm678_vm0, %v4129_v60  ;;  %v981_v6 = vadd.f32 %v4487_v9, %v980_v1  ;;  %v4143_v60 = vld [vmem:[%s5624_s0 + $0x2c4] ss:$8 sps:$4 sm:$0xff]  }
 0x16b   :  { %v982_v5 = vpop.f32.mrf.mxu0 }
 0x16c   :  { %v1281_v14 = vmax.f32 %v981_v6, 0.0  ;;  %v4161_v5 = vld [vmem:[%s5627_s5 + $0x18] sm:$0xff]  }
 0x16d   :  { %v983_v7 = vpop.f32.mrf.mxu0 }
 0x16e   :  { %v984_v10 = vadd.f32 %v4487_v9, %v983_v7 }
 0x16f   :  { %v985_v12 = vpop.f32.mrf.mxu0 }
 0x170   :  { %v1282_v16 = vmax.f32 %v984_v10, 0.0 }
 0x171   :  { %v988_v17 = vpop.f32.mrf.mxu0  ;;  %1179 = vmatmul.mubr.bf16.gmra.mxu0 %v4131_v8 }
 0x172   :  { %v4669_v18 = vpack.c.bf16 %v1282_v16, %v1281_v14  ;;  %3224 = vmatprep.mubr.msk.bf16.mxu0 %vm678_vm0, %v4132_v11  ;;  %v989_v20 = vadd.f32 %v4487_v9, %v988_v17  ;;  %v4145_v11 = vld [vmem:[%s5624_s0 + $0x2c0] ss:$8 sps:$4 sm:$0xff]   ;;  %v4146_v14 = vld [vmem:[%s5624_s0 + $0x2d4] ss:$8 sps:$4 sm:$0xff]  }
 0x173   :  { %v990_v19 = vpop.f32.mrf.mxu0 }
 0x174   :  { %v1283_v29 = vmax.f32 %v989_v20, 0.0 }
 0x175   :  { %v991_v21 = vpop.f32.mrf.mxu0 }
 0x176   :  { %v992_v24 = vadd.f32 %v4487_v9, %v991_v21 }
 0x177   :  { %v993_v28 = vpop.f32.mrf.mxu0 }
 0x178   :  { %v1284_v30 = vmax.f32 %v992_v24, 0.0  ;;  %v4148_v28 = vld [vmem:[%s5624_s0 + $0x2d0] ss:$8 sps:$4 sm:$0xff]  }
 0x179   :  { %v996_v31 = vpop.f32.mrf.mxu0  ;;  %1187 = vmatmul.mubr.bf16.gmra.mxu0 %v4134_v23 }
 0x17a   :  { %v1365_v34 = vpack.c.bf16 %v1284_v30, %v1283_v29  ;;  %3225 = vmatprep.mubr.msk.bf16.mxu0 %vm678_vm0, %v4137_v25  ;;  %v997_v36 = vadd.f32 %v4487_v9, %v996_v31  ;;  %v4150_v30 = vld [vmem:[%s5624_s0 + $0x2e4] ss:$8 sps:$4 sm:$0xff]  }
 0x17b   :  { %v998_v35 = vpop.f32.mrf.mxu0 }
 0x17c   :  { %3586 = vmatmul.mubr.bf16.vlgmr.msra.gmra.mxu1 %v1365_v34  ;;  %v1285_v46 = vmax.f32 %v997_v36, 0.0 }
 0x17d   :  { %v999_v37 = vpop.f32.mrf.mxu0  ;;  %3718 = vmatpush3.bf16.msra.mxu1 %v4136_v32  ;;  %3589 = vmatprep.mubr.msk.bf16.mxu1 %vm4177_vm1, %v4176_v2 }
 0x17e   :  { %v1000_v42 = vadd.f32 %v4487_v9, %v999_v37  ;;  %3719 = vmatprep.subr.bf16.mxu1 %v4176_v2 }
 0x17f   :  { %v1001_v45 = vpop.f32.mrf.mxu0 }
 0x180   :  { %v1286_v47 = vmax.f32 %v1000_v42, 0.0  ;;  %v4152_v42 = vld [vmem:[%s5624_s0 + $0x2e0] ss:$8 sps:$4 sm:$0xff]   ;;  %v4153_v45 = vld [vmem:[%s5624_s0 + $0x2f4] ss:$8 sps:$4 sm:$0xff]  }
 0x181   :  { %v1004_v48 = vpop.f32.mrf.mxu0  ;;  %1195 = vmatmul.mubr.bf16.gmra.mxu0 %v4139_v38  ;;  %3720 = vmatpush3.bf16.msra.mxu1 %v4149_v41 }
 0x182   :  { %v1366_v50 = vpack.c.bf16 %v1286_v47, %v1285_v46  ;;  %3226 = vmatprep.mubr.msk.bf16.mxu0 %vm678_vm0, %v4140_v43  ;;  %3721 = vmatprep.subr.bf16.mxu1 %v4176_v2  ;;  %v1005_v54 = vadd.f32 %v4487_v9, %v1004_v48 }
 0x183   :  { %v1006_v52 = vpop.f32.mrf.mxu0 }
 0x184   :  { %3590 = vmatmul.mubr.bf16.gmra.mxu1 %v1366_v50  ;;  %v1287_v62 = vmax.f32 %v1005_v54, 0.0 }
 0x185   :  { %v1007_v56 = vpop.f32.mrf.mxu0  ;;  %3593 = vmatprep.mubr.msk.bf16.mxu1 %vm4177_vm1, %v4176_v2  ;;  %3722 = vmatpush3.bf16.msra.mxu1 %v4159_v49 }
 0x186   :  { %v1008_v59 = vadd.f32 %v4487_v9, %v1007_v56  ;;  %3723 = vmatprep.subr.bf16.mxu1 %v4176_v2  ;;  %v4162_v56 = vld [vmem:[%s5627_s5 + $0x10] sm:$0xff]  }
 0x187   :  { %v1009_v61 = vpop.f32.mrf.mxu0 }
 0x188   :  { %v1288_v0 = vmax.f32 %v1008_v59, 0.0 }
 0x189   :  { %v1012_v1 = vpop.f32.mrf.mxu0  ;;  %1203 = vmatmul.mubr.bf16.gmra.mxu0 %v4142_v57  ;;  %3724 = vmatpush3.bf16.msra.mxu1 %v4160_v58  ;;  %v4155_v58 = vld [vmem:[%s5624_s0 + $0x2f0] ss:$8 sps:$4 sm:$0xff]  }
 0x18a   :  { %v1367_v6 = vpack.c.bf16 %v1288_v0, %v1287_v62  ;;  %3227 = vmatprep.mubr.msk.bf16.mxu0 %vm678_vm0, %v4143_v60  ;;  %3725 = vmatprep.subr.bf16.mxu1 %v4176_v2  ;;  %v1013_v8 = vadd.f32 %v4487_v9, %v1012_v1  ;;  %v4156_v60 = vld [vmem:[%s5624_s0 + $0x304] ss:$8 sps:$4 sm:$0xff]  }
 0x18b   :  { %v1014_v7 = vpop.f32.mrf.mxu0 }
 0x18c   :  { %3594 = vmatmul.mubr.bf16.gmra.mxu1 %v1367_v6  ;;  %v1289_v17 = vmax.f32 %v1013_v8, 0.0 }
 0x18d   :  { %v1015_v10 = vpop.f32.mrf.mxu0  ;;  %3597 = vmatprep.mubr.msk.bf16.mxu1 %vm4177_vm1, %v4176_v2  ;;  %3726 = vmatpush3.bf16.msra.mxu1 %v4161_v5 }
 0x18e   :  { %v1016_v12 = vadd.f32 %v4487_v9, %v1015_v10  ;;  %3727 = vmatprep.subr.bf16.mxu1 %v4176_v2  ;;  %v4158_v10 = vld [vmem:[%s5624_s0 + $0x300] ss:$8 sps:$4 sm:$0xff]  }
 0x18f   :  { %v1017_v16 = vpop.f32.mrf.mxu0 }
 0x190   :  { %v1290_v19 = vmax.f32 %v1016_v12, 0.0 }
 0x191   :  { %v1020_v20 = vpop.f32.mrf.mxu0  ;;  %1211 = vmatmul.mubr.bf16.gmra.mxu0 %v4145_v11  ;;  %3728 = vmatpush3.bf16.msra.mxu1 %v4162_v56 }
 0x192   :  { %v1368_v21 = vpack.c.bf16 %v1290_v19, %v1289_v17  ;;  %3228 = vmatprep.mubr.msk.bf16.mxu0 %vm678_vm0, %v4146_v14  ;;  %v1021_v24 = vadd.f32 %v4487_v9, %v1020_v20  ;;  %3729 = vmatprep.subr.bf16.mxu1 %v4176_v2 }
 0x193   :  { %v1022_v23 = vpop.f32.mrf.mxu0 }
 0x194   :  { %3598 = vmatmul.mubr.bf16.gmra.mxu1 %v1368_v21  ;;  %v1291_v32 = vmax.f32 %v1021_v24, 0.0 }
 0x195   :  { %v1023_v25 = vpop.f32.mrf.mxu0  ;;  %3601 = vmatprep.mubr.msk.bf16.mxu1 %vm4177_vm1, %v4176_v2 }
 0x196   :  { %v1024_v29 = vadd.f32 %v4487_v9, %v1023_v25 }
 0x197   :  { %v1025_v31 = vpop.f32.mrf.mxu0 }
 0x198   :  { %v1292_v34 = vmax.f32 %v1024_v29, 0.0 }
 0x199   :  { %v1028_v35 = vpop.f32.mrf.mxu0  ;;  %1219 = vmatmul.mubr.bf16.gmra.mxu0 %v4148_v28 }
 0x19a   :  { %v1369_v36 = vpack.c.bf16 %v1292_v34, %v1291_v32  ;;  %3229 = vmatprep.mubr.msk.bf16.mxu0 %vm678_vm0, %v4150_v30  ;;  %v1029_v38 = vadd.f32 %v4487_v9, %v1028_v35 }
 0x19b   :  { %v1030_v37 = vpop.f32.mrf.mxu0 }
 0x19c   :  { %3602 = vmatmul.mubr.bf16.gmra.mxu1 %v1369_v36  ;;  %v1293_v47 = vmax.f32 %v1029_v38, 0.0 }
 0x19d   :  { %v1031_v41 = vpop.f32.mrf.mxu0  ;;  %3605 = vmatprep.mubr.msk.bf16.mxu1 %vm4177_vm1, %v4176_v2 }
 0x19e   :  { %v1032_v43 = vadd.f32 %v4487_v9, %v1031_v41 }
 0x19f   :  { %v1033_v46 = vpop.f32.mrf.mxu0 }
 0x1a0   :  { %v1294_v48 = vmax.f32 %v1032_v43, 0.0 }
 0x1a1   :  { %v1036_v49 = vpop.f32.mrf.mxu0  ;;  %1227 = vmatmul.mubr.bf16.gmra.mxu0 %v4152_v42 }
 0x1a2   :  { %v1370_v50 = vpack.c.bf16 %v1294_v48, %v1293_v47  ;;  %3230 = vmatprep.mubr.msk.bf16.mxu0 %vm678_vm0, %v4153_v45  ;;  %v1037_v54 = vadd.f32 %v4487_v9, %v1036_v49  ;;  %v4163_v47 = vld [vmem:[%s5627_s5 + $0x8] sm:$0xff]  }
 0x1a3   :  { %v1038_v52 = vpop.f32.mrf.mxu0  ;;  %3730 = vmatpush3.bf16.msra.mxu1 %v4163_v47 }
 0x1a4   :  { %3606 = vmatmul.mubr.bf16.gmra.mxu1 %v1370_v50  ;;  %v1295_v62 = vmax.f32 %v1037_v54, 0.0  ;;  %3731 = vmatprep.subr.bf16.mxu1 %v4176_v2 }
 0x1a5   :  { %v1039_v57 = vpop.f32.mrf.mxu0  ;;  %3609 = vmatprep.mubr.msk.bf16.mxu1 %vm4177_vm1, %v4176_v2 }
 0x1a6   :  { %v1040_v59 = vadd.f32 %v4487_v9, %v1039_v57 }
 0x1a7   :  { %v1041_v61 = vpop.f32.mrf.mxu0 }
 0x1a8   :  { %v1296_v0 = vmax.f32 %v1040_v59, 0.0 }
 0x1a9   :  { %v1044_v1 = vpop.f32.mrf.mxu0  ;;  %1235 = vmatmul.mubr.bf16.gmra.mxu0 %v4155_v58 }
 0x1aa   :  { %v1371_v5 = vpack.c.bf16 %v1296_v0, %v1295_v62  ;;  %3231 = vmatprep.mubr.msk.bf16.mxu0 %vm678_vm0, %v4156_v60  ;;  %v1045_v7 = vadd.f32 %v4487_v9, %v1044_v1 }
 0x1ab   :  { %v1046_v6 = vpop.f32.mrf.mxu0 }
 0x1ac   :  { %3610 = vmatmul.mubr.bf16.gmra.mxu1 %v1371_v5  ;;  %v1297_v14 = vmax.f32 %v1045_v7, 0.0 }
 0x1ad   :  { %v1047_v8 = vpop.f32.mrf.mxu0  ;;  %3613 = vmatprep.mubr.msk.bf16.mxu1 %vm4177_vm1, %v4176_v2 }
 0x1ae   :  { %v1048_v11 = vadd.f32 %v4487_v9, %v1047_v8 }
 0x1af   :  { %v1049_v12 = vpop.f32.mrf.mxu0 }
 0x1b0   :  { %v1298_v16 = vmax.f32 %v1048_v11, 0.0 }
 0x1b1   :  { %v1052_v17 = vpop.f32.mrf.mxu0  ;;  %1243 = vmatmul.mubr.bf16.gmra.mxu0 %v4158_v10 }
 0x1b2   :  { %v1372_v19 = vpack.c.bf16 %v1298_v16, %v1297_v14  ;;  %3521 = vmatprep.mubr.msk.bf16.mxu0 %vm4177_vm1, %v4176_v2  ;;  %v1053_v21 = vadd.f32 %v4487_v9, %v1052_v17 }
 0x1b3   :  { %v1054_v20 = vpop.f32.mrf.mxu0 }
 0x1b4   :  { %3614 = vmatmul.mubr.bf16.gmra.mxu1 %v1372_v19  ;;  %v1299_v28 = vmax.f32 %v1053_v21, 0.0 }
 0x1b5   :  { %v1055_v23 = vpop.f32.mrf.mxu0  ;;  %3617 = vmatprep.mubr.msk.bf16.mxu1 %vm4177_vm1, %v4176_v2 }
 0x1b6   :  { %v1056_v24 = vadd.f32 %v4487_v9, %v1055_v23 }
 0x1b7   :  { %v1057_v25 = vpop.f32.mrf.mxu0 }
 0x1b8   :  { %v1300_v29 = vmax.f32 %v1056_v24, 0.0 }
 0x1b9   :  { %v1060_v30 = vpop.f32.mrf.mxu0  ;;  %3522 = vmatmul.mubr.bf16.vlgmr.msra.gmra.mxu0 %v4501_v22 }
 0x1ba   :  { %v1373_v31 = vpack.c.bf16 %v1300_v29, %v1299_v28  ;;  %3525 = vmatprep.mubr.msk.bf16.mxu0 %vm4177_vm1, %v4176_v2  ;;  %v1061_v34 = vadd.f32 %v4487_v9, %v1060_v30 }
 0x1bb   :  { %v1062_v32 = vpop.f32.mrf.mxu0 }
 0x1bc   :  { %3618 = vmatmul.mubr.bf16.gmra.mxu1 %v1373_v31  ;;  %v1301_v38 = vmax.f32 %v1061_v34, 0.0  ;;  %v4164_v32 = vld [vmem:[%s5627_s5] sm:$0xff]  }
 0x1bd   :  { %v1063_v35 = vpop.f32.mrf.mxu0  ;;  %3621 = vmatprep.mubr.msk.bf16.mxu1 %vm4177_vm1, %v4176_v2  ;;  %3732 = vmatpush3.bf16.msra.mxu1 %v4164_v32 }
 0x1be   :  { %v1064_v36 = vadd.f32 %v4487_v9, %v1063_v35 }
 0x1bf   :  { %v1065_v37 = vpop.f32.mrf.mxu0 }
 0x1c0   :  { %v1302_v41 = vmax.f32 %v1064_v36, 0.0 }
 0x1c1   :  { %v1068_v42 = vpop.f32.mrf.mxu0  ;;  %3526 = vmatmul.mubr.bf16.gmra.mxu0 %v4515_v33 }
 0x1c2   :  { %v1374_v22 = vpack.c.bf16 %v1302_v41, %v1301_v38  ;;  %3529 = vmatprep.mubr.msk.bf16.mxu0 %vm4177_vm1, %v4176_v2  ;;  %v1069_v45 = vadd.f32 %v4487_v9, %v1068_v42 }
 0x1c3   :  { %v1070_v43 = vpop.f32.mrf.mxu0 }
 0x1c4   :  { %3622 = vmatmul.mubr.bf16.gmra.mxu1 %v1374_v22  ;;  %v1303_v33 = vmax.f32 %v1069_v45, 0.0 }
 0x1c5   :  { %v1071_v46 = vpop.f32.mrf.mxu0  ;;  %3625 = vmatprep.mubr.msk.bf16.mxu1 %vm4177_vm1, %v4176_v2 }
 0x1c6   :  { %v1072_v48 = vadd.f32 %v4487_v9, %v1071_v46 }
 0x1c7   :  { %v1073_v49 = vpop.f32.mrf.mxu0 }
 0x1c8   :  { %v1304_v50 = vmax.f32 %v1072_v48, 0.0 }
 0x1c9   :  { %v1076_v52 = vpop.f32.mrf.mxu0  ;;  %3530 = vmatmul.mubr.bf16.gmra.mxu0 %v4526_v44 }
 0x1ca   :  { %v1375_v54 = vpack.c.bf16 %v1304_v50, %v1303_v33  ;;  %3533 = vmatprep.mubr.msk.bf16.mxu0 %vm4177_vm1, %v4176_v2  ;;  %v1077_v57 = vadd.f32 %v4487_v9, %v1076_v52 }
 0x1cb   :  { %v1078_v56 = vpop.f32.mrf.mxu0 }
 0x1cc   :  { %3626 = vmatmul.mubr.bf16.gmra.mxu1 %v1375_v54  ;;  %v1305_v61 = vmax.f32 %v1077_v57, 0.0 }
 0x1cd   :  { %v1079_v58 = vpop.f32.mrf.mxu0  ;;  %3629 = vmatprep.mubr.msk.bf16.mxu1 %vm4177_vm1, %v4176_v2 }
 0x1ce   :  { %v1080_v59 = vadd.f32 %v4487_v9, %v1079_v58 }
 0x1cf   :  { %v1081_v60 = vpop.f32.mrf.mxu0 }
 0x1d0   :  { %v1306_v62 = vmax.f32 %v1080_v59, 0.0 }
 0x1d1   :  { %v1084_v0 = vpop.f32.mrf.mxu0  ;;  %3534 = vmatmul.mubr.bf16.gmra.mxu0 %v4537_v55 }
 0x1d2   :  { %v1376_v44 = vpack.c.bf16 %v1306_v62, %v1305_v61  ;;  %3537 = vmatprep.mubr.msk.bf16.mxu0 %vm4177_vm1, %v4176_v2  ;;  %v1085_v5 = vadd.f32 %v4487_v9, %v1084_v0 }
 0x1d3   :  { %v1086_v1 = vpop.f32.mrf.mxu0 }
 0x1d4   :  { %3630 = vmatmul.mubr.bf16.gmra.mxu1 %v1376_v44  ;;  %v1307_v10 = vmax.f32 %v1085_v5, 0.0 }
 0x1d5   :  { %v1087_v6 = vpop.f32.mrf.mxu0  ;;  %3633 = vmatprep.mubr.msk.bf16.mxu1 %vm4177_vm1, %v4176_v2 }
 0x1d6   :  { %v1088_v7 = vadd.f32 %v4487_v9, %v1087_v6 }
 0x1d7   :  { %v1089_v8 = vpop.f32.mrf.mxu0 }
 0x1d8   :  { %v1308_v11 = vmax.f32 %v1088_v7, 0.0 }
 0x1d9   :  { %v1092_v12 = vpop.f32.mrf.mxu0  ;;  %3538 = vmatmul.mubr.bf16.gmra.mxu0 %v4548_v3 }
 0x1da   :  { %v1377_v55 = vpack.c.bf16 %v1308_v11, %v1307_v10  ;;  %3541 = vmatprep.mubr.msk.bf16.mxu0 %vm4177_vm1, %v4176_v2  ;;  %v1093_v16 = vadd.f32 %v4487_v9, %v1092_v12 }
 0x1db   :  { %v1094_v14 = vpop.f32.mrf.mxu0 }
 0x1dc   :  { %3634 = vmatmul.mubr.bf16.gmra.mxu1 %v1377_v55  ;;  %v1309_v21 = vmax.f32 %v1093_v16, 0.0  ;;  %v4867_v14 = vld [vmem:[%s5626_s2] ss:$0 sm:$0xff] }
 0x1dd   :  { %v1095_v17 = vpop.f32.mrf.mxu0  ;;  %3637 = vmatprep.mubr.msk.bf16.mxu1 %vm4177_vm1, %v4176_v2 }
 0x1de   :  { %v1096_v19 = vadd.f32 %v4487_v9, %v1095_v17 }
 0x1df   :  { %v1097_v20 = vpop.f32.mrf.mxu0 }
 0x1e0   :  { %v1310_v23 = vmax.f32 %v1096_v19, 0.0 }
 0x1e1   :  { %v1100_v24 = vpop.f32.mrf.mxu0  ;;  %3542 = vmatmul.mubr.bf16.gmra.mxu0 %v4559_v15 }
 0x1e2   :  { %v1378_v3 = vpack.c.bf16 %v1310_v23, %v1309_v21  ;;  %3545 = vmatprep.mubr.msk.bf16.mxu0 %vm4177_vm1, %v4176_v2  ;;  %v1101_v28 = vadd.f32 %v4487_v9, %v1100_v24 }
 0x1e3   :  { %v1102_v25 = vpop.f32.mrf.mxu0 }
 0x1e4   :  { %3638 = vmatmul.mubr.bf16.gmra.mxu1 %v1378_v3  ;;  %v1311_v15 = vmax.f32 %v1101_v28, 0.0 }
 0x1e5   :  { %v1103_v29 = vpop.f32.mrf.mxu0  ;;  %3641 = vmatprep.mubr.msk.bf16.mxu1 %vm4177_vm1, %v4176_v2 }
 0x1e6   :  { %v1104_v30 = vadd.f32 %v4487_v9, %v1103_v29 }
 0x1e7   :  { %v1105_v31 = vpop.f32.mrf.mxu0 }
 0x1e8   :  { %v1312_v34 = vmax.f32 %v1104_v30, 0.0 }
 0x1e9   :  { %v1108_v35 = vpop.f32.mrf.mxu0  ;;  %3546 = vmatmul.mubr.bf16.gmra.mxu0 %v4570_v27 }
 0x1ea   :  { %v1379_v36 = vpack.c.bf16 %v1312_v34, %v1311_v15  ;;  %3549 = vmatprep.mubr.msk.bf16.mxu0 %vm4177_vm1, %v4176_v2  ;;  %v1109_v38 = vadd.f32 %v4487_v9, %v1108_v35 }
 0x1eb   :  { %v1110_v37 = vpop.f32.mrf.mxu0 }
 0x1ec   :  { %3642 = vmatmul.mubr.bf16.gmra.mxu1 %v1379_v36  ;;  %v1313_v43 = vmax.f32 %v1109_v38, 0.0 }
 0x1ed   :  { %v1111_v41 = vpop.f32.mrf.mxu0  ;;  %3645 = vmatprep.mubr.msk.bf16.mxu1 %vm4177_vm1, %v4176_v2 }
 0x1ee   :  { %v1112_v42 = vadd.f32 %v4487_v9, %v1111_v41 }
 0x1ef   :  { %v1113_v22 = vpop.f32.mrf.mxu0 }
 0x1f0   :  { %v1314_v45 = vmax.f32 %v1112_v42, 0.0 }
 0x1f1   :  { %v1116_v46 = vpop.f32.mrf.mxu0  ;;  %3550 = vmatmul.mubr.bf16.gmra.mxu0 %v4581_v39 }
 0x1f2   :  { %v1380_v27 = vpack.c.bf16 %v1314_v45, %v1313_v43  ;;  %3553 = vmatprep.mubr.msk.bf16.mxu0 %vm4177_vm1, %v4176_v2  ;;  %v1117_v48 = vadd.f32 %v4487_v9, %v1116_v46 }
 0x1f3   :  { %v1118_v47 = vpop.f32.mrf.mxu0 }
 0x1f4   :  { %3646 = vmatmul.mubr.bf16.gmra.mxu1 %v1380_v27  ;;  %v1315_v52 = vmax.f32 %v1117_v48, 0.0 }
 0x1f5   :  { %v1119_v49 = vpop.f32.mrf.mxu0  ;;  %3649 = vmatprep.mubr.msk.bf16.mxu1 %vm4177_vm1, %v4176_v2 }
 0x1f6   :  { %v1120_v33 = vadd.f32 %v4487_v9, %v1119_v49 }
 0x1f7   :  { %v1121_v50 = vpop.f32.mrf.mxu0 }
 0x1f8   :  { %v1316_v54 = vmax.f32 %v1120_v33, 0.0 }
 0x1f9   :  { %v1124_v56 = vpop.f32.mrf.mxu0  ;;  %3554 = vmatmul.mubr.bf16.gmra.mxu0 %v4592_v51 }
 0x1fa   :  { %v1381_v39 = vpack.c.bf16 %v1316_v54, %v1315_v52  ;;  %3557 = vmatprep.mubr.msk.bf16.mxu0 %vm4177_vm1, %v4176_v2  ;;  %v1125_v58 = vadd.f32 %v4487_v9, %v1124_v56 }
 0x1fb   :  { %v1126_v57 = vpop.f32.mrf.mxu0 }
 0x1fc   :  { %3650 = vmatmul.mubr.bf16.gmra.mxu1 %v1381_v39  ;;  %v1317_v62 = vmax.f32 %v1125_v58, 0.0 }
 0x1fd   :  { %v1127_v59 = vpop.f32.mrf.mxu0  ;;  %3653 = vmatprep.mubr.msk.bf16.mxu1 %vm4177_vm1, %v4176_v2 }
 0x1fe   :  { %v1128_v60 = vadd.f32 %v4487_v9, %v1127_v59 }
 0x1ff   :  { %v1129_v61 = vpop.f32.mrf.mxu0 }
 0x200   :  { %v1318_v0 = vmax.f32 %v1128_v60, 0.0 }
 0x201   :  { %v1132_v44 = vpop.f32.mrf.mxu0  ;;  %3558 = vmatmul.mubr.bf16.gmra.mxu0 %v4603_v63 }
 0x202   :  { %v1382_v51 = vpack.c.bf16 %v1318_v0, %v1317_v62  ;;  %3561 = vmatprep.mubr.msk.bf16.mxu0 %vm4177_vm1, %v4176_v2  ;;  %v1133_v5 = vadd.f32 %v4487_v9, %v1132_v44 }
 0x203   :  { %v1134_v1 = vpop.f32.mrf.mxu0 }
 0x204   :  { %3654 = vmatmul.mubr.bf16.gmra.mxu1 %v1382_v51  ;;  %v1319_v10 = vmax.f32 %v1133_v5, 0.0 }
 0x205   :  { %v1135_v6 = vpop.f32.mrf.mxu0  ;;  %3657 = vmatprep.mubr.msk.bf16.mxu1 %vm4177_vm1, %v4176_v2 }
 0x206   :  { %v1136_v7 = vadd.f32 %v4487_v9, %v1135_v6 }
 0x207   :  { %v1137_v8 = vpop.f32.mrf.mxu0 }
 0x208   :  { %v1320_v11 = vmax.f32 %v1136_v7, 0.0 }
 0x209   :  { %v1140_v12 = vpop.f32.mrf.mxu0  ;;  %3562 = vmatmul.mubr.bf16.gmra.mxu0 %v4614_v13 }
 0x20a   :  { %v1383_v63 = vpack.c.bf16 %v1320_v11, %v1319_v10  ;;  %3565 = vmatprep.mubr.msk.bf16.mxu0 %vm4177_vm1, %v4176_v2  ;;  %v1141_v16 = vadd.f32 %v4867_v14, %v1140_v12 }
 0x20b   :  { %v1142_v55 = vpop.f32.mrf.mxu0 }
 0x20c   :  { %3658 = vmatmul.mubr.bf16.gmra.mxu1 %v1383_v63  ;;  %v1321_v19 = vmax.f32 %v1141_v16, 0.0 }
 0x20d   :  { %v1143_v9 = vpop.f32.mrf.mxu0  ;;  %3661 = vmatprep.mubr.msk.bf16.mxu1 %vm4177_vm1, %v4176_v2 }
 0x20e   :  { %v1144_v17 = vadd.f32 %v4867_v14, %v1143_v9 }
 0x20f   :  { %v1145_v13 = vpop.f32.mrf.mxu0 }
 0x210   :  { %v1322_v20 = vmax.f32 %v1144_v17, 0.0 }
 0x211   :  { %v1148_v21 = vpop.f32.mrf.mxu0  ;;  %3566 = vmatmul.mubr.bf16.gmra.mxu0 %v4625_v26 }
 0x212   :  { %v1384_v23 = vpack.c.bf16 %v1322_v20, %v1321_v19  ;;  %3569 = vmatprep.mubr.msk.bf16.mxu0 %vm4177_vm1, %v4176_v2  ;;  %v1149_v3 = vadd.f32 %v4867_v14, %v1148_v21 }
 0x213   :  { %v1150_v24 = vpop.f32.mrf.mxu0 }
 0x214   :  { %3662 = vmatmul.mubr.bf16.gmra.mxu1 %v1384_v23  ;;  %v1323_v30 = vmax.f32 %v1149_v3, 0.0 }
 0x215   :  { %v1151_v25 = vpop.f32.mrf.mxu0  ;;  %3665 = vmatprep.mubr.msk.bf16.mxu1 %vm4177_vm1, %v4176_v2 }
 0x216   :  { %v1152_v28 = vadd.f32 %v4867_v14, %v1151_v25 }
 0x217   :  { %v1153_v29 = vpop.f32.mrf.mxu0 }
 0x218   :  { %v1324_v31 = vmax.f32 %v1152_v28, 0.0 }
 0x219   :  { %v1156_v32 = vpop.f32.mrf.mxu0  ;;  %3570 = vmatmul.mubr.bf16.gmra.mxu0 %v4636_v40 }
 0x21a   :  { %v1385_v26 = vpack.c.bf16 %v1324_v31, %v1323_v30  ;;  %3573 = vmatprep.mubr.msk.bf16.mxu0 %vm4177_vm1, %v4176_v2  ;;  %v1157_v34 = vadd.f32 %v4867_v14, %v1156_v32 }
 0x21b   :  { %v1158_v15 = vpop.f32.mrf.mxu0 }
 0x21c   :  { %3666 = vmatmul.mubr.bf16.gmra.mxu1 %v1385_v26  ;;  %v1325_v38 = vmax.f32 %v1157_v34, 0.0 }
 0x21d   :  { %v1159_v35 = vpop.f32.mrf.mxu0  ;;  %3669 = vmatprep.mubr.msk.bf16.mxu1 %vm4177_vm1, %v4176_v2 }
 0x21e   :  { %v1160_v36 = vadd.f32 %v4867_v14, %v1159_v35 }
 0x21f   :  { %v1161_v37 = vpop.f32.mrf.mxu0 }
 0x220   :  { %v1326_v41 = vmax.f32 %v1160_v36, 0.0 }
 0x221   :  { %v1164_v42 = vpop.f32.mrf.mxu0  ;;  %3574 = vmatmul.mubr.bf16.gmra.mxu0 %v4647_v53 }
 0x222   :  { %v1386_v40 = vpack.c.bf16 %v1326_v41, %v1325_v38  ;;  %3577 = vmatprep.mubr.msk.bf16.mxu0 %vm4177_vm1, %v4176_v2  ;;  %v1165_v43 = vadd.f32 %v4867_v14, %v1164_v42 }
 0x223   :  { %v1166_v22 = vpop.f32.mrf.mxu0 }
 0x224   :  { %3670 = vmatmul.mubr.bf16.gmra.mxu1 %v1386_v40  ;;  %v1327_v47 = vmax.f32 %v1165_v43, 0.0 }
 0x225   :  { %v1167_v45 = vpop.f32.mrf.mxu0  ;;  %3673 = vmatprep.mubr.msk.bf16.mxu1 %vm4177_vm1, %v4176_v2 }
 0x226   :  { %v1168_v46 = vadd.f32 %v4867_v14, %v1167_v45 }
 0x227   :  { %v1169_v27 = vpop.f32.mrf.mxu0 }
 0x228   :  { %v1328_v48 = vmax.f32 %v1168_v46, 0.0 }
 0x229   :  { %v1172_v49 = vpop.f32.mrf.mxu0  ;;  %3578 = vmatmul.mubr.bf16.gmra.mxu0 %v4658_v4 }
 0x22a   :  { %v1387_v53 = vpack.c.bf16 %v1328_v48, %v1327_v47  ;;  %3581 = vmatprep.mubr.msk.bf16.mxu0 %vm4177_vm1, %v4176_v2  ;;  %v1173_v50 = vadd.f32 %v4867_v14, %v1172_v49 }
 0x22b   :  { %v1174_v33 = vpop.f32.mrf.mxu0 }
 0x22c   :  { %3674 = vmatmul.mubr.bf16.gmra.mxu1 %v1387_v53  ;;  %v1329_v39 = vmax.f32 %v1173_v50, 0.0 }
 0x22d   :  { %v1175_v52 = vpop.f32.mrf.mxu0  ;;  %3677 = vmatprep.mubr.msk.bf16.mxu1 %vm4177_vm1, %v4176_v2 }
 0x22e   :  { %v1176_v54 = vadd.f32 %v4867_v14, %v1175_v52 }
 0x22f   :  { %v1177_v56 = vpop.f32.mrf.mxu0 }
 0x230   :  { %v1330_v57 = vmax.f32 %v1176_v54, 0.0 }
 0x231   :  { %v1180_v58 = vpop.f32.mrf.mxu0  ;;  %3582 = vmatmul.mubr.bf16.gmra.mxu0 %v4669_v18  ;;  %v4910_v18 = vld [vmem:[%s5628_s4] ss:$0 sm:$0xff] }
 0x232   :  { %v1388_v4 = vpack.c.bf16 %v1330_v57, %v1329_v39  ;;  %v1181_v60 = vadd.f32 %v4867_v14, %v1180_v58 }
 0x233   :  { %v1182_v59 = vpop.f32.mrf.mxu0 }
 0x234   :  { %3678 = vmatmul.mubr.bf16.gmra.mxu1 %v1388_v4  ;;  %v1331_v44 = vmax.f32 %v1181_v60, 0.0 }
 0x235   :  { %v1183_v61 = vpop.f32.mrf.mxu0  ;;  %3681 = vmatprep.mubr.msk.bf16.mxu1 %vm4177_vm1, %v4176_v2 }
 0x236   :  { %v1184_v62 = vadd.f32 %v4867_v14, %v1183_v61 }
 0x237   :  { %v1185_v0 = vpop.f32.mrf.mxu0 }
 0x238   :  { %v1332_v51 = vmax.f32 %v1184_v62, 0.0 }
 0x239   :  { %v1188_v1 = vpop.f32.mrf.mxu0 }
 0x23a   :  { %v1389_v5 = vpack.c.bf16 %v1332_v51, %v1331_v44  ;;  %v1189_v7 = vadd.f32 %v4867_v14, %v1188_v1 }
 0x23b   :  { %v1190_v6 = vpop.f32.mrf.mxu0 }
 0x23c   :  { %v1631_v8 = vpop.f32.mrf.mxu1  ;;  %3682 = vmatmul.mubr.bf16.gmra.mxu1 %v1389_v5  ;;  %v1333_v16 = vmax.f32 %v1189_v7, 0.0 }
 0x23d   :  { %v1191_v10 = vpop.f32.mrf.mxu0  ;;  %3685 = vmatprep.mubr.msk.bf16.mxu1 %vm4177_vm1, %v4176_v2  ;;  %v1632_v63 = vadd.f32 %v4910_v18, %v1631_v8 }
 0x23e   :  { %v1192_v11 = vadd.f32 %v4867_v14, %v1191_v10  ;;  %v3587_v12 = vpop.f32.mrf.mxu1 }
 0x23f   :  { %v1193_v55 = vpop.f32.mrf.mxu0  ;;  %v1926_v23 = vmax.f32 %v1632_v63, 0.0 }
 0x240   :  { %v1334_v9 = vmax.f32 %v1192_v11, 0.0  ;;  %v1634_v17 = vpop.f32.mrf.mxu1 }
 0x241   :  { %v1635_v13 = vadd.f32 %v4910_v18, %v1634_v17  ;;  %v1196_v19 = vpop.f32.mrf.mxu0 }
 0x242   :  { %v1390_v20 = vpack.c.bf16 %v1334_v9, %v1333_v16  ;;  %v3588_v21 = vpop.f32.mrf.mxu1  ;;  %v1197_v25 = vadd.f32 %v4867_v14, %v1196_v19 }
 0x243   :  { %v1927_v24 = vmax.f32 %v1635_v13, 0.0  ;;  %v1198_v3 = vpop.f32.mrf.mxu0 }
 0x244   :  { %v1639_v28 = vpop.f32.mrf.mxu1  ;;  %3686 = vmatmul.mubr.bf16.gmra.mxu1 %v1390_v20  ;;  %v1335_v34 = vmax.f32 %v1197_v25, 0.0 }
 0x245   :  { %v4918_v29 = vpack.c.bf16 %v1927_v24, %v1926_v23  ;;  %v1199_v30 = vpop.f32.mrf.mxu0  ;;  %3689 = vmatprep.mubr.msk.bf16.mxu1 %vm4177_vm1, %v4176_v2  ;;  %v1640_v26 = vadd.f32 %v4910_v18, %v1639_v28 }
 0x246   :  { %v1200_v31 = vadd.f32 %v4867_v14, %v1199_v30  ;;  %v3591_v32 = vpop.f32.mrf.mxu1 }
 0x247   :  { %v1201_v15 = vpop.f32.mrf.mxu0  ;;  %v1928_v40 = vmax.f32 %v1640_v26, 0.0 }
 0x248   :  { %v1336_v35 = vmax.f32 %v1200_v31, 0.0  ;;  %v1642_v36 = vpop.f32.mrf.mxu1 }
 0x249   :  { %v1643_v37 = vadd.f32 %v4910_v18, %v1642_v36  ;;  %v1204_v38 = vpop.f32.mrf.mxu0 }
 0x24a   :  { %v1391_v41 = vpack.c.bf16 %v1336_v35, %v1335_v34  ;;  %v3592_v42 = vpop.f32.mrf.mxu1  ;;  %v1205_v45 = vadd.f32 %v4867_v14, %v1204_v38 }
 0x24b   :  { %v1929_v22 = vmax.f32 %v1643_v37, 0.0  ;;  %v1206_v43 = vpop.f32.mrf.mxu0 }
 0x24c   :  { %v1647_v46 = vpop.f32.mrf.mxu1  ;;  %3690 = vmatmul.mubr.bf16.gmra.mxu1 %v1391_v41  ;;  %v1337_v50 = vmax.f32 %v1205_v45, 0.0 }
 0x24d   :  { %v4926_v27 = vpack.c.bf16 %v1929_v22, %v1928_v40  ;;  %v1207_v47 = vpop.f32.mrf.mxu0  ;;  %3693 = vmatprep.mubr.msk.bf16.mxu1 %vm4177_vm1, %v4176_v2  ;;  %v1648_v53 = vadd.f32 %v4910_v18, %v1647_v46 }
 0x24e   :  { %v1208_v48 = vadd.f32 %v4867_v14, %v1207_v47  ;;  %v3595_v49 = vpop.f32.mrf.mxu1 }
 0x24f   :  { %v1209_v33 = vpop.f32.mrf.mxu0  ;;  %v1930_v4 = vmax.f32 %v1648_v53, 0.0 }
 0x250   :  { %v1338_v52 = vmax.f32 %v1208_v48, 0.0  ;;  %v1650_v54 = vpop.f32.mrf.mxu1 }
 0x251   :  { %v1651_v56 = vadd.f32 %v4910_v18, %v1650_v54  ;;  %v1212_v39 = vpop.f32.mrf.mxu0 }
 0x252   :  { %v1392_v57 = vpack.c.bf16 %v1338_v52, %v1337_v50  ;;  %v3596_v58 = vpop.f32.mrf.mxu1  ;;  %v1213_v61 = vadd.f32 %v4867_v14, %v1212_v39 }
 0x253   :  { %v1931_v59 = vmax.f32 %v1651_v56, 0.0  ;;  %v1214_v60 = vpop.f32.mrf.mxu0 }
 0x254   :  { %v1655_v62 = vpop.f32.mrf.mxu1  ;;  %3694 = vmatmul.mubr.bf16.gmra.mxu1 %v1392_v57  ;;  %v1339_v7 = vmax.f32 %v1213_v61, 0.0 }
 0x255   :  { %v4934_v0 = vpack.c.bf16 %v1931_v59, %v1930_v4  ;;  %v1215_v44 = vpop.f32.mrf.mxu0  ;;  %3697 = vmatprep.mubr.msk.bf16.mxu1 %vm4177_vm1, %v4176_v2  ;;  %v1656_v5 = vadd.f32 %v4910_v18, %v1655_v62 }
 0x256   :  { %v1216_v51 = vadd.f32 %v4867_v14, %v1215_v44  ;;  %v3599_v1 = vpop.f32.mrf.mxu1 }
 0x257   :  { %v1217_v6 = vpop.f32.mrf.mxu0  ;;  %v1932_v16 = vmax.f32 %v1656_v5, 0.0 }
 0x258   :  { %v1340_v8 = vmax.f32 %v1216_v51, 0.0  ;;  %v1658_v10 = vpop.f32.mrf.mxu1 }
 0x259   :  { %v1659_v11 = vadd.f32 %v4910_v18, %v1658_v10  ;;  %v1220_v12 = vpop.f32.mrf.mxu0 }
 0x25a   :  { %v1393_v63 = vpack.c.bf16 %v1340_v8, %v1339_v7  ;;  %v3600_v55 = vpop.f32.mrf.mxu1  ;;  %v1221_v13 = vadd.f32 %v4867_v14, %v1220_v12 }
 0x25b   :  { %v1933_v9 = vmax.f32 %v1659_v11, 0.0  ;;  %v1222_v17 = vpop.f32.mrf.mxu0 }
 0x25c   :  { %v1663_v19 = vpop.f32.mrf.mxu1  ;;  %3698 = vmatmul.mubr.bf16.gmra.mxu1 %v1393_v63  ;;  %v1341_v28 = vmax.f32 %v1221_v13, 0.0 }
 0x25d   :  { %v4942_v20 = vpack.c.bf16 %v1933_v9, %v1932_v16  ;;  %v1223_v21 = vpop.f32.mrf.mxu0  ;;  %3701 = vmatprep.mubr.msk.bf16.mxu1 %vm4177_vm1, %v4176_v2  ;;  %v1664_v3 = vadd.f32 %v4910_v18, %v1663_v19 }
 0x25e   :  { %v1224_v23 = vadd.f32 %v4867_v14, %v1223_v21  ;;  %v3603_v24 = vpop.f32.mrf.mxu1 }
 0x25f   :  { %v1225_v25 = vpop.f32.mrf.mxu0  ;;  %v1934_v35 = vmax.f32 %v1664_v3, 0.0 }
 0x260   :  { %v1342_v30 = vmax.f32 %v1224_v23, 0.0  ;;  %v1666_v31 = vpop.f32.mrf.mxu1 }
 0x261   :  { %v1667_v32 = vadd.f32 %v4910_v18, %v1666_v31  ;;  %v1228_v26 = vpop.f32.mrf.mxu0 }
 0x262   :  { %v1394_v15 = vpack.c.bf16 %v1342_v30, %v1341_v28  ;;  %v3604_v34 = vpop.f32.mrf.mxu1  ;;  %v1229_v38 = vadd.f32 %v4867_v14, %v1228_v26 }
 0x263   :  { %v1935_v36 = vmax.f32 %v1667_v32, 0.0  ;;  %v1230_v37 = vpop.f32.mrf.mxu0 }
 0x264   :  { %v1671_v41 = vpop.f32.mrf.mxu1  ;;  %3702 = vmatmul.mubr.bf16.gmra.mxu1 %v1394_v15  ;;  %v1343_v47 = vmax.f32 %v1229_v38, 0.0 }
 0x265   :  { %v4950_v42 = vpack.c.bf16 %v1935_v36, %v1934_v35  ;;  %v1231_v40 = vpop.f32.mrf.mxu0  ;;  %3705 = vmatprep.mubr.msk.bf16.mxu1 %vm4177_vm1, %v4176_v2  ;;  %v1672_v45 = vadd.f32 %v4910_v18, %v1671_v41 }
 0x266   :  { %v1232_v22 = vadd.f32 %v4867_v14, %v1231_v40  ;;  %v3607_v43 = vpop.f32.mrf.mxu1 }
 0x267   :  { %v1233_v46 = vpop.f32.mrf.mxu0  ;;  %v1936_v54 = vmax.f32 %v1672_v45, 0.0 }
 0x268   :  { %v1344_v48 = vmax.f32 %v1232_v22, 0.0  ;;  %v1674_v49 = vpop.f32.mrf.mxu1 }
 0x269   :  { %v1675_v53 = vadd.f32 %v4910_v18, %v1674_v49  ;;  %v1236_v33 = vpop.f32.mrf.mxu0 }
 0x26a   :  { %v1395_v50 = vpack.c.bf16 %v1344_v48, %v1343_v47  ;;  %v3608_v52 = vpop.f32.mrf.mxu1  ;;  %v1237_v57 = vadd.f32 %v4867_v14, %v1236_v33 }
 0x26b   :  { %v1937_v56 = vmax.f32 %v1675_v53, 0.0  ;;  %v1238_v39 = vpop.f32.mrf.mxu0 }
 0x26c   :  { %v1679_v58 = vpop.f32.mrf.mxu1  ;;  %3706 = vmatmul.mubr.bf16.gmra.mxu1 %v1395_v50  ;;  %v1345_v51 = vmax.f32 %v1237_v57, 0.0 }
 0x26d   :  { %v4958_v4 = vpack.c.bf16 %v1937_v56, %v1936_v54  ;;  %v1239_v59 = vpop.f32.mrf.mxu0  ;;  %3709 = vmatprep.mubr.msk.bf16.mxu1 %vm4177_vm1, %v4176_v2  ;;  %v1680_v62 = vadd.f32 %v4910_v18, %v1679_v58 }
 0x26e   :  { %v1240_v60 = vadd.f32 %v4867_v14, %v1239_v59  ;;  %v3611_v61 = vpop.f32.mrf.mxu1 }
 0x26f   :  { %v1241_v44 = vpop.f32.mrf.mxu0  ;;  %v1938_v11 = vmax.f32 %v1680_v62, 0.0 }
 0x270   :  { %v1346_v1 = vmax.f32 %v1240_v60, 0.0  ;;  %v1682_v5 = vpop.f32.mrf.mxu1 }
 0x271   :  { %v1683_v6 = vadd.f32 %v4910_v18, %v1682_v5  ;;  %v1244_v7 = vpop.f32.mrf.mxu0 }
 0x272   :  { %v1396_v8 = vpack.c.bf16 %v1346_v1, %v1345_v51  ;;  %v3612_v10 = vpop.f32.mrf.mxu1  ;;  %v1245_v55 = vadd.f32 %v4867_v14, %v1244_v7 }
 0x273   :  { %v1939_v12 = vmax.f32 %v1683_v6, 0.0  ;;  %v1246_v63 = vpop.f32.mrf.mxu0 }
 0x274   :  { %v1687_v16 = vpop.f32.mrf.mxu1  ;;  %3710 = vmatmul.mubr.bf16.gmra.mxu1 %v1396_v8  ;;  %v1347_v24 = vmax.f32 %v1245_v55, 0.0 }
 0x275   :  { %v4966_v9 = vpack.c.bf16 %v1939_v12, %v1938_v11  ;;  %v1247_v17 = vpop.f32.mrf.mxu0  ;;  %3713 = vmatprep.mubr.msk.bf16.mxu1 %vm4177_vm1, %v4176_v2  ;;  %v1688_v21 = vadd.f32 %v4910_v18, %v1687_v16 }
 0x276   :  { %v1248_v13 = vadd.f32 %v4867_v14, %v1247_v17  ;;  %v3615_v19 = vpop.f32.mrf.mxu1 }
 0x277   :  { %v1249_v23 = vpop.f32.mrf.mxu0  ;;  %v1940_v26 = vmax.f32 %v1688_v21, 0.0 }
 0x278   :  { %v1348_v3 = vmax.f32 %v1248_v13, 0.0  ;;  %v1690_v25 = vpop.f32.mrf.mxu1 }
 0x279   :  { %v1691_v28 = vadd.f32 %v4910_v18, %v1690_v25  ;;  %v1503_v30 = vpop.f32.mrf.mxu0 }
 0x27a   :  { %v1397_v31 = vpack.c.bf16 %v1348_v3, %v1347_v24  ;;  %v3616_v32 = vpop.f32.mrf.mxu1  ;;  %v1504_v35 = vadd.f32 %v4910_v18, %v1503_v30 }
 0x27b   :  { %v1941_v15 = vmax.f32 %v1691_v28, 0.0  ;;  %v3523_v34 = vpop.f32.mrf.mxu0 }
 0x27c   :  { %v1695_v36 = vpop.f32.mrf.mxu1  ;;  %3714 = vmatmul.mubr.bf16.gmra.mxu1 %v1397_v31  ;;  %v1894_v43 = vmax.f32 %v1504_v35, 0.0 }
 0x27d   :  { %v4974_v14 = vpack.c.bf16 %v1941_v15, %v1940_v26  ;;  %v1506_v37 = vpop.f32.mrf.mxu0  ;;  %3733 = vmatprep.mubr.msk.bf16.mxu1 %vm4177_vm1, %v4176_v2  ;;  %v1696_v40 = vadd.f32 %v4910_v18, %v1695_v36 }
 0x27e   :  { %v1507_v38 = vadd.f32 %v4910_v18, %v1506_v37  ;;  %v3619_v41 = vpop.f32.mrf.mxu1 }
 0x27f   :  { %v3524_v22 = vpop.f32.mrf.mxu0  ;;  %v1942_v33 = vmax.f32 %v1696_v40, 0.0 }
 0x280   :  { %v1895_v45 = vmax.f32 %v1507_v38, 0.0  ;;  %v1698_v46 = vpop.f32.mrf.mxu1 }
 0x281   :  { %v1699_v47 = vadd.f32 %v4910_v18, %v1698_v46  ;;  %v1511_v48 = vpop.f32.mrf.mxu0 }
 0x282   :  { %v1992_v49 = vpack.c.bf16 %v1895_v45, %v1894_v43  ;;  %v3620_v53 = vpop.f32.mrf.mxu1  ;;  %v1512_v54 = vadd.f32 %v4910_v18, %v1511_v48 }
 0x283   :  { %v1943_v50 = vmax.f32 %v1699_v47, 0.0  ;;  %v3527_v52 = vpop.f32.mrf.mxu0 }
 0x284   :  { %v1703_v56 = vpop.f32.mrf.mxu1  ;;  %3734 = vmatmul.mubr.bf16.vlgmr.msra.gmra.mxu1 %v1992_v49  ;;  %v1896_v62 = vmax.f32 %v1512_v54, 0.0 }
 0x285   :  { %v4982_v39 = vpack.c.bf16 %v1943_v50, %v1942_v33  ;;  %v1514_v57 = vpop.f32.mrf.mxu0  ;;  %3737 = vmatprep.mubr.msk.bf16.mxu1 %vm4177_vm1, %v4176_v2  ;;  %v1704_v60 = vadd.f32 %v4910_v18, %v1703_v56 }
 0x286   :  { %v1515_v58 = vadd.f32 %v4910_v18, %v1514_v57  ;;  %v3623_v59 = vpop.f32.mrf.mxu1 }
 0x287   :  { %v3528_v61 = vpop.f32.mrf.mxu0  ;;  %v1944_v8 = vmax.f32 %v1704_v60, 0.0 }
 0x288   :  { %v1897_v44 = vmax.f32 %v1515_v58, 0.0  ;;  %v1706_v51 = vpop.f32.mrf.mxu1 }
 0x289   :  { %v1707_v1 = vadd.f32 %v4910_v18, %v1706_v51  ;;  %v1519_v5 = vpop.f32.mrf.mxu0 }
 0x28a   :  { %v1993_v6 = vpack.c.bf16 %v1897_v44, %v1896_v62  ;;  %v3624_v7 = vpop.f32.mrf.mxu1  ;;  %v1520_v12 = vadd.f32 %v4910_v18, %v1519_v5 }
 0x28b   :  { %v1945_v10 = vmax.f32 %v1707_v1, 0.0  ;;  %v3531_v11 = vpop.f32.mrf.mxu0 }
 0x28c   :  { %v1711_v63 = vpop.f32.mrf.mxu1  ;;  %3738 = vmatmul.mubr.bf16.gmra.mxu1 %v1993_v6  ;;  %v1898_v23 = vmax.f32 %v1520_v12, 0.0 }
 0x28d   :  { %v4990_v55 = vpack.c.bf16 %v1945_v10, %v1944_v8  ;;  %v1522_v16 = vpop.f32.mrf.mxu0  ;;  %3741 = vmatprep.mubr.msk.bf16.mxu1 %vm4177_vm1, %v4176_v2  ;;  %v1712_v19 = vadd.f32 %v4910_v18, %v1711_v63 }
 0x28e   :  { %v1523_v17 = vadd.f32 %v4910_v18, %v1522_v16  ;;  %v3627_v13 = vpop.f32.mrf.mxu1 }
 0x28f   :  { %v3532_v21 = vpop.f32.mrf.mxu0  ;;  %v1946_v32 = vmax.f32 %v1712_v19, 0.0 }
 0x290   :  { %v1899_v24 = vmax.f32 %v1523_v17, 0.0  ;;  %v1714_v3 = vpop.f32.mrf.mxu1 }
 0x291   :  { %v1715_v25 = vadd.f32 %v4910_v18, %v1714_v3  ;;  %v1527_v28 = vpop.f32.mrf.mxu0 }
 0x292   :  { %v1994_v30 = vpack.c.bf16 %v1899_v24, %v1898_v23  ;;  %v3628_v31 = vpop.f32.mrf.mxu1  ;;  %v1528_v34 = vadd.f32 %v4910_v18, %v1527_v28 }
 0x293   :  { %v1947_v26 = vmax.f32 %v1715_v25, 0.0  ;;  %v3535_v15 = vpop.f32.mrf.mxu0 }
 0x294   :  { %v1719_v35 = vpop.f32.mrf.mxu1  ;;  %3742 = vmatmul.mubr.bf16.gmra.mxu1 %v1994_v30  ;;  %v1900_v43 = vmax.f32 %v1528_v34, 0.0 }
 0x295   :  { %v4998_v36 = vpack.c.bf16 %v1947_v26, %v1946_v32  ;;  %v1530_v37 = vpop.f32.mrf.mxu0  ;;  %3745 = vmatprep.mubr.msk.bf16.mxu1 %vm4177_vm1, %v4176_v2  ;;  %v1720_v40 = vadd.f32 %v4910_v18, %v1719_v35 }
 0x296   :  { %v1531_v38 = vadd.f32 %v4910_v18, %v1530_v37  ;;  %v3631_v41 = vpop.f32.mrf.mxu1 }
 0x297   :  { %v3536_v22 = vpop.f32.mrf.mxu0  ;;  %v1948_v33 = vmax.f32 %v1720_v40, 0.0 }
 0x298   :  { %v1901_v45 = vmax.f32 %v1531_v38, 0.0  ;;  %v1722_v46 = vpop.f32.mrf.mxu1 }
 0x299   :  { %v1723_v47 = vadd.f32 %v4910_v18, %v1722_v46  ;;  %v1535_v48 = vpop.f32.mrf.mxu0 }
 0x29a   :  { %v1995_v49 = vpack.c.bf16 %v1901_v45, %v1900_v43  ;;  %v3632_v53 = vpop.f32.mrf.mxu1  ;;  %v1536_v54 = vadd.f32 %v4910_v18, %v1535_v48 }
 0x29b   :  { %v1949_v50 = vmax.f32 %v1723_v47, 0.0  ;;  %v3539_v52 = vpop.f32.mrf.mxu0 }
 0x29c   :  { %v1727_v56 = vpop.f32.mrf.mxu1  ;;  %3746 = vmatmul.mubr.bf16.gmra.mxu1 %v1995_v49  ;;  %v1902_v44 = vmax.f32 %v1536_v54, 0.0 }
 0x29d   :  { %v5006_v57 = vpack.c.bf16 %v1949_v50, %v1948_v33  ;;  %v1538_v58 = vpop.f32.mrf.mxu0  ;;  %3749 = vmatprep.mubr.msk.bf16.mxu1 %vm4177_vm1, %v4176_v2  ;;  %v1728_v61 = vadd.f32 %v4910_v18, %v1727_v56 }
 0x29e   :  { %v1539_v59 = vadd.f32 %v4910_v18, %v1538_v58  ;;  %v3635_v60 = vpop.f32.mrf.mxu1 }
 0x29f   :  { %v3540_v62 = vpop.f32.mrf.mxu0  ;;  %v1950_v10 = vmax.f32 %v1728_v61, 0.0 }
 0x2a0   :  { %v1903_v51 = vmax.f32 %v1539_v59, 0.0  ;;  %v1730_v1 = vpop.f32.mrf.mxu1 }
 0x2a1   :  { %v1731_v5 = vadd.f32 %v4910_v18, %v1730_v1  ;;  %v1543_v6 = vpop.f32.mrf.mxu0 }
 0x2a2   :  { %v1996_v7 = vpack.c.bf16 %v1903_v51, %v1902_v44  ;;  %v3636_v8 = vpop.f32.mrf.mxu1  ;;  %v1544_v63 = vadd.f32 %v4910_v18, %v1543_v6 }
 0x2a3   :  { %v1951_v11 = vmax.f32 %v1731_v5, 0.0  ;;  %v3543_v12 = vpop.f32.mrf.mxu0 }
 0x2a4   :  { %v1735_v16 = vpop.f32.mrf.mxu1  ;;  %3750 = vmatmul.mubr.bf16.gmra.mxu1 %v1996_v7  ;;  %v1904_v3 = vmax.f32 %v1544_v63, 0.0 }
 0x2a5   :  { %v5014_v17 = vpack.c.bf16 %v1951_v11, %v1950_v10  ;;  %v1546_v13 = vpop.f32.mrf.mxu0  ;;  %3753 = vmatprep.mubr.msk.bf16.mxu1 %vm4177_vm1, %v4176_v2  ;;  %v1736_v23 = vadd.f32 %v4910_v18, %v1735_v16 }
 0x2a6   :  { %v1547_v19 = vadd.f32 %v4910_v18, %v1546_v13  ;;  %v3639_v21 = vpop.f32.mrf.mxu1 }
 0x2a7   :  { %v3544_v24 = vpop.f32.mrf.mxu0  ;;  %v1952_v15 = vmax.f32 %v1736_v23, 0.0 }
 0x2a8   :  { %v1905_v25 = vmax.f32 %v1547_v19, 0.0  ;;  %v1738_v28 = vpop.f32.mrf.mxu1 }
 0x2a9   :  { %v1739_v30 = vadd.f32 %v4910_v18, %v1738_v28  ;;  %v1551_v31 = vpop.f32.mrf.mxu0 }
 0x2aa   :  { %v1997_v32 = vpack.c.bf16 %v1905_v25, %v1904_v3  ;;  %v3640_v26 = vpop.f32.mrf.mxu1  ;;  %v1552_v37 = vadd.f32 %v4910_v18, %v1551_v31 }
 0x2ab   :  { %v1953_v34 = vmax.f32 %v1739_v30, 0.0  ;;  %v3547_v35 = vpop.f32.mrf.mxu0 }
 0x2ac   :  { %v1743_v38 = vpop.f32.mrf.mxu1  ;;  %3754 = vmatmul.mubr.bf16.gmra.mxu1 %v1997_v32  ;;  %v1906_v47 = vmax.f32 %v1552_v37, 0.0 }
 0x2ad   :  { %v5022_v41 = vpack.c.bf16 %v1953_v34, %v1952_v15  ;;  %v1554_v40 = vpop.f32.mrf.mxu0  ;;  %3757 = vmatprep.mubr.msk.bf16.mxu1 %vm4177_vm1, %v4176_v2  ;;  %v1744_v45 = vadd.f32 %v4910_v18, %v1743_v38 }
 0x2ae   :  { %v1555_v22 = vadd.f32 %v4910_v18, %v1554_v40  ;;  %v3643_v43 = vpop.f32.mrf.mxu1 }
 0x2af   :  { %v3548_v46 = vpop.f32.mrf.mxu0  ;;  %v1954_v54 = vmax.f32 %v1744_v45, 0.0 }
 0x2b0   :  { %v1907_v48 = vmax.f32 %v1555_v22, 0.0  ;;  %v1746_v49 = vpop.f32.mrf.mxu1 }
 0x2b1   :  { %v1747_v53 = vadd.f32 %v4910_v18, %v1746_v49  ;;  %v1559_v33 = vpop.f32.mrf.mxu0 }
 0x2b2   :  { %v1998_v50 = vpack.c.bf16 %v1907_v48, %v1906_v47  ;;  %v3644_v52 = vpop.f32.mrf.mxu1  ;;  %v1560_v59 = vadd.f32 %v4910_v18, %v1559_v33 }
 0x2b3   :  { %v1955_v56 = vmax.f32 %v1747_v53, 0.0  ;;  %v3551_v58 = vpop.f32.mrf.mxu0 }
 0x2b4   :  { %v1751_v60 = vpop.f32.mrf.mxu1  ;;  %3758 = vmatmul.mubr.bf16.gmra.mxu1 %v1998_v50  ;;  %v1908_v6 = vmax.f32 %v1560_v59, 0.0 }
 0x2b5   :  { %v5030_v61 = vpack.c.bf16 %v1955_v56, %v1954_v54  ;;  %v1562_v62 = vpop.f32.mrf.mxu0  ;;  %3761 = vmatprep.mubr.msk.bf16.mxu1 %vm4177_vm1, %v4176_v2  ;;  %v1752_v1 = vadd.f32 %v4910_v18, %v1751_v60 }
 0x2b6   :  { %v1563_v44 = vadd.f32 %v4910_v18, %v1562_v62  ;;  %v3647_v51 = vpop.f32.mrf.mxu1 }
 0x2b7   :  { %v3552_v5 = vpop.f32.mrf.mxu0  ;;  %v1956_v16 = vmax.f32 %v1752_v1, 0.0 }
 0x2b8   :  { %v1909_v7 = vmax.f32 %v1563_v44, 0.0  ;;  %v1754_v8 = vpop.f32.mrf.mxu1 }
 0x2b9   :  { %v1755_v10 = vadd.f32 %v4910_v18, %v1754_v8  ;;  %v1567_v11 = vpop.f32.mrf.mxu0 }
 0x2ba   :  { %v1999_v12 = vpack.c.bf16 %v1909_v7, %v1908_v6  ;;  %v3648_v63 = vpop.f32.mrf.mxu1  ;;  %v1568_v21 = vadd.f32 %v4910_v18, %v1567_v11 }
 0x2bb   :  { %v1957_v13 = vmax.f32 %v1755_v10, 0.0  ;;  %v3555_v19 = vpop.f32.mrf.mxu0 }
 0x2bc   :  { %v1759_v23 = vpop.f32.mrf.mxu1  ;;  %3762 = vmatmul.mubr.bf16.gmra.mxu1 %v1999_v12  ;;  %v1910_v32 = vmax.f32 %v1568_v21, 0.0 }
 0x2bd   :  { %v5038_v24 = vpack.c.bf16 %v1957_v13, %v1956_v16  ;;  %v1570_v3 = vpop.f32.mrf.mxu0  ;;  %3765 = vmatprep.mubr.msk.bf16.mxu1 %vm4177_vm1, %v4176_v2  ;;  %v1760_v30 = vadd.f32 %v4910_v18, %v1759_v23 }
 0x2be   :  { %v1571_v25 = vadd.f32 %v4910_v18, %v1570_v3  ;;  %v3651_v28 = vpop.f32.mrf.mxu1 }
 0x2bf   :  { %v3556_v31 = vpop.f32.mrf.mxu0  ;;  %v1958_v40 = vmax.f32 %v1760_v30, 0.0 }
 0x2c0   :  { %v1911_v26 = vmax.f32 %v1571_v25, 0.0  ;;  %v1762_v15 = vpop.f32.mrf.mxu1 }
 0x2c1   :  { %v1763_v34 = vadd.f32 %v4910_v18, %v1762_v15  ;;  %v1575_v35 = vpop.f32.mrf.mxu0 }
 0x2c2   :  { %v2000_v37 = vpack.c.bf16 %v1911_v26, %v1910_v32  ;;  %v3652_v38 = vpop.f32.mrf.mxu1  ;;  %v1576_v45 = vadd.f32 %v4910_v18, %v1575_v35 }
 0x2c3   :  { %v1959_v22 = vmax.f32 %v1763_v34, 0.0  ;;  %v3559_v43 = vpop.f32.mrf.mxu0 }
 0x2c4   :  { %v1767_v46 = vpop.f32.mrf.mxu1  ;;  %3766 = vmatmul.mubr.bf16.gmra.mxu1 %v2000_v37  ;;  %v1912_v52 = vmax.f32 %v1576_v45, 0.0 }
 0x2c5   :  { %v5046_v47 = vpack.c.bf16 %v1959_v22, %v1958_v40  ;;  %v1578_v48 = vpop.f32.mrf.mxu0  ;;  %3769 = vmatprep.mubr.msk.bf16.mxu1 %vm4177_vm1, %v4176_v2  ;;  %v1768_v33 = vadd.f32 %v4910_v18, %v1767_v46 }
 0x2c6   :  { %v1579_v49 = vadd.f32 %v4910_v18, %v1578_v48  ;;  %v3655_v53 = vpop.f32.mrf.mxu1 }
 0x2c7   :  { %v3560_v50 = vpop.f32.mrf.mxu0  ;;  %v1960_v44 = vmax.f32 %v1768_v33, 0.0 }
 0x2c8   :  { %v1913_v54 = vmax.f32 %v1579_v49, 0.0  ;;  %v1770_v56 = vpop.f32.mrf.mxu1 }
 0x2c9   :  { %v1771_v58 = vadd.f32 %v4910_v18, %v1770_v56  ;;  %v1583_v59 = vpop.f32.mrf.mxu0 }
 0x2ca   :  { %v2001_v60 = vpack.c.bf16 %v1913_v54, %v1912_v52  ;;  %v3656_v62 = vpop.f32.mrf.mxu1  ;;  %v1584_v5 = vadd.f32 %v4910_v18, %v1583_v59 }
 0x2cb   :  { %v1961_v51 = vmax.f32 %v1771_v58, 0.0  ;;  %v3563_v1 = vpop.f32.mrf.mxu0 }
 0x2cc   :  { %v1775_v6 = vpop.f32.mrf.mxu1  ;;  %3770 = vmatmul.mubr.bf16.gmra.mxu1 %v2001_v60  ;;  %v1914_v16 = vmax.f32 %v1584_v5, 0.0 }
 0x2cd   :  { %v5054_v7 = vpack.c.bf16 %v1961_v51, %v1960_v44  ;;  %v1586_v8 = vpop.f32.mrf.mxu0  ;;  %3773 = vmatprep.mubr.msk.bf16.mxu1 %vm4177_vm1, %v4176_v2  ;;  %v1776_v12 = vadd.f32 %v4910_v18, %v1775_v6 }
 0x2ce   :  { %v1587_v10 = vadd.f32 %v4910_v18, %v1586_v8  ;;  %v3659_v11 = vpop.f32.mrf.mxu1 }
 0x2cf   :  { %v3564_v63 = vpop.f32.mrf.mxu0  ;;  %v1962_v28 = vmax.f32 %v1776_v12, 0.0 }
 0x2d0   :  { %v1915_v13 = vmax.f32 %v1587_v10, 0.0  ;;  %v1778_v19 = vpop.f32.mrf.mxu1 }
 0x2d1   :  { %v1779_v21 = vadd.f32 %v4910_v18, %v1778_v19  ;;  %v1591_v23 = vpop.f32.mrf.mxu0 }
 0x2d2   :  { %v2002_v3 = vpack.c.bf16 %v1915_v13, %v1914_v16  ;;  %v3660_v25 = vpop.f32.mrf.mxu1  ;;  %v1592_v32 = vadd.f32 %v4910_v18, %v1591_v23 }
 0x2d3   :  { %v1963_v30 = vmax.f32 %v1779_v21, 0.0  ;;  %v3567_v31 = vpop.f32.mrf.mxu0 }
 0x2d4   :  { %v1783_v26 = vpop.f32.mrf.mxu1  ;;  %3774 = vmatmul.mubr.bf16.gmra.mxu1 %v2002_v3  ;;  %v1916_v22 = vmax.f32 %v1592_v32, 0.0 }
 0x2d5   :  { %v5062_v15 = vpack.c.bf16 %v1963_v30, %v1962_v28  ;;  %v1594_v34 = vpop.f32.mrf.mxu0  ;;  %3777 = vmatprep.mubr.msk.bf16.mxu1 %vm4177_vm1, %v4176_v2  ;;  %v1784_v38 = vadd.f32 %v4910_v18, %v1783_v26 }
 0x2d6   :  { %v1595_v35 = vadd.f32 %v4910_v18, %v1594_v34  ;;  %v3663_v37 = vpop.f32.mrf.mxu1 }
 0x2d7   :  { %v3568_v40 = vpop.f32.mrf.mxu0  ;;  %v1964_v33 = vmax.f32 %v1784_v38, 0.0 }
 0x2d8   :  { %v1917_v43 = vmax.f32 %v1595_v35, 0.0  ;;  %v1786_v45 = vpop.f32.mrf.mxu1 }
 0x2d9   :  { %v1787_v46 = vadd.f32 %v4910_v18, %v1786_v45  ;;  %v1599_v48 = vpop.f32.mrf.mxu0 }
 0x2da   :  { %v2003_v49 = vpack.c.bf16 %v1917_v43, %v1916_v22  ;;  %v3664_v53 = vpop.f32.mrf.mxu1  ;;  %v1600_v54 = vadd.f32 %v4910_v18, %v1599_v48 }
 0x2db   :  { %v1965_v50 = vmax.f32 %v1787_v46, 0.0  ;;  %v3571_v52 = vpop.f32.mrf.mxu0 }
 0x2dc   :  { %v1791_v56 = vpop.f32.mrf.mxu1  ;;  %3778 = vmatmul.mubr.bf16.gmra.mxu1 %v2003_v49  ;;  %v1918_v1 = vmax.f32 %v1600_v54, 0.0 }
 0x2dd   :  { %v5070_v58 = vpack.c.bf16 %v1965_v50, %v1964_v33  ;;  %v1602_v59 = vpop.f32.mrf.mxu0  ;;  %3781 = vmatprep.mubr.msk.bf16.mxu1 %vm4177_vm1, %v4176_v2  ;;  %v1792_v44 = vadd.f32 %v4910_v18, %v1791_v56 }
 0x2de   :  { %v1603_v60 = vadd.f32 %v4910_v18, %v1602_v59  ;;  %v3667_v62 = vpop.f32.mrf.mxu1 }
 0x2df   :  { %v3572_v51 = vpop.f32.mrf.mxu0  ;;  %v1966_v63 = vmax.f32 %v1792_v44, 0.0 }
 0x2e0   :  { %v1919_v5 = vmax.f32 %v1603_v60, 0.0  ;;  %v1794_v6 = vpop.f32.mrf.mxu1 }
 0x2e1   :  { %v1795_v8 = vadd.f32 %v4910_v18, %v1794_v6  ;;  %v1607_v10 = vpop.f32.mrf.mxu0 }
 0x2e2   :  { %v2004_v11 = vpack.c.bf16 %v1919_v5, %v1918_v1  ;;  %v3668_v12 = vpop.f32.mrf.mxu1  ;;  %v1608_v19 = vadd.f32 %v4910_v18, %v1607_v10 }
 0x2e3   :  { %v1967_v16 = vmax.f32 %v1795_v8, 0.0  ;;  %v3575_v13 = vpop.f32.mrf.mxu0 }
 0x2e4   :  { %v1799_v21 = vpop.f32.mrf.mxu1  ;;  %3782 = vmatmul.mubr.bf16.gmra.mxu1 %v2004_v11  ;;  %v1920_v32 = vmax.f32 %v1608_v19, 0.0 }
 0x2e5   :  { %v5078_v23 = vpack.c.bf16 %v1967_v16, %v1966_v63  ;;  %v1610_v3 = vpop.f32.mrf.mxu0  ;;  %3785 = vmatprep.mubr.msk.bf16.mxu1 %vm4177_vm1, %v4176_v2  ;;  %v1800_v30 = vadd.f32 %v4910_v18, %v1799_v21 }
 0x2e6   :  { %v1611_v25 = vadd.f32 %v4910_v18, %v1610_v3  ;;  %v3671_v28 = vpop.f32.mrf.mxu1 }
 0x2e7   :  { %v3576_v31 = vpop.f32.mrf.mxu0  ;;  %v1968_v22 = vmax.f32 %v1800_v30, 0.0 }
 0x2e8   :  { %v1921_v26 = vmax.f32 %v1611_v25, 0.0  ;;  %v1802_v34 = vpop.f32.mrf.mxu1 }
 0x2e9   :  { %v1803_v35 = vadd.f32 %v4910_v18, %v1802_v34  ;;  %v1615_v37 = vpop.f32.mrf.mxu0 }
 0x2ea   :  { %v2005_v38 = vpack.c.bf16 %v1921_v26, %v1920_v32  ;;  %v3672_v40 = vpop.f32.mrf.mxu1  ;;  %v1616_v46 = vadd.f32 %v4910_v18, %v1615_v37 }
 0x2eb   :  { %v1969_v43 = vmax.f32 %v1803_v35, 0.0  ;;  %v3579_v45 = vpop.f32.mrf.mxu0 }
 0x2ec   :  { %v1807_v48 = vpop.f32.mrf.mxu1  ;;  %3786 = vmatmul.mubr.bf16.gmra.mxu1 %v2005_v38  ;;  %v1922_v56 = vmax.f32 %v1616_v46, 0.0 }
 0x2ed   :  { %v5086_v49 = vpack.c.bf16 %v1969_v43, %v1968_v22  ;;  %v1618_v53 = vpop.f32.mrf.mxu0  ;;  %3789 = vmatprep.mubr.msk.bf16.mxu1 %vm4177_vm1, %v4176_v2  ;;  %v1808_v52 = vadd.f32 %v4910_v18, %v1807_v48 }
 0x2ee   :  { %v1619_v33 = vadd.f32 %v4910_v18, %v1618_v53  ;;  %v3675_v50 = vpop.f32.mrf.mxu1 }
 0x2ef   :  { %v3580_v54 = vpop.f32.mrf.mxu0  ;;  %v1970_v5 = vmax.f32 %v1808_v52, 0.0 }
 0x2f0   :  { %v1923_v59 = vmax.f32 %v1619_v33, 0.0  ;;  %v1810_v60 = vpop.f32.mrf.mxu1 }
 0x2f1   :  { %v1811_v62 = vadd.f32 %v4910_v18, %v1810_v60  ;;  %v1623_v44 = vpop.f32.mrf.mxu0 }
 0x2f2   :  { %v2006_v51 = vpack.c.bf16 %v1923_v59, %v1922_v56  ;;  %v3676_v1 = vpop.f32.mrf.mxu1  ;;  %v1624_v10 = vadd.f32 %v4910_v18, %v1623_v44 }
 0x2f3   :  { %v1971_v6 = vmax.f32 %v1811_v62, 0.0  ;;  %v3583_v8 = vpop.f32.mrf.mxu0 }
 0x2f4   :  { %v1815_v11 = vpop.f32.mrf.mxu1  ;;  %3790 = vmatmul.mubr.bf16.gmra.mxu1 %v2006_v51  ;;  %v1924_v3 = vmax.f32 %v1624_v10, 0.0 }
 0x2f5   :  { %v5094_v12 = vpack.c.bf16 %v1971_v6, %v1970_v5  ;;  %v1626_v63 = vpop.f32.mrf.mxu0  ;;  %3793 = vmatprep.mubr.msk.bf16.mxu1 %vm4177_vm1, %v4176_v2  ;;  %v1816_v19 = vadd.f32 %v4910_v18, %v1815_v11 }
 0x2f6   :  { %v1627_v16 = vadd.f32 %v4910_v18, %v1626_v63  ;;  %v3679_v13 = vpop.f32.mrf.mxu1 }
 0x2f7   :  { %v3584_v21 = vpop.f32.mrf.mxu0  ;;  %v1972_v26 = vmax.f32 %v1816_v19, 0.0  ;;  %v4174_v13 = vld [vmem:[%s5628_s4] ss:$0 sm:$0xff] }
 0x2f8   :  { %v1925_v25 = vmax.f32 %v1627_v16, 0.0  ;;  %v1818_v28 = vpop.f32.mrf.mxu1 }
 0x2f9   :  { %v1819_v30 = vadd.f32 %v4910_v18, %v1818_v28 }
 0x2fa   :  { %v2007_v31 = vpack.c.bf16 %v1925_v25, %v1924_v3  ;;  %v3680_v32 = vpop.f32.mrf.mxu1 }
 0x2fb   :  { %v1973_v34 = vmax.f32 %v1819_v30, 0.0 }
 0x2fc   :  { %v1823_v35 = vpop.f32.mrf.mxu1  ;;  %3794 = vmatmul.mubr.bf16.gmra.mxu1 %v2007_v31 }
 0x2fd   :  { %v5101_v37 = vpack.c.bf16 %v1973_v34, %v1972_v26  ;;  %3797 = vmatprep.mubr.msk.bf16.mxu1 %vm4177_vm1, %v4176_v2  ;;  %v1824_v40 = vadd.f32 %v4910_v18, %v1823_v35 }
 0x2fe   :  { %v3683_v38 = vpop.f32.mrf.mxu1 }
 0x2ff   :  { %v1974_v46 = vmax.f32 %v1824_v40, 0.0 }
 0x300   :  { %v1826_v22 = vpop.f32.mrf.mxu1 }
 0x301   :  { %v1827_v43 = vadd.f32 %v4910_v18, %v1826_v22 }
 0x302   :  { %v3684_v45 = vpop.f32.mrf.mxu1 }
 0x303   :  { %v1975_v48 = vmax.f32 %v1827_v43, 0.0 }
 0x304   :  { %v1831_v53 = vpop.f32.mrf.mxu1  ;;  %3798 = vmatmul.mubr.bf16.gmra.mxu1 %v4918_v29 }
 0x305   :  { %v5108_v33 = vpack.c.bf16 %v1975_v48, %v1974_v46  ;;  %3801 = vmatprep.mubr.msk.bf16.mxu1 %vm4177_vm1, %v4176_v2  ;;  %v1832_v52 = vadd.f32 %v4910_v18, %v1831_v53 }
 0x306   :  { %v3687_v50 = vpop.f32.mrf.mxu1 }
 0x307   :  { %v1976_v60 = vmax.f32 %v1832_v52, 0.0 }
 0x308   :  { %v1834_v54 = vpop.f32.mrf.mxu1 }
 0x309   :  { %v1835_v56 = vadd.f32 %v4910_v18, %v1834_v54 }
 0x30a   :  { %v3688_v59 = vpop.f32.mrf.mxu1 }
 0x30b   :  { %v1977_v62 = vmax.f32 %v1835_v56, 0.0 }
 0x30c   :  { %v1839_v44 = vpop.f32.mrf.mxu1  ;;  %3802 = vmatmul.mubr.bf16.gmra.mxu1 %v4926_v27 }
 0x30d   :  { %v5115_v51 = vpack.c.bf16 %v1977_v62, %v1976_v60  ;;  %3805 = vmatprep.mubr.msk.bf16.mxu1 %vm4177_vm1, %v4176_v2  ;;  %v1840_v1 = vadd.f32 %v4910_v18, %v1839_v44 }
 0x30e   :  { %v3691_v29 = vpop.f32.mrf.mxu1 }
 0x30f   :  { %v1978_v10 = vmax.f32 %v1840_v1, 0.0 }
 0x310   :  { %v1842_v5 = vpop.f32.mrf.mxu1 }
 0x311   :  { %v1843_v6 = vadd.f32 %v4910_v18, %v1842_v5 }
 0x312   :  { %v3692_v8 = vpop.f32.mrf.mxu1 }
 0x313   :  { %v1979_v11 = vmax.f32 %v1843_v6, 0.0 }
 0x314   :  { %v1847_v63 = vpop.f32.mrf.mxu1  ;;  %3806 = vmatmul.mubr.bf16.gmra.mxu1 %v4934_v0 }
 0x315   :  { %v5122_v16 = vpack.c.bf16 %v1979_v11, %v1978_v10  ;;  %3809 = vmatprep.mubr.msk.bf16.mxu1 %vm4177_vm1, %v4176_v2  ;;  %v1848_v19 = vadd.f32 %v4174_v13, %v1847_v63 }
 0x316   :  { %v3695_v27 = vpop.f32.mrf.mxu1 }
 0x317   :  { %v1980_v25 = vmax.f32 %v1848_v19, 0.0 }
 0x318   :  { %v1850_v21 = vpop.f32.mrf.mxu1 }
 0x319   :  { %v1851_v3 = vadd.f32 %v4174_v13, %v1850_v21 }
 0x31a   :  { %v3696_v18 = vpop.f32.mrf.mxu1 }
 0x31b   :  { %v1981_v28 = vmax.f32 %v1851_v3, 0.0 }
 0x31c   :  { %v1855_v30 = vpop.f32.mrf.mxu1  ;;  %3810 = vmatmul.mubr.bf16.gmra.mxu1 %v4942_v20 }
 0x31d   :  { %v5130_v0 = vpack.c.bf16 %v1981_v28, %v1980_v25  ;;  %3813 = vmatprep.mubr.msk.bf16.mxu1 %vm4177_vm1, %v4176_v2  ;;  %v1856_v32 = vadd.f32 %v4174_v13, %v1855_v30 }
 0x31e   :  { %v3699_v31 = vpop.f32.mrf.mxu1 }
 0x31f   :  { %v1982_v38 = vmax.f32 %v1856_v32, 0.0 }
 0x320   :  { %v1858_v26 = vpop.f32.mrf.mxu1 }
 0x321   :  { %v1859_v34 = vadd.f32 %v4174_v13, %v1858_v26 }
 0x322   :  { %v3700_v35 = vpop.f32.mrf.mxu1 }
 0x323   :  { %v1983_v40 = vmax.f32 %v1859_v34, 0.0 }
 0x324   :  { %v1863_v22 = vpop.f32.mrf.mxu1  ;;  %3814 = vmatmul.mubr.bf16.gmra.mxu1 %v4950_v42 }
 0x325   :  { %v5135_v43 = vpack.c.bf16 %v1983_v40, %v1982_v38  ;;  %3817 = vmatprep.mubr.msk.bf16.mxu1 %vm4177_vm1, %v4176_v2  ;;  %v1864_v45 = vadd.f32 %v4174_v13, %v1863_v22 }
 0x326   :  { %v3703_v20 = vpop.f32.mrf.mxu1 }
 0x327   :  { %v1984_v50 = vmax.f32 %v1864_v45, 0.0 }
 0x328   :  { %v1866_v46 = vpop.f32.mrf.mxu1 }
 0x329   :  { %v1867_v48 = vadd.f32 %v4174_v13, %v1866_v46 }
 0x32a   :  { %v3704_v53 = vpop.f32.mrf.mxu1 }
 0x32b   :  { %v1985_v52 = vmax.f32 %v1867_v48, 0.0 }
 0x32c   :  { %v1871_v54 = vpop.f32.mrf.mxu1  ;;  %3818 = vmatmul.mubr.bf16.gmra.mxu1 %v4958_v4 }
 0x32d   :  { %v5140_v56 = vpack.c.bf16 %v1985_v52, %v1984_v50  ;;  %3821 = vmatprep.mubr.msk.bf16.mxu1 %vm4177_vm1, %v4176_v2  ;;  %v1872_v59 = vadd.f32 %v4174_v13, %v1871_v54 }
 0x32e   :  { %v3707_v42 = vpop.f32.mrf.mxu1 }
 0x32f   :  { %v1986_v29 = vmax.f32 %v1872_v59, 0.0 }
 0x330   :  { %v1874_v60 = vpop.f32.mrf.mxu1 }
 0x331   :  { %v1875_v62 = vadd.f32 %v4174_v13, %v1874_v60 }
 0x332   :  { %v3708_v44 = vpop.f32.mrf.mxu1 }
 0x333   :  { %v1987_v1 = vmax.f32 %v1875_v62, 0.0 }
 0x334   :  { %v1879_v5 = vpop.f32.mrf.mxu1  ;;  %3822 = vmatmul.mubr.bf16.gmra.mxu1 %v4966_v9 }
 0x335   :  { %v5145_v6 = vpack.c.bf16 %v1987_v1, %v1986_v29  ;;  %3825 = vmatprep.mubr.msk.bf16.mxu1 %vm4177_vm1, %v4176_v2  ;;  %v1880_v8 = vadd.f32 %v4174_v13, %v1879_v5 }
 0x336   :  { %v3711_v4 = vpop.f32.mrf.mxu1 }
 0x337   :  { %v1988_v27 = vmax.f32 %v1880_v8, 0.0 }
 0x338   :  { %v1882_v10 = vpop.f32.mrf.mxu1 }
 0x339   :  { %v1883_v11 = vadd.f32 %v4174_v13, %v1882_v10 }
 0x33a   :  { %v3712_v63 = vpop.f32.mrf.mxu1 }
 0x33b   :  { %v1989_v19 = vmax.f32 %v1883_v11, 0.0 }
 0x33c   :  { %v1887_v21 = vpop.f32.mrf.mxu1  ;;  %3826 = vmatmul.mubr.bf16.gmra.mxu1 %v4974_v14 }
 0x33d   :  { %v5150_v3 = vpack.c.bf16 %v1989_v19, %v1988_v27  ;;  %3829 = vmatprep.mubr.msk.bf16.mxu1 %vm4177_vm1, %v4176_v2  ;;  %v1888_v18 = vadd.f32 %v4174_v13, %v1887_v21 }
 0x33e   :  { %v3715_v9 = vpop.f32.mrf.mxu1 }
 0x33f   :  { %v1990_v31 = vmax.f32 %v1888_v18, 0.0 }
 0x340   :  { %v1890_v25 = vpop.f32.mrf.mxu1 }
 0x341   :  { %v1891_v28 = vadd.f32 %v4174_v13, %v1890_v25 }
 0x342   :  { %v3716_v30 = vpop.f32.mrf.mxu1 }
 0x343   :  { %v1991_v32 = vmax.f32 %v1891_v28, 0.0 }
 0x344   :  { %v5154_v26 = vpop.f32.mrf.mxu1  ;;  %3830 = vmatmul.mubr.bf16.gmra.mxu1 %v4982_v39 }
 0x345   :  { %v5157_v34 = vpack.c.bf16 %v1991_v32, %v1990_v31  ;;  %3833 = vmatprep.mubr.msk.bf16.mxu1 %vm4177_vm1, %v4176_v2 }
 0x346   :  { %v3735_v14 = vpop.f32.mrf.mxu1 }
 0x348   :  { %v5161_v35 = vpop.f32.mrf.mxu1 }
 0x34a   :  { %v3736_v38 = vpop.f32.mrf.mxu1 }
 0x34c   :  { %v5163_v40 = vpop.f32.mrf.mxu1  ;;  %3834 = vmatmul.mubr.bf16.gmra.mxu1 %v4990_v55 }
 0x34d   :  { %3837 = vmatprep.mubr.msk.bf16.mxu1 %vm4177_vm1, %v4176_v2 }
 0x34e   :  { %v3739_v13 = vpop.f32.mrf.mxu1 }
 0x350   :  { %v5168_v22 = vpop.f32.mrf.mxu1 }
 0x352   :  { %v3740_v39 = vpop.f32.mrf.mxu1 }
 0x354   :  { %v5170_v20 = vpop.f32.mrf.mxu1  ;;  %3838 = vmatmul.mubr.bf16.gmra.mxu1 %v4998_v36 }
 0x355   :  { %3841 = vmatprep.mubr.msk.bf16.mxu1 %vm4177_vm1, %v4176_v2 }
 0x356   :  { %v3743_v45 = vpop.f32.mrf.mxu1 }
 0x358   :  { %v5175_v46 = vpop.f32.mrf.mxu1 }
 0x35a   :  { %v3744_v48 = vpop.f32.mrf.mxu1 }
 0x35c   :  { %v5177_v53 = vpop.f32.mrf.mxu1  ;;  %3842 = vmatmul.mubr.bf16.gmra.mxu1 %v5006_v57 }
 0x35d   :  { %3845 = vmatprep.mubr.msk.bf16.mxu1 %vm4177_vm1, %v4176_v2 }
 0x35e   :  { %v3747_v55 = vpop.f32.mrf.mxu1 }
 0x360   :  { %v5182_v50 = vpop.f32.mrf.mxu1 }
 0x362   :  { %v3748_v52 = vpop.f32.mrf.mxu1 }
 0x364   :  { %v5184_v54 = vpop.f32.mrf.mxu1  ;;  %3846 = vmatmul.mubr.bf16.gmra.mxu1 %v5014_v17 }
 0x365   :  { %3849 = vmatprep.mubr.msk.bf16.mxu1 %vm4177_vm1, %v4176_v2 }
 0x366   :  { %v3751_v36 = vpop.f32.mrf.mxu1 }
 0x368   :  { %v5189_v42 = vpop.f32.mrf.mxu1 }
 0x36a   :  { %v3752_v59 = vpop.f32.mrf.mxu1 }
 0x36c   :  { %v5191_v60 = vpop.f32.mrf.mxu1  ;;  %3850 = vmatmul.mubr.bf16.gmra.mxu1 %v5022_v41 }
 0x36d   :  { %3853 = vmatprep.mubr.msk.bf16.mxu1 %vm4177_vm1, %v4176_v2 }
 0x36e   :  { %v3755_v57 = vpop.f32.mrf.mxu1 }
 0x36f   :  { %v5253_v57 = vld [vmem:[%s5629_s6] ss:$0 sm:$0xff] }
 0x370   :  { %v5196_v62 = vpop.f32.mrf.mxu1 }
 0x372   :  { %v3756_v44 = vpop.f32.mrf.mxu1 }
 0x374   :  { %v5198_v29 = vpop.f32.mrf.mxu1  ;;  %3854 = vmatmul.mubr.bf16.gmra.mxu1 %v5030_v61 }
 0x375   :  { %3857 = vmatprep.mubr.msk.bf16.mxu1 %vm4177_vm1, %v4176_v2 }
 0x376   :  { %v3759_v17 = vpop.f32.mrf.mxu1 }
 0x378   :  { %v5203_v1 = vpop.f32.mrf.mxu1 }
 0x37a   :  { %v3760_v5 = vpop.f32.mrf.mxu1 }
 0x37c   :  { %v2202_v4 = vpop.f32.mrf.mxu1  ;;  %3858 = vmatmul.mubr.bf16.gmra.mxu1 %v5038_v24 }
 0x37d   :  { %3861 = vmatprep.mubr.msk.bf16.mxu1 %vm4177_vm1, %v4176_v2 }
 0x37e   :  { %v3763_v41 = vpop.f32.mrf.mxu1 }
 0x37f   :  { %v2203_v41 = vadd.f32 %v5253_v57, %v2202_v4  ;;  %v2195_v4 = vadd.f32 %v5253_v57, %v5198_v29  ;;  %v2187_v29 = vadd.f32 %v5253_v57, %v5191_v60 }
 0x380   :  { %v2205_v8 = vpop.f32.mrf.mxu1 }
 0x382   :  { %v3764_v10 = vpop.f32.mrf.mxu1 }
 0x384   :  { %v5208_v11 = vpop.f32.mrf.mxu1  ;;  %3862 = vmatmul.mubr.bf16.gmra.mxu1 %v5046_v47 }
 0x385   :  { %3865 = vmatprep.mubr.msk.bf16.mxu1 %vm4177_vm1, %v4176_v2 }
 0x386   :  { %v3767_v61 = vpop.f32.mrf.mxu1 }
 0x388   :  { %v5213_v63 = vpop.f32.mrf.mxu1 }
 0x38a   :  { %v3768_v27 = vpop.f32.mrf.mxu1 }
 0x38b   :  { %v2198_v27 = vadd.f32 %v5253_v57, %v5203_v1  ;;  %v2551_v1 = vmax.f32 %v2203_v41, 0.0 }
 0x38c   :  { %v5215_v19 = vpop.f32.mrf.mxu1  ;;  %3866 = vmatmul.mubr.bf16.gmra.mxu1 %v5054_v7 }
 0x38d   :  { %3869 = vmatprep.mubr.msk.bf16.mxu1 %vm4177_vm1, %v4176_v2 }
 0x38e   :  { %v3771_v24 = vpop.f32.mrf.mxu1 }
 0x390   :  { %v5220_v21 = vpop.f32.mrf.mxu1 }
 0x392   :  { %v3772_v9 = vpop.f32.mrf.mxu1 }
 0x394   :  { %v5222_v18 = vpop.f32.mrf.mxu1  ;;  %3870 = vmatmul.mubr.bf16.gmra.mxu1 %v5062_v15 }
 0x395   :  { %3873 = vmatprep.mubr.msk.bf16.mxu1 %vm4177_vm1, %v4176_v2 }
 0x396   :  { %v3775_v47 = vpop.f32.mrf.mxu1 }
 0x398   :  { %v5227_v25 = vpop.f32.mrf.mxu1 }
 0x39a   :  { %v3776_v28 = vpop.f32.mrf.mxu1 }
 0x39c   :  { %v5229_v30 = vpop.f32.mrf.mxu1  ;;  %3874 = vmatmul.mubr.bf16.gmra.mxu1 %v5070_v58 }
 0x39d   :  { %3877 = vmatprep.mubr.msk.bf16.mxu1 %vm4177_vm1, %v4176_v2  ;;  %v2235_v41 = vadd.f32 %v5253_v57, %v5229_v30 }
 0x39e   :  { %v3779_v7 = vpop.f32.mrf.mxu1 }
 0x39f   :  { %v2559_v30 = vmax.f32 %v2235_v41, 0.0 }
 0x3a0   :  { %v5234_v31 = vpop.f32.mrf.mxu1 }
 0x3a2   :  { %v3780_v32 = vpop.f32.mrf.mxu1 }
 0x3a4   :  { %v5236_v14 = vpop.f32.mrf.mxu1  ;;  %3878 = vmatmul.mubr.bf16.gmra.mxu1 %v5078_v23 }
 0x3a5   :  { %3881 = vmatprep.mubr.msk.bf16.mxu1 %vm4177_vm1, %v4176_v2 }
 0x3a6   :  { %v3783_v15 = vpop.f32.mrf.mxu1 }
 0x3a7   :  { %v2190_v15 = vadd.f32 %v5253_v57, %v5196_v62  ;;  %v2182_v62 = vadd.f32 %v5253_v57, %v5189_v42  ;;  %v2238_v42 = vadd.f32 %v5253_v57, %v5234_v31  ;;  %v2230_v31 = vadd.f32 %v5253_v57, %v5227_v25 }
 0x3a8   :  { %v2245_v38 = vpop.f32.mrf.mxu1  ;;  %v2163_v25 = vadd.f32 %v5253_v57, %v5170_v20  ;;  %v2155_v20 = vadd.f32 %v5253_v57, %v5163_v40  ;;  %v2211_v40 = vadd.f32 %v5253_v57, %v5208_v11 }
 0x3aa   :  { %v3784_v13 = vpop.f32.mrf.mxu1 }
 0x3ab   :  { %v2550_v13 = vmax.f32 %v2198_v27, 0.0  ;;  %v2560_v27 = vmax.f32 %v2238_v42, 0.0 }
 0x3ac   :  { %v2250_v39 = vpop.f32.mrf.mxu1  ;;  %3882 = vmatmul.mubr.bf16.gmra.mxu1 %v5086_v49 }
 0x3ad   :  { %3885 = vmatprep.mubr.msk.bf16.mxu1 %vm4177_vm1, %v4176_v2 }
 0x3ae   :  { %v3787_v58 = vpop.f32.mrf.mxu1 }
 0x3b0   :  { %v2253_v45 = vpop.f32.mrf.mxu1 }
 0x3b2   :  { %v3788_v48 = vpop.f32.mrf.mxu1 }
 0x3b3   :  { %v2251_v48 = vadd.f32 %v5253_v57, %v2250_v39  ;;  %v2243_v39 = vadd.f32 %v5253_v57, %v5236_v14  ;;  %v2546_v14 = vmax.f32 %v2182_v62, 0.0  ;;  %v2635_v62 = vld [vmem:[%s5630_s7] sm:$0xff] }
 0x3b4   :  { %v2258_v55 = vpop.f32.mrf.mxu1  ;;  %3886 = vmatmul.mubr.bf16.gmra.mxu1 %v5094_v12  ;;  %v2206_v12 = vadd.f32 %v5253_v57, %v2205_v8  ;;  %v2636_v8 = vld [vmem:[%s5630_s7 + $0x8] sm:$0xff] }
 0x3b5   :  { %3889 = vmatprep.mubr.msk.bf16.mxu1 %vm4177_vm1, %v4176_v2  ;;  %v2259_v47 = vadd.f32 %v5253_v57, %v2258_v55  ;;  %2720 = vmatprep.mubr.f32.mxu0 %v2636_v8  ;;  %v2563_v60 = vmax.f32 %v2251_v48, 0.0 }
 0x3b6   :  { %v3791_v23 = vpop.f32.mrf.mxu1  ;;  %v2552_v24 = vmax.f32 %v2206_v12, 0.0  ;;  %v2547_v12 = vmax.f32 %v2187_v29, 0.0  ;;  %v2539_v29 = vmax.f32 %v2155_v20, 0.0 }
 0x3b7   :  { %v2565_v55 = vmax.f32 %v2259_v47, 0.0  ;;  %v2549_v23 = vmax.f32 %v2195_v4, 0.0  ;;  %v2558_v4 = vmax.f32 %v2230_v31, 0.0 }
 0x3b8   :  { %v2261_v52 = vpop.f32.mrf.mxu1 }
 0x3ba   :  { %v3792_v36 = vpop.f32.mrf.mxu1 }
 0x3bc   :  { %v2266_v59 = vpop.f32.mrf.mxu1  ;;  %3890 = vmatmul.mubr.bf16.gmra.mxu1 %v5101_v37  ;;  %v2262_v37 = vadd.f32 %v5253_v57, %v2261_v52 }
 0x3bd   :  { %3893 = vmatprep.mubr.msk.bf16.mxu1 %vm4177_vm1, %v4176_v2  ;;  %v2267_v17 = vadd.f32 %v5253_v57, %v2266_v59  ;;  %v2548_v59 = vmax.f32 %v2190_v15, 0.0 }
 0x3be   :  { %v3795_v49 = vpop.f32.mrf.mxu1  ;;  %v2566_v32 = vmax.f32 %v2262_v37, 0.0 }
 0x3bf   :  { %v2567_v28 = vmax.f32 %v2267_v17, 0.0 }
 0x3c0   :  { %v2269_v44 = vpop.f32.mrf.mxu1 }
 0x3c1   :  { %v2270_v5 = vadd.f32 %v5253_v57, %v2269_v44 }
 0x3c2   :  { %v3796_v10 = vpop.f32.mrf.mxu1 }
 0x3c3   :  { %v2568_v61 = vmax.f32 %v2270_v5, 0.0  ;;  %v2561_v10 = vmax.f32 %v2243_v39, 0.0 }
 0x3c4   :  { %v5262_v9 = vpop.f32.mrf.mxu1  ;;  %3894 = vmatmul.mubr.bf16.gmra.mxu1 %v5108_v33  ;;  %v2254_v33 = vadd.f32 %v5253_v57, %v2253_v45  ;;  %v2246_v45 = vadd.f32 %v5253_v57, %v2245_v38  ;;  %v2179_v38 = vadd.f32 %v5253_v57, %v5184_v54  ;;  %v2171_v54 = vadd.f32 %v5253_v57, %v5177_v53 }
 0x3c5   :  { %3369 = vmatprep.subr.mxu0 %v2568_v61  ;;  %3897 = vmatprep.mubr.msk.bf16.mxu1 %vm4177_vm1, %v4176_v2  ;;  %v2227_v53 = vadd.f32 %v5253_v57, %v5222_v18 }
 0x3c6   :  { %v3799_v7 = vpop.f32.mrf.mxu1  ;;  %3370 = vmatpush3.msra.mxu0 %v2552_v24  ;;  %v2564_v36 = vmax.f32 %v2254_v33, 0.0  ;;  %v2562_v17 = vmax.f32 %v2246_v45, 0.0  ;;  %v2545_v37 = vmax.f32 %v2179_v38, 0.0  ;;  %v2543_v47 = vmax.f32 %v2171_v54, 0.0 }
 0x3c7   :  { %3371 = vmatprep.subr.mxu0 %v2567_v28  ;;  %v2219_v7 = vadd.f32 %v5253_v57, %v5215_v19  ;;  %v2557_v33 = vmax.f32 %v2227_v53, 0.0 }
 0x3c8   :  { %v5276_v58 = vpop.f32.mrf.mxu1  ;;  %3372 = vmatpush3.msra.mxu0 %v2551_v1 }
 0x3c9   :  { %3373 = vmatprep.subr.mxu0 %v2566_v32  ;;  %v2541_v32 = vmax.f32 %v2163_v25, 0.0  ;;  %v2555_v19 = vmax.f32 %v2219_v7, 0.0 }
 0x3ca   :  { %v3800_v52 = vpop.f32.mrf.mxu1  ;;  %3374 = vmatpush3.msra.mxu0 %v2550_v13 }
 0x3cb   :  { %3375 = vmatprep.subr.mxu0 %v2565_v55 }
 0x3cc   :  { %v5284_v49 = vpop.f32.mrf.mxu1  ;;  %3898 = vmatmul.mubr.bf16.gmra.mxu1 %v5115_v51  ;;  %3376 = vmatpush3.msra.mxu0 %v2549_v23  ;;  %v2174_v51 = vadd.f32 %v5253_v57, %v5182_v50  ;;  %v2166_v50 = vadd.f32 %v5253_v57, %v5175_v46  ;;  %v2222_v46 = vadd.f32 %v5253_v57, %v5220_v21 }
 0x3cd   :  { %3377 = vmatprep.subr.mxu0 %v2564_v36  ;;  %3901 = vmatprep.mubr.msk.bf16.mxu1 %vm4177_vm1, %v4176_v2  ;;  %v2214_v21 = vadd.f32 %v5253_v57, %v5213_v63  ;;  %v2147_v63 = vadd.f32 %v5253_v57, %v5154_v26 }
 0x3ce   :  { %v3803_v44 = vpop.f32.mrf.mxu1  ;;  %3378 = vmatpush3.msra.mxu0 %v2548_v59  ;;  %v2544_v24 = vmax.f32 %v2174_v51, 0.0  ;;  %v2542_v18 = vmax.f32 %v2166_v50, 0.0  ;;  %v2556_v13 = vmax.f32 %v2222_v46, 0.0  ;;  %v2642_v46 = vld [vmem:[%s5630_s7 + $0x38] sm:$0xff] }
 0x3cf   :  { %3379 = vmatprep.subr.mxu0 %v2563_v60  ;;  %v2537_v11 = vmax.f32 %v2147_v63, 0.0 }
 0x3d0   :  { %v5297_v5 = vpop.f32.mrf.mxu1  ;;  %3380 = vmatpush3.msra.mxu0 %v2547_v12 }
 0x3d1   :  { %3381 = vmatprep.subr.mxu0 %v2562_v17 }
 0x3d2   :  { %v3804_v61 = vpop.f32.mrf.mxu1  ;;  %3382 = vmatpush3.msra.mxu0 %v2546_v14 }
 0x3d3   :  { %3383 = vmatprep.subr.mxu0 %v2561_v10 }
 0x3d4   :  { %v5307_v8 = vpop.f32.mrf.mxu1  ;;  %3902 = vmatmul.mubr.bf16.gmra.mxu1 %v5122_v16  ;;  %3384 = vmatpush3.msra.mxu0 %v2545_v37  ;;  %v2158_v16 = vadd.f32 %v5253_v57, %v5168_v22  ;;  %v2150_v22 = vadd.f32 %v5253_v57, %v5161_v35  ;;  %v2554_v35 = vmax.f32 %v2214_v21, 0.0 }
 0x3d5   :  { %3385 = vmatprep.subr.mxu0 %v2560_v27  ;;  %3905 = vmatprep.mubr.msk.bf16.mxu1 %vm4177_vm1, %v4176_v2 }
 0x3d6   :  { %v3807_v28 = vpop.f32.mrf.mxu1  ;;  %3386 = vmatpush3.msra.mxu0 %v2544_v24  ;;  %v2540_v48 = vmax.f32 %v2158_v16, 0.0  ;;  %v2538_v52 = vmax.f32 %v2150_v22, 0.0 }
 0x3d7   :  { %3387 = vmatprep.subr.mxu0 %v2559_v30 }
 0x3d8   :  { %v5320_v1 = vpop.f32.mrf.mxu1  ;;  %3388 = vmatpush3.msra.mxu0 %v2543_v47 }
 0x3d9   :  { %3389 = vmatprep.subr.mxu0 %v2558_v4 }
 0x3da   :  { %v3808_v15 = vpop.f32.mrf.mxu1  ;;  %3390 = vmatpush3.msra.mxu0 %v2542_v18  ;;  %v2638_v18 = vld [vmem:[%s5630_s7 + $0x18] sm:$0xff] }
 0x3db   :  { %3391 = vmatprep.subr.mxu0 %v2557_v33 }
 0x3dc   :  { %v5330_v55 = vpop.f32.mrf.mxu1  ;;  %3906 = vmatmul.mubr.bf16.gmra.mxu1 %v5130_v0  ;;  %3392 = vmatpush3.msra.mxu0 %v2541_v32  ;;  %v2553_v0 = vmax.f32 %v2211_v40, 0.0 }
 0x3dd   :  { %3393 = vmatprep.subr.mxu0 %v2556_v13  ;;  %3909 = vmatprep.mubr.msk.bf16.mxu1 %vm4177_vm1, %v4176_v2 }
 0x3de   :  { %v3811_v23 = vpop.f32.mrf.mxu1  ;;  %3394 = vmatpush3.msra.mxu0 %v2540_v48 }
 0x3df   :  { %3395 = vmatprep.subr.mxu0 %v2555_v19 }
 0x3e0   :  { %v5339_v45 = vpop.f32.mrf.mxu1  ;;  %3396 = vmatpush3.msra.mxu0 %v2539_v29 }
 0x3e1   :  { %3397 = vmatprep.subr.mxu0 %v2554_v35 }
 0x3e2   :  { %v3812_v36 = vpop.f32.mrf.mxu1  ;;  %3398 = vmatpush3.msra.mxu0 %v2538_v52 }
 0x3e3   :  { %3399 = vmatprep.subr.mxu0 %v2553_v0 }
 0x3e4   :  { %v5344_v26 = vpop.f32.mrf.mxu1  ;;  %3910 = vmatmul.mubr.bf16.gmra.mxu1 %v5135_v43  ;;  %3400 = vmatpush3.msra.mxu0 %v2537_v11 }
 0x3e5   :  { %3913 = vmatprep.mubr.msk.bf16.mxu1 %vm4177_vm1, %v4176_v2  ;;  %2721 = vmatmul.mubr.f32.vlgmr.msra.gmra.mxu0 %v2635_v62 }
 0x3e6   :  { %v3815_v59 = vpop.f32.mrf.mxu1 }
 0x3e8   :  { %v5349_v39 = vpop.f32.mrf.mxu1 }
 0x3ea   :  { %v3816_v60 = vpop.f32.mrf.mxu1 }
 0x3ec   :  { %v5351_v38 = vpop.f32.mrf.mxu1  ;;  %3914 = vmatmul.mubr.bf16.gmra.mxu1 %v5140_v56 }
 0x3ed   :  { %3917 = vmatprep.mubr.msk.bf16.mxu1 %vm4177_vm1, %v4176_v2 }
 0x3ee   :  { %v3819_v12 = vpop.f32.mrf.mxu1 }
 0x3f0   :  { %v5356_v44 = vpop.f32.mrf.mxu1 }
 0x3f2   :  { %v3820_v43 = vpop.f32.mrf.mxu1 }
 0x3f4   :  { %v5358_v42 = vpop.f32.mrf.mxu1  ;;  %3918 = vmatmul.mubr.bf16.gmra.mxu1 %v5145_v6 }
 0x3f5   :  { %3921 = vmatprep.mubr.msk.bf16.mxu1 %vm4177_vm1, %v4176_v2 }
 0x3f6   :  { %v3823_v17 = vpop.f32.mrf.mxu1 }
 0x3f8   :  { %v2325_v51 = vpop.f32.mrf.mxu1 }
 0x3f9   :  { %v2326_v12 = vadd.f32 %v5253_v57, %v2325_v51  ;;  %v2318_v51 = vadd.f32 %v5253_v57, %v5356_v44  ;;  %v2310_v44 = vadd.f32 %v5253_v57, %v5349_v39  ;;  %v2302_v39 = vadd.f32 %v5253_v57, %v5339_v45 }
 0x3fa   :  { %v3824_v14 = vpop.f32.mrf.mxu1  ;;  %v2294_v45 = vadd.f32 %v5253_v57, %v5320_v1  ;;  %v2286_v1 = vadd.f32 %v5253_v57, %v5297_v5  ;;  %v2278_v5 = vadd.f32 %v5253_v57, %v5276_v58 }
 0x3fc   :  { %v2330_v41 = vpop.f32.mrf.mxu1  ;;  %3922 = vmatmul.mubr.bf16.gmra.mxu1 %v5150_v3 }
 0x3fd   :  { %3925 = vmatprep.mubr.msk.bf16.mxu1 %vm4177_vm1, %v4176_v2  ;;  %v2331_v36 = vadd.f32 %v5253_v57, %v2330_v41 }
 0x3fe   :  { %v3827_v56 = vpop.f32.mrf.mxu1 }
 0x400   :  { %v2333_v10 = vpop.f32.mrf.mxu1 }
 0x401   :  { %v2334_v35 = vadd.f32 %v5253_v57, %v2333_v10  ;;  %v2323_v10 = vadd.f32 %v5253_v57, %v5358_v42  ;;  %v2315_v42 = vadd.f32 %v5253_v57, %v5351_v38  ;;  %v2307_v38 = vadd.f32 %v5253_v57, %v5344_v26 }
 0x402   :  { %v3828_v54 = vpop.f32.mrf.mxu1  ;;  %v2299_v26 = vadd.f32 %v5253_v57, %v5330_v55  ;;  %v2291_v55 = vadd.f32 %v5253_v57, %v5307_v8  ;;  %v2283_v8 = vadd.f32 %v5253_v57, %v5284_v49  ;;  %v2275_v49 = vadd.f32 %v5253_v57, %v5262_v9  ;;  %v2645_v9 = vld [vmem:[%s5630_s7 + $0x50] sm:$0xff] }
 0x403   :  { %v2584_v43 = vmax.f32 %v2334_v35, 0.0  ;;  %v2583_v54 = vmax.f32 %v2331_v36, 0.0  ;;  %v2576_v35 = vmax.f32 %v2302_v39, 0.0 }
 0x404   :  { %v5366_v37 = vpop.f32.mrf.mxu1  ;;  %3926 = vmatmul.mubr.bf16.gmra.mxu1 %v5157_v34  ;;  %v2643_v34 = vld [vmem:[%s5630_s7 + $0x40] sm:$0xff] }
 0x405   :  { %2725 = vmatprep.mubr.f32.mxu0 %v2643_v34 }
 0x406   :  { %v3831_v6 = vpop.f32.mrf.mxu1  ;;  %2726 = vmatmul.mubr.f32.gmra.mxu0 %v2642_v46 }
 0x407   :  { %2795 = vmatprep.mubr.f32.mxu0 %v2638_v18  ;;  %v2580_v18 = vmax.f32 %v2318_v51, 0.0  ;;  %v2570_v51 = vmax.f32 %v2278_v5, 0.0 }
 0x408   :  { %v5369_v61 = vpop.f32.mrf.mxu1 }
 0x40a   :  { %v3832_v31 = vpop.f32.mrf.mxu1 }
 0x40c   :  { %v5371_v27 = vpop.f32.mrf.mxu1 }
 0x40e   :  { %v3835_v50 = vpop.f32.mrf.mxu1 }
 0x40f   :  { %v2582_v50 = vmax.f32 %v2326_v12, 0.0 }
 0x410   :  { %v5373_v24 = vpop.f32.mrf.mxu1 }
 0x412   :  { %v3836_v3 = vpop.f32.mrf.mxu1 }
 0x414   :  { %v5375_v53 = vpop.f32.mrf.mxu1 }
 0x416   :  { %v3839_v2 = vpop.f32.mrf.mxu1 }
 0x418   :  { %v5377_v30 = vpop.f32.mrf.mxu1 }
 0x41a   :  { %v3840_v25 = vpop.f32.mrf.mxu1 }
 0x41c   :  { %v5379_v47 = vpop.f32.mrf.mxu1 }
 0x41e   :  { %v3843_v28 = vpop.f32.mrf.mxu1 }
 0x41f   :  { %v2581_v28 = vmax.f32 %v2323_v10, 0.0  ;;  %v2572_v10 = vmax.f32 %v2286_v1, 0.0 }
 0x420   :  { %v5387_v4 = vpop.f32.mrf.mxu1 }
 0x422   :  { %v3844_v16 = vpop.f32.mrf.mxu1 }
 0x424   :  { %v2370_v7 = vpop.f32.mrf.mxu1 }
 0x426   :  { %v3847_v33 = vpop.f32.mrf.mxu1 }
 0x428   :  { %v2373_v20 = vpop.f32.mrf.mxu1 }
 0x429   :  { %v2374_v46 = vadd.f32 %v5253_v57, %v2373_v20  ;;  %v2366_v20 = vadd.f32 %v5253_v57, %v5387_v4  ;;  %v2358_v4 = vadd.f32 %v5253_v57, %v5377_v30  ;;  %v2350_v30 = vadd.f32 %v5253_v57, %v5373_v24 }
 0x42a   :  { %v3848_v32 = vpop.f32.mrf.mxu1  ;;  %v2342_v24 = vadd.f32 %v5253_v57, %v5369_v61 }
 0x42b   :  { %v2371_v32 = vadd.f32 %v5253_v57, %v2370_v7  ;;  %v2363_v7 = vadd.f32 %v5253_v57, %v5379_v47  ;;  %v2355_v47 = vadd.f32 %v5253_v57, %v5375_v53  ;;  %v2347_v53 = vadd.f32 %v5253_v57, %v5371_v27 }
 0x42c   :  { %v2378_v15 = vpop.f32.mrf.mxu1  ;;  %v2339_v27 = vadd.f32 %v5253_v57, %v5366_v37  ;;  %v2586_v61 = vmax.f32 %v2342_v24, 0.0  ;;  %v2637_v37 = vld [vmem:[%s5630_s7 + $0x10] sm:$0xff] }
 0x42d   :  { %v2379_v2 = vadd.f32 %v5253_v57, %v2378_v15  ;;  %v2589_v12 = vmax.f32 %v2355_v47, 0.0 }
 0x42e   :  { %v3851_v21 = vpop.f32.mrf.mxu1  ;;  %v2585_v58 = vmax.f32 %v2339_v27, 0.0 }
 0x42f   :  { %v2595_v15 = vmax.f32 %v2379_v2, 0.0  ;;  %v2579_v21 = vmax.f32 %v2315_v42, 0.0  ;;  %v2569_v2 = vmax.f32 %v2275_v49, 0.0 }
 0x430   :  { %v2381_v13 = vpop.f32.mrf.mxu1 }
 0x431   :  { %v2382_v41 = vadd.f32 %v5253_v57, %v2381_v13 }
 0x432   :  { %v3852_v22 = vpop.f32.mrf.mxu1 }
 0x433   :  { %v2596_v16 = vmax.f32 %v2382_v41, 0.0  ;;  %v2594_v22 = vmax.f32 %v2374_v46, 0.0  ;;  %v2571_v41 = vmax.f32 %v2283_v8, 0.0  ;;  %v2640_v46 = vld [vmem:[%s5630_s7 + $0x28] sm:$0xff] }
 0x434   :  { %v2386_v48 = vpop.f32.mrf.mxu1 }
 0x435   :  { %v2387_v14 = vadd.f32 %v5253_v57, %v2386_v48  ;;  %v2578_v48 = vmax.f32 %v2310_v44, 0.0 }
 0x436   :  { %v3855_v40 = vpop.f32.mrf.mxu1 }
 0x437   :  { %v2597_v25 = vmax.f32 %v2387_v14, 0.0 }
 0x438   :  { %v2389_v19 = vpop.f32.mrf.mxu1 }
 0x439   :  { %v2390_v59 = vadd.f32 %v5253_v57, %v2389_v19  ;;  %v2593_v19 = vmax.f32 %v2371_v32, 0.0 }
 0x43a   :  { %v3856_v63 = vpop.f32.mrf.mxu1 }
 0x43b   :  { %v2598_v31 = vmax.f32 %v2390_v59, 0.0  ;;  %v2577_v63 = vmax.f32 %v2307_v38, 0.0  ;;  %v2574_v59 = vmax.f32 %v2294_v45, 0.0 }
 0x43c   :  { %v2394_v29 = vpop.f32.mrf.mxu1 }
 0x43d   :  { %v2395_v0 = vadd.f32 %v5253_v57, %v2394_v29 }
 0x43e   :  { %v3859_v23 = vpop.f32.mrf.mxu1 }
 0x43f   :  { %v2599_v56 = vmax.f32 %v2395_v0, 0.0  ;;  %v2592_v23 = vmax.f32 %v2366_v20, 0.0  ;;  %v2591_v0 = vmax.f32 %v2363_v7, 0.0 }
 0x440   :  { %v2397_v52 = vpop.f32.mrf.mxu1 }
 0x441   :  { %v2398_v11 = vadd.f32 %v5253_v57, %v2397_v52 }
 0x442   :  { %v3860_v62 = vpop.f32.mrf.mxu1 }
 0x443   :  { %v2600_v60 = vmax.f32 %v2398_v11, 0.0  ;;  %v2575_v11 = vmax.f32 %v2299_v26, 0.0  ;;  %v2590_v62 = vmax.f32 %v2358_v4, 0.0 }
 0x444   :  { %v5398_v17 = vpop.f32.mrf.mxu1 }
 0x445   :  { %3407 = vmatprep.subr.mxu0 %v2600_v60 }
 0x446   :  { %v3863_v6 = vpop.f32.mrf.mxu1  ;;  %3408 = vmatpush3.msra.mxu0 %v2584_v43  ;;  %v2573_v43 = vmax.f32 %v2291_v55, 0.0 }
 0x447   :  { %3409 = vmatprep.subr.mxu0 %v2599_v56  ;;  %v2588_v56 = vmax.f32 %v2350_v30, 0.0  ;;  %v2587_v6 = vmax.f32 %v2347_v53, 0.0 }
 0x448   :  { %v5406_v3 = vpop.f32.mrf.mxu1  ;;  %3410 = vmatpush3.msra.mxu0 %v2583_v54 }
 0x449   :  { %3411 = vmatprep.subr.mxu0 %v2598_v31 }
 0x44a   :  { %v3864_v34 = vpop.f32.mrf.mxu1  ;;  %3412 = vmatpush3.msra.mxu0 %v2582_v50 }
 0x44b   :  { %3413 = vmatprep.subr.mxu0 %v2597_v25  ;;  %v2644_v34 = vld [vmem:[%s5630_s7 + $0x48] sm:$0xff] }
 0x44c   :  { %v5414_v33 = vpop.f32.mrf.mxu1  ;;  %3414 = vmatpush3.msra.mxu0 %v2581_v28 }
 0x44d   :  { %3415 = vmatprep.subr.mxu0 %v2596_v16 }
 0x44e   :  { %v3867_v13 = vpop.f32.mrf.mxu1  ;;  %3416 = vmatpush3.msra.mxu0 %v2580_v18 }
 0x44f   :  { %3417 = vmatprep.subr.mxu0 %v2595_v15 }
 0x450   :  { %v5423_v40 = vpop.f32.mrf.mxu1  ;;  %3418 = vmatpush3.msra.mxu0 %v2579_v21 }
 0x451   :  { %3419 = vmatprep.subr.mxu0 %v2594_v22 }
 0x452   :  { %v3868_v29 = vpop.f32.mrf.mxu1  ;;  %3420 = vmatpush3.msra.mxu0 %v2578_v48 }
 0x453   :  { %3421 = vmatprep.subr.mxu0 %v2593_v19 }
 0x454   :  { %v5433_v52 = vpop.f32.mrf.mxu1  ;;  %3422 = vmatpush3.msra.mxu0 %v2577_v63 }
 0x455   :  { %3423 = vmatprep.subr.mxu0 %v2592_v23 }
 0x456   :  { %v3871_v36 = vpop.f32.mrf.mxu1  ;;  %3424 = vmatpush3.msra.mxu0 %v2576_v35 }
 0x457   :  { %3425 = vmatprep.subr.mxu0 %v2591_v0 }
 0x458   :  { %v5443_v60 = vpop.f32.mrf.mxu1  ;;  %3426 = vmatpush3.msra.mxu0 %v2575_v11 }
 0x459   :  { %3427 = vmatprep.subr.mxu0 %v2590_v62 }
 0x45a   :  { %v3872_v14 = vpop.f32.mrf.mxu1  ;;  %3428 = vmatpush3.msra.mxu0 %v2574_v59 }
 0x45b   :  { %3429 = vmatprep.subr.mxu0 %v2589_v12 }
 0x45c   :  { %v5453_v54 = vpop.f32.mrf.mxu1  ;;  %3430 = vmatpush3.msra.mxu0 %v2573_v43 }
 0x45d   :  { %3431 = vmatprep.subr.mxu0 %v2588_v56 }
 0x45e   :  { %v3875_v31 = vpop.f32.mrf.mxu1  ;;  %3432 = vmatpush3.msra.mxu0 %v2572_v10 }
 0x45f   :  { %3433 = vmatprep.subr.mxu0 %v2587_v6 }
 0x460   :  { %v5459_v50 = vpop.f32.mrf.mxu1  ;;  %3434 = vmatpush3.msra.mxu0 %v2571_v41 }
 0x461   :  { %3435 = vmatprep.subr.mxu0 %v2586_v61 }
 0x462   :  { %v3876_v25 = vpop.f32.mrf.mxu1  ;;  %3436 = vmatpush3.msra.mxu0 %v2570_v51 }
 0x463   :  { %3437 = vmatprep.subr.mxu0 %v2585_v58 }
 0x464   :  { %v5467_v42 = vpop.f32.mrf.mxu1  ;;  %3438 = vmatpush3.msra.mxu0 %v2569_v2 }
 0x465   :  { %2796 = vmatmul.mubr.f32.vlgmr.msra.gmra.mxu0 %v2637_v37 }
 0x466   :  { %v3879_v28 = vpop.f32.mrf.mxu1  ;;  %2800 = vmatprep.mubr.f32.mxu0 %v2645_v9 }
 0x468   :  { %v5475_v16 = vpop.f32.mrf.mxu1 }
 0x469   :  { %2801 = vmatmul.mubr.f32.gmra.mxu0 %v2644_v34 }
 0x46a   :  { %v3880_v44 = vpop.f32.mrf.mxu1  ;;  %2870 = vmatprep.mubr.f32.mxu0 %v2640_v46 }
 0x46c   :  { %v5477_v18 = vpop.f32.mrf.mxu1 }
 0x46e   :  { %v3883_v32 = vpop.f32.mrf.mxu1 }
 0x470   :  { %v2445_v15 = vpop.f32.mrf.mxu1 }
 0x472   :  { %v3884_v38 = vpop.f32.mrf.mxu1 }
 0x474   :  { %v2450_v21 = vpop.f32.mrf.mxu1 }
 0x476   :  { %v3887_v13 = vpop.f32.mrf.mxu1 }
 0x477   :  { %v2451_v13 = vadd.f32 %v5253_v57, %v2450_v21  ;;  %v2443_v21 = vadd.f32 %v5253_v57, %v5477_v18 }
 0x478   :  { %v2453_v20 = vpop.f32.mrf.mxu1 }
 0x479   :  { %v2454_v34 = vadd.f32 %v5253_v57, %v2453_v20  ;;  %v2611_v18 = vmax.f32 %v2443_v21, 0.0  ;;  %v2963_v21 = vld [vmem:[%s5631_s8 + $0x38] sm:$0xff] }
 0x47a   :  { %v3888_v22 = vpop.f32.mrf.mxu1 }
 0x47c   :  { %v2458_v39 = vpop.f32.mrf.mxu1 }
 0x47d   :  { %v2459_v25 = vadd.f32 %v5253_v57, %v2458_v39 }
 0x47e   :  { %v3891_v48 = vpop.f32.mrf.mxu1 }
 0x47f   :  { %v2615_v22 = vmax.f32 %v2459_v25, 0.0 }
 0x480   :  { %v2461_v7 = vpop.f32.mrf.mxu1 }
 0x481   :  { %v2462_v61 = vadd.f32 %v5253_v57, %v2461_v7 }
 0x482   :  { %v3892_v19 = vpop.f32.mrf.mxu1 }
 0x483   :  { %v2616_v46 = vmax.f32 %v2462_v61, 0.0  ;;  %v2446_v19 = vadd.f32 %v5253_v57, %v2445_v15  ;;  %v2438_v15 = vadd.f32 %v5253_v57, %v5475_v16 }
 0x484   :  { %v5479_v26 = vpop.f32.mrf.mxu1 }
 0x486   :  { %v3895_v63 = vpop.f32.mrf.mxu1 }
 0x487   :  { %v2614_v63 = vmax.f32 %v2454_v34, 0.0 }
 0x488   :  { %v5481_v29 = vpop.f32.mrf.mxu1 }
 0x48a   :  { %v3896_v4 = vpop.f32.mrf.mxu1 }
 0x48c   :  { %v5483_v23 = vpop.f32.mrf.mxu1 }
 0x48e   :  { %v3899_v45 = vpop.f32.mrf.mxu1 }
 0x490   :  { %v5485_v35 = vpop.f32.mrf.mxu1 }
 0x492   :  { %v3900_v47 = vpop.f32.mrf.mxu1 }
 0x493   :  { %v2613_v47 = vmax.f32 %v2451_v13, 0.0 }
 0x494   :  { %v5487_v0 = vpop.f32.mrf.mxu1 }
 0x496   :  { %v3903_v55 = vpop.f32.mrf.mxu1 }
 0x498   :  { %v5489_v11 = vpop.f32.mrf.mxu1 }
 0x49a   :  { %v3904_v36 = vpop.f32.mrf.mxu1 }
 0x49c   :  { %v5491_v30 = vpop.f32.mrf.mxu1 }
 0x49d   :  { %v2491_v16 = vadd.f32 %v5253_v57, %v5491_v30  ;;  %v2483_v30 = vadd.f32 %v5253_v57, %v5487_v0  ;;  %v2475_v0 = vadd.f32 %v5253_v57, %v5483_v23  ;;  %v2467_v23 = vadd.f32 %v5253_v57, %v5479_v26 }
 0x49e   :  { %v3907_v62 = vpop.f32.mrf.mxu1 }
 0x4a0   :  { %v2493_v1 = vpop.f32.mrf.mxu1 }
 0x4a2   :  { %v3908_v59 = vpop.f32.mrf.mxu1 }
 0x4a3   :  { %v2612_v59 = vmax.f32 %v2446_v19, 0.0  ;;  %v2968_v19 = vld [vmem:[%s5631_s8 + $0x60] sm:$0xff] }
 0x4a4   :  { %v2498_v53 = vpop.f32.mrf.mxu1 }
 0x4a6   :  { %v3911_v12 = vpop.f32.mrf.mxu1 }
 0x4a7   :  { %v2499_v12 = vadd.f32 %v5253_v57, %v2498_v53 }
 0x4a8   :  { %v2501_v8 = vpop.f32.mrf.mxu1 }
 0x4a9   :  { %v2502_v36 = vadd.f32 %v5253_v57, %v2501_v8  ;;  %v2430_v8 = vadd.f32 %v5253_v57, %v5459_v50  ;;  %v2625_v53 = vmax.f32 %v2499_v12, 0.0  ;;  %v2422_v50 = vadd.f32 %v5253_v57, %v5443_v60  ;;  %v2956_v12 = vld [vmem:[%s5631_s8] sm:$0xff] }
 0x4aa   :  { %v3912_v43 = vpop.f32.mrf.mxu1  ;;  %v2414_v60 = vadd.f32 %v5253_v57, %v5423_v40  ;;  %v2406_v40 = vadd.f32 %v5253_v57, %v5406_v3  ;;  %v2617_v3 = vmax.f32 %v2467_v23, 0.0 }
 0x4ab   :  { %v2606_v61 = vmax.f32 %v2422_v50, 0.0 }
 0x4ac   :  { %v2506_v14 = vpop.f32.mrf.mxu1  ;;  %v2604_v25 = vmax.f32 %v2414_v60, 0.0  ;;  %v2602_v34 = vmax.f32 %v2406_v40, 0.0 }
 0x4ad   :  { %v2507_v4 = vadd.f32 %v5253_v57, %v2506_v14  ;;  %v2435_v14 = vadd.f32 %v5253_v57, %v5467_v42 }
 0x4ae   :  { %v3915_v24 = vpop.f32.mrf.mxu1 }
 0x4af   :  { %v2627_v43 = vmax.f32 %v2507_v4, 0.0  ;;  %v2494_v24 = vadd.f32 %v5253_v57, %v2493_v1  ;;  %v2609_v42 = vmax.f32 %v2435_v14, 0.0  ;;  %v2486_v1 = vadd.f32 %v5253_v57, %v5489_v11  ;;  %v2965_v4 = vld [vmem:[%s5631_s8 + $0x48] sm:$0xff] }
 0x4b0   :  { %v2509_v56 = vpop.f32.mrf.mxu1  ;;  %v2478_v11 = vadd.f32 %v5253_v57, %v5485_v35  ;;  %v2470_v35 = vadd.f32 %v5253_v57, %v5481_v29 }
 0x4b1   :  { %v2510_v39 = vadd.f32 %v5253_v57, %v2509_v56  ;;  %v2626_v56 = vmax.f32 %v2502_v36, 0.0  ;;  %v2960_v36 = vld [vmem:[%s5631_s8 + $0x20] sm:$0xff] }
 0x4b2   :  { %v3916_v5 = vpop.f32.mrf.mxu1 }
 0x4b3   :  { %v2628_v62 = vmax.f32 %v2510_v39, 0.0  ;;  %v2610_v5 = vmax.f32 %v2438_v15, 0.0  ;;  %v2970_v39 = vld [vmem:[%s5631_s8 + $0x70] sm:$0xff] }
 0x4b4   :  { %v2514_v10 = vpop.f32.mrf.mxu1  ;;  %v2958_v15 = vld [vmem:[%s5631_s8 + $0x10] sm:$0xff] }
 0x4b5   :  { %v2515_v32 = vadd.f32 %v5253_v57, %v2514_v10  ;;  %v2427_v10 = vadd.f32 %v5253_v57, %v5453_v54  ;;  %v2419_v54 = vadd.f32 %v5253_v57, %v5433_v52  ;;  %v2411_v52 = vadd.f32 %v5253_v57, %v5414_v33 }
 0x4b6   :  { %v3919_v27 = vpop.f32.mrf.mxu1  ;;  %v2403_v33 = vadd.f32 %v5253_v57, %v5398_v17  ;;  %v2639_v17 = vld [vmem:[%s5630_s7 + $0x20] sm:$0xff] }
 0x4b7   :  { %v2629_v45 = vmax.f32 %v2515_v32, 0.0  ;;  %v2624_v27 = vmax.f32 %v2494_v24, 0.0 }
 0x4b8   :  { %v2517_v6 = vpop.f32.mrf.mxu1  ;;  %v2601_v26 = vmax.f32 %v2403_v33, 0.0 }
 0x4b9   :  { %v2518_v9 = vadd.f32 %v5253_v57, %v2517_v6  ;;  %v2608_v6 = vmax.f32 %v2430_v8, 0.0 }
 0x4ba   :  { %v3920_v49 = vpop.f32.mrf.mxu1 }
 0x4bb   :  { %v2630_v7 = vmax.f32 %v2518_v9, 0.0  ;;  %v2623_v49 = vmax.f32 %v2491_v16, 0.0  ;;  %v2603_v9 = vmax.f32 %v2411_v52, 0.0 }
 0x4bc   :  { %v2522_v41 = vpop.f32.mrf.mxu1 }
 0x4bd   :  { %v2523_v58 = vadd.f32 %v5253_v57, %v2522_v41  ;;  %v2607_v41 = vmax.f32 %v2427_v10, 0.0 }
 0x4be   :  { %v3923_v31 = vpop.f32.mrf.mxu1 }
 0x4bf   :  { %v2631_v38 = vmax.f32 %v2523_v58, 0.0  ;;  %v2622_v31 = vmax.f32 %v2486_v1, 0.0  ;;  %v2605_v58 = vmax.f32 %v2419_v54, 0.0 }
 0x4c0   :  { %v2525_v51 = vpop.f32.mrf.mxu1 }
 0x4c1   :  { %v2526_v2 = vadd.f32 %v5253_v57, %v2525_v51  ;;  %v2621_v51 = vmax.f32 %v2483_v30, 0.0 }
 0x4c2   :  { %v3924_v37 = vpop.f32.mrf.mxu1 }
 0x4c3   :  { %v2632_v28 = vmax.f32 %v2526_v2, 0.0  ;;  %v2620_v2 = vmax.f32 %v2478_v11, 0.0  ;;  %v2619_v37 = vmax.f32 %v2475_v0, 0.0 }
 0x4c4   :  { %v5499_v44 = vpop.f32.mrf.mxu1 }
 0x4c5   :  { %3445 = vmatprep.subr.mxu0 %v2632_v28  ;;  %v2618_v28 = vmax.f32 %v2470_v35, 0.0 }
 0x4c6   :  { %v3927_v48 = vpop.f32.mrf.mxu1  ;;  %3446 = vmatpush3.msra.mxu0 %v2616_v46  ;;  %v2531_v46 = vadd.f32 %v5253_v57, %v5499_v44  ;;  %v2971_v44 = vld [vmem:[%s5631_s8 + $0x78] sm:$0xff] }
 0x4c7   :  { %3447 = vmatprep.subr.mxu0 %v2631_v38  ;;  %v2647_v38 = vld [vmem:[%s5630_s7 + $0x60] sm:$0xff]  ;;  %v2648_v48 = vld [vmem:[%s5630_s7 + $0x68] sm:$0xff] }
 0x4c8   :  { %v5505_v20 = vpop.f32.mrf.mxu1  ;;  %3448 = vmatpush3.msra.mxu0 %v2615_v22  ;;  %v2633_v13 = vmax.f32 %v2531_v46, 0.0  ;;  %v2641_v22 = vld [vmem:[%s5630_s7 + $0x30] sm:$0xff] }
 0x4c9   :  { %3449 = vmatprep.subr.mxu0 %v2630_v7  ;;  %v2534_v29 = vadd.f32 %v5253_v57, %v5505_v20  ;;  %v2646_v57 = vld [vmem:[%s5630_s7 + $0x58] sm:$0xff]  ;;  %v2969_v7 = vld [vmem:[%s5631_s8 + $0x68] sm:$0xff]  ;;  %v2966_v20 = vld [vmem:[%s5631_s8 + $0x50] sm:$0xff] }
 0x4ca   :  { %v3928_v55 = vpop.f32.mrf.mxu1  ;;  %3450 = vmatpush3.msra.mxu0 %v2614_v63  ;;  %v2967_v63 = vld [vmem:[%s5631_s8 + $0x58] sm:$0xff] }
 0x4cb   :  { %3451 = vmatprep.subr.mxu0 %v2629_v45  ;;  %v2634_v32 = vmax.f32 %v2534_v29, 0.0  ;;  %v2964_v45 = vld [vmem:[%s5631_s8 + $0x40] sm:$0xff]  ;;  %v2961_v55 = vld [vmem:[%s5631_s8 + $0x28] sm:$0xff] }
 0x4cc   :  { %3452 = vmatpush3.msra.mxu0 %v2613_v47  ;;  %v2962_v47 = vld [vmem:[%s5631_s8 + $0x30] sm:$0xff] }
 0x4cd   :  { %3453 = vmatprep.subr.mxu0 %v2628_v62  ;;  %v2959_v62 = vld [vmem:[%s5631_s8 + $0x18] sm:$0xff] }
 0x4ce   :  { %3454 = vmatpush3.msra.mxu0 %v2612_v59  ;;  %v2957_v59 = vld [vmem:[%s5631_s8 + $0x8] sm:$0xff] }
 0x4cf   :  { %3455 = vmatprep.subr.mxu0 %v2627_v43  ;;  %v3401_v43 = vpop.f32.mrf.mxu0 }
 0x4d0   :  { %3456 = vmatpush3.msra.mxu0 %v2611_v18 }
 0x4d1   :  { %3457 = vmatprep.subr.mxu0 %v2626_v56  ;;  %v3402_v14 = vpop.f32.mrf.mxu0 }
 0x4d2   :  { %3458 = vmatpush3.msra.mxu0 %v2610_v5 }
 0x4d3   :  { %3459 = vmatprep.subr.mxu0 %v2625_v53  ;;  %v3404_v18 = vpop.f32.mrf.mxu0 }
 0x4d4   :  { %3460 = vmatpush3.msra.mxu0 %v2609_v42  ;;  %v3403_v42 = vadd.f32 %v3402_v14, %v3401_v43 }
 0x4d5   :  { %3461 = vmatprep.subr.mxu0 %v2624_v27  ;;  %v3405_v24 = vpop.f32.mrf.mxu0 }
 0x4d6   :  { %3462 = vmatpush3.msra.mxu0 %v2608_v6  ;;  %v3406_v1 = vadd.f32 %v3405_v24, %v3404_v18 }
 0x4d7   :  { %3463 = vmatprep.subr.mxu0 %v2623_v49 }
 0x4d8   :  { %3464 = vmatpush3.msra.mxu0 %v2607_v41 }
 0x4d9   :  { %3465 = vmatprep.subr.mxu0 %v2622_v31 }
 0x4da   :  { %3466 = vmatpush3.msra.mxu0 %v2606_v61 }
 0x4db   :  { %3467 = vmatprep.subr.mxu0 %v2621_v51 }
 0x4dc   :  { %3468 = vmatpush3.msra.mxu0 %v2605_v58  ;;  %v3252_v58 = vld [vmem:[%s5632_s9] ss:$0 sm:$0xff] }
 0x4dd   :  { %3469 = vmatprep.subr.mxu0 %v2620_v2 }
 0x4de   :  { %3470 = vmatpush3.msra.mxu0 %v2604_v25 }
 0x4df   :  { %3471 = vmatprep.subr.mxu0 %v2619_v37 }
 0x4e0   :  { %3472 = vmatpush3.msra.mxu0 %v2603_v9 }
 0x4e1   :  { %3473 = vmatprep.subr.mxu0 %v2618_v28 }
 0x4e2   :  { %3474 = vmatpush3.msra.mxu0 %v2602_v34 }
 0x4e3   :  { %3475 = vmatprep.subr.mxu0 %v2617_v3 }
 0x4e4   :  { %3476 = vmatpush3.msra.mxu0 %v2601_v26 }
 0x4e5   :  { %2871 = vmatmul.mubr.f32.vlgmr.msra.gmra.mxu0 %v2639_v17  ;;  %3929 = vmatprep.subr.mxu0 %v2634_v32 }
 0x4e6   :  { %3930 = vmatpush3.msra.mxu0 %v2634_v32  ;;  %2875 = vmatprep.mubr.f32.mxu0 %v2647_v38 }
 0x4e7   :  { %3931 = vmatprep.subr.mxu0 %v2633_v13 }
 0x4e8   :  { %3932 = vmatpush3.msra.mxu0 %v2633_v13 }
 0x4e9   :  { %2876 = vmatmul.mubr.f32.gmra.mxu0 %v2646_v57  ;;  %3936 = vmatprep.subr.mxu0 %v2971_v44 }
 0x4ea   :  { %3933 = vmatprep.mubr.msk.f32.mxu0 %vm2649_vm2, %v2641_v22 }
 0x4ed   :  { %3934 = vmatmul.mubr.msk.f32.vlgmr.msra.gmra.mxu0 %vm2649_vm2, %v2648_v48 }
 0x4ee   :  { %3937 = vmatpush3.msra.mxu0 %v2971_v44 }
 0x4ef   :  { %3938 = vmatprep.subr.mxu0 %v2970_v39 }
 0x4f0   :  { %3939 = vmatpush3.msra.mxu0 %v2970_v39 }
 0x4f1   :  { %3940 = vmatprep.subr.mxu0 %v2969_v7 }
 0x4f2   :  { %3941 = vmatpush3.msra.mxu0 %v2969_v7 }
 0x4f3   :  { %3942 = vmatprep.subr.mxu0 %v2968_v19 }
 0x4f4   :  { %3943 = vmatpush3.msra.mxu0 %v2968_v19 }
 0x4f5   :  { %3944 = vmatprep.subr.mxu0 %v2967_v63 }
 0x4f6   :  { %3945 = vmatpush3.msra.mxu0 %v2967_v63 }
 0x4f7   :  { %3946 = vmatprep.subr.mxu0 %v2966_v20 }
 0x4f8   :  { %3947 = vmatpush3.msra.mxu0 %v2966_v20 }
 0x4f9   :  { %3948 = vmatprep.subr.mxu0 %v2965_v4 }
 0x4fa   :  { %3949 = vmatpush3.msra.mxu0 %v2965_v4 }
 0x4fb   :  { %3950 = vmatprep.subr.mxu0 %v2964_v45 }
 0x4fc   :  { %3951 = vmatpush3.msra.mxu0 %v2964_v45 }
 0x4fd   :  { %3952 = vmatprep.subr.mxu0 %v2963_v21 }
 0x4fe   :  { %3953 = vmatpush3.msra.mxu0 %v2963_v21 }
 0x4ff   :  { %3954 = vmatprep.subr.mxu0 %v2962_v47 }
 0x500   :  { %3955 = vmatpush3.msra.mxu0 %v2962_v47 }
 0x501   :  { %3956 = vmatprep.subr.mxu0 %v2961_v55 }
 0x502   :  { %3957 = vmatpush3.msra.mxu0 %v2961_v55 }
 0x503   :  { %3958 = vmatprep.subr.mxu0 %v2960_v36 }
 0x504   :  { %3959 = vmatpush3.msra.mxu0 %v2960_v36 }
 0x505   :  { %3960 = vmatprep.subr.mxu0 %v2959_v62 }
 0x506   :  { %3961 = vmatpush3.msra.mxu0 %v2959_v62 }
 0x507   :  { %3962 = vmatprep.subr.mxu0 %v2958_v15 }
 0x508   :  { %3963 = vmatpush3.msra.mxu0 %v2958_v15 }
 0x509   :  { %3964 = vmatprep.subr.mxu0 %v2957_v59 }
 0x50a   :  { %3965 = vmatpush3.msra.mxu0 %v2957_v59 }
 0x50b   :  { %3966 = vmatprep.subr.mxu0 %v2956_v12 }
 0x50c   :  { %3967 = vmatpush3.msra.mxu0 %v2956_v12 }
 0x525   :  { %v3439_v56 = vpop.f32.mrf.mxu0 }
 0x527   :  { %v3440_v8 = vpop.f32.mrf.mxu0 }
 0x528   :  { %v3441_v27 = vadd.f32 %v3440_v8, %v3439_v56 }
 0x529   :  { %v3442_v5 = vpop.f32.mrf.mxu0 }
 0x52a   :  { %v2798_v54 = vadd.f32 %v3441_v27, %v3403_v42 }
 0x52b   :  { %v3443_v16 = vpop.f32.mrf.mxu0 }
 0x52c   :  { %v3444_v50 = vadd.f32 %v3443_v16, %v3442_v5 }
 0x52e   :  { %v2803_v41 = vadd.f32 %v3444_v50, %v3406_v1 }
 0x5a5   :  { %v3477_v53 = vpop.f32.mrf.mxu0 }
 0x5a7   :  { %v3478_v10 = vpop.f32.mrf.mxu0 }
 0x5a8   :  { %v3479_v30 = vadd.f32 %v3478_v10, %v3477_v53 }
 0x5a9   :  { %v3480_v6 = vpop.f32.mrf.mxu0 }
 0x5aa   :  { %v2873_v61 = vadd.f32 %v3479_v30, %v2798_v54 }
 0x5ab   :  { %v3481_v49 = vpop.f32.mrf.mxu0 }
 0x5ac   :  { %v3482_v11 = vadd.f32 %v3481_v49, %v3480_v6 }
 0x5ad   :  { %v3935_v31 = vpop.f32.mrf.mxu0 }
 0x5ae   :  { %v2878_v60 = vadd.f32 %v3482_v11, %v2803_v41 }
 0x5af   :  { %v2947_v0 = vpop.f32.mrf.mxu0 }
 0x5b0   :  { %v2953_v51 = vadd.f32 %v3935_v31, %v2878_v60  ;;  %v2948_v52 = vadd.f32 %v2947_v0, %v2873_v61 }
 0x5b2   :  { %3968 = vmatprep.mubr.f32.mxu0 %v2948_v52 }
 0x5b3   :  { %3969 = vmatmul.mubr.f32.vlgmr.msra.gmra.mxu0 %v2953_v51 }
 0x673   :  { %v3970_v35 = vpop.f32.mrf.mxu0 }
 0x674   :  { %v3051_v2 = vadd.f32 %v3970_v35, %v3252_v58 }
 0x675   :  { %v3045_v40 = vpop.f32.mrf.mxu0 }
 0x676   :  { %v3254_v25 = vmul.f32 -1.442695, %v3051_v2  ;;  %v3046_v23 = vadd.f32 %v3252_v58, %v3045_v40 }
 0x678   :  { %4165 = vpow2.f32 %v3254_v25  ;;  %v3253_v37 = vmul.f32 -1.442695, %v3046_v23 }
 0x67a   :  { %4167 = vpow2.f32 %v3253_v37 }
 0x685   :  { %v4166_v33 = vpop.eup %4165 }
 0x686   :  { %v3061_v9 = vadd.f32 1.0, %v4166_v33 }
 0x687   :  { %v4168_v28 = vpop.eup %4167 }
 0x688   :  { %4169 = vrcp.f32 %v3061_v9  ;;  %v3060_v29 = vadd.f32 1.0, %v4168_v28 }
 0x68a   :  { %4171 = vrcp.f32 %v3060_v29 }
 0x695   :  { %v4170_v34 = vpop.eup %4169 }
 0x696   :  { %3067 = vst [vmem:[%s5633_s10 + $0x8] sm:$0xff] %v4170_v34 }
 0x697   :  { %v4172_v3 = vpop.eup %4171 }
 0x698   :  { %3066 = vst [vmem:[%s5633_s10] sm:$0xff] %v4172_v3 }

</bundles_post_ra>
